<compile_context>
chip_gen: v7x
topology: tpu7x:2x2x1
jax: 0.10.0
libtpu: 0.0.40
codegen_flags: <defaults>
</compile_context>

<pallas_src>
import jax
import jax.numpy as jnp
from jax.experimental import pallas as pl
from jax.experimental.pallas import tpu as pltpu

LN_EPS = 1e-5          # torch nn.LayerNorm default
MAX_ROW_TILE = 256     # keeps >=4 grid steps at B~1000 (v7x megacore split)


def _round_up(n, m):
    return (n + m - 1) // m * m


def _row_tiling(batch):
    """Row tile (multiple of 8, <= MAX_ROW_TILE) and the padded batch size."""
    b8 = _round_up(batch, 8)
    tile = min(MAX_ROW_TILE, b8)
    return tile, _round_up(batch, tile)


# --------------------------------------------------------------------------
# Fused kernel
# --------------------------------------------------------------------------

def _layernorm(x, gamma, beta):
    mu = jnp.mean(x, axis=-1, keepdims=True)
    xc = x - mu
    var = jnp.mean(xc * xc, axis=-1, keepdims=True)
    return xc * jax.lax.rsqrt(var + LN_EPS) * gamma + beta


def _make_fused_kernel(kinds):
    """kinds: tuple of ('linear', apply_sigmoid) / ('enc',) layer tags."""

    def kernel(*refs):
        x_ref, o_ref = refs[0], refs[-1]
        it = iter(refs[1:-1])
        x = x_ref[...]
        for kind in kinds:
            if kind[0] == 'linear':
                w, b = next(it), next(it)
                x = jnp.dot(x, w[...],
                            preferred_element_type=jnp.float32) + b[...]
                if kind[1]:
                    x = jax.nn.sigmoid(x)
            else:
                # Encoder layer. The SENet scale (input-independent) has been
                # folded into the preceding Linear, so:
                #   attention(x)+x == already applied; start with LayerNorm1.
                g1, b1, w1, bb1, w2, bb2, g2, b2 = (next(it) for _ in range(8))
                y = _layernorm(x, g1[...], b1[...])
                h = jnp.dot(y, w1[...],
                            preferred_element_type=jnp.float32) + bb1[...]
                h = h * jax.nn.sigmoid(h)                      # SiLU
                ff = jnp.dot(h, w2[...],
                             preferred_element_type=jnp.float32) + bb2[...]
                # feedforward(y)+y == (y + bottleneck(y)) + y == 2*y + ff
                x = _layernorm(2.0 * y + ff, g2[...], b2[...])
        o_ref[...] = x.astype(o_ref.dtype)

    return kernel


# --------------------------------------------------------------------------
# Parameters
# --------------------------------------------------------------------------

def init_mlp_params(key, embedding_dim):
    E = embedding_dim
    keys = iter(jax.random.split(key, 64))
    nk = lambda: next(keys)

    def lin_w(kin, kout):   # torch Linear weight (kout, kin), stored transposed
        return jax.random.normal(nk(), (kin, kout), jnp.float32) * (kin ** -0.5)

    def lin_b(kin, kout):
        return jax.random.normal(nk(), (1, kout), jnp.float32) * (kin ** -0.5)

    def enc_params(C, r):
        Cr = C // r
        return dict(
            att_emb=jax.random.normal(nk(), (1, C), jnp.float32),
            att_w1=lin_w(C, Cr), att_w2=lin_w(Cr, C),
            ln1_g=jnp.ones((1, C), jnp.float32),
            ln1_b=jnp.zeros((1, C), jnp.float32),
            ff_w1=lin_w(C, Cr), ff_b1=lin_b(C, Cr),
            ff_w2=lin_w(Cr, C), ff_b2=lin_b(Cr, C),
            ln2_g=jnp.ones((1, C), jnp.float32),
            ln2_b=jnp.zeros((1, C), jnp.float32),
        )

    K_in = 2 * E + 1
    K_pad = _round_up(K_in, 128)   # lane-dense first-layer input width
    w0 = jnp.zeros((K_pad, 128), jnp.float32).at[:K_in].set(lin_w(K_in, 128))

    # Final 128->1 projection padded to a lane-dense (128,128); only column 0
    # is real and the wrapper slices it back out (avoids masked vst.msk).
    w_last = jnp.zeros((128, 128), jnp.float32).at[:, :1].set(lin_w(128, 1))
    b_last = jnp.zeros((1, 128), jnp.float32).at[:, :1].set(lin_b(128, 1))

    encoder = [
        ('linear', dict(w=w0, b=lin_b(K_in, 128), sigmoid=False)),
        ('enc', enc_params(128, 2)),
        ('linear', dict(w=lin_w(128, 256), b=lin_b(128, 256), sigmoid=False)),
        ('enc', enc_params(256, 4)),
        ('linear', dict(w=lin_w(256, 256), b=lin_b(256, 256), sigmoid=False)),
        ('enc', enc_params(256, 8)),
        ('linear', dict(w=lin_w(256, 256), b=lin_b(256, 256), sigmoid=False)),
        ('enc', enc_params(256, 8)),
        ('linear', dict(w=lin_w(256, 256), b=lin_b(256, 256), sigmoid=False)),
        ('enc', enc_params(256, 4)),
        ('linear', dict(w=lin_w(256, 128), b=lin_b(256, 128), sigmoid=False)),
        ('enc', enc_params(128, 2)),
        ('linear', dict(w=w_last, b=b_last, sigmoid=True)),
    ]
    return dict(
        # TODO(synk): torch uses nn.Embedding(1, 1); allocate (num_symbols, 1)
        # if a larger SEP vocabulary is ever needed.
        sep_emb=jax.random.normal(nk(), (1, 1), jnp.float32),
        encoder=encoder,
        in_features=K_in,
        in_features_padded=K_pad,
    )


# --------------------------------------------------------------------------
# Forward
# --------------------------------------------------------------------------

def _attention_scale(p):
    # sigmoid(W2 @ SiLU(W1 @ S(0))) -- depends only on parameters.
    h = p['att_emb'] @ p['att_w1']
    h = h * jax.nn.sigmoid(h)
    return jax.nn.sigmoid(h @ p['att_w2'])        # (1, C)


def _fold_scale_into_linear(w, b, scale):
    # x @ (w*(1+s)) + b*(1+s) == (x@w + b) * (1+s)  (exact)
    f = 1.0 + scale
    return w * f, b * f


def mlp_forward(query, passage, symbol, params):
    B = query.shape[0]
    sep = params['sep_emb'][symbol]                  # (1, 1) embedding lookup
    # TODO(synk): the PyTorch module hardcodes .repeat((1000, 1)) (assumes
    # batch==1000); here the SEP row is repeated to the actual batch size.
    sep = jnp.broadcast_to(sep, (B, 1))
    x = jnp.concatenate([query, sep, passage], axis=1).astype(jnp.float32)

    # Zero-pad the odd (2E+1) feature axis to a lane-dense multiple of 128;
    # matching zero rows were baked into the first linear weight.
    K_pad = params['in_features_padded']
    x = jnp.pad(x, ((0, 0), (0, K_pad - x.shape[1])))

    # Pad batch to a multiple of the row tile so every grid block is full.
    tile, B_pad = _row_tiling(B)
    if B_pad != B:
        x = jnp.pad(x, ((0, B_pad - B), (0, 0)))

    # Flatten the stack into (layer tags, flat parameter list). The constant
    # SENet scale of each encoder layer is folded into the preceding Linear,
    # removing it from the hot per-tile path entirely.
    layers = params['encoder']
    kinds, flat = [], []
    for i, (kind, p) in enumerate(layers):
        if kind == 'linear':
            w, b = p['w'], p['b']
            if i + 1 < len(layers) and layers[i + 1][0] == 'enc':
                w, b = _fold_scale_into_linear(
                    w, b, _attention_scale(layers[i + 1][1]))
            kinds.append(('linear', p['sigmoid']))
            flat += [w, b]
        else:
            kinds.append(('enc',))
            flat += [p['ln1_g'], p['ln1_b'], p['ff_w1'], p['ff_b1'],
                     p['ff_w2'], p['ff_b2'], p['ln2_g'], p['ln2_b']]

    N_out = flat[-2].shape[1]                        # padded final width (128)

    const = lambda i: (0, 0)                         # grid-invariant operands
    in_specs = [pl.BlockSpec((tile, K_pad), lambda i: (i, 0))]
    in_specs += [pl.BlockSpec(a.shape, const) for a in flat]

    out = pl.pallas_call(
        _make_fused_kernel(tuple(kinds)),
        out_shape=jax.ShapeDtypeStruct((B_pad, N_out), jnp.float32),
        grid=(B_pad // tile,),
        in_specs=in_specs,
        out_specs=pl.BlockSpec((tile, N_out), lambda i: (i, 0)),
        compiler_params=pltpu.CompilerParams(
            dimension_semantics=("parallel",)),
    )(x, *flat)

    return out[:B, :1]                               # real column of the padded head


# --------------------------------------------------------------------------
# Pure-JAX reference (same math, no Pallas, no scale folding)
# --------------------------------------------------------------------------

def mlp_reference(query, passage, symbol, params):
    B = query.shape[0]
    sep = jnp.broadcast_to(params['sep_emb'][symbol], (B, 1))
    x = jnp.concatenate([query, sep, passage], axis=1).astype(jnp.float32)
    x = jnp.pad(x, ((0, 0), (0, params['in_features_padded'] - x.shape[1])))

    def layernorm(v, g, b):
        mu = jnp.mean(v, axis=-1, keepdims=True)
        vc = v - mu
        var = jnp.mean(vc * vc, axis=-1, keepdims=True)
        return vc * jax.lax.rsqrt(var + LN_EPS) * g + b

    for kind, p in params['encoder']:
        if kind == 'linear':
            x = x @ p['w'] + p['b']
            if p['sigmoid']:
                x = jax.nn.sigmoid(x)
        else:
            h = p['att_emb'] @ p['att_w1']
            h = h * jax.nn.sigmoid(h)
            scale = jax.nn.sigmoid(h @ p['att_w2'])  # (1, C)
            x = x * scale + x
            x = layernorm(x, p['ln1_g'], p['ln1_b'])
            f = x @ p['ff_w1'] + p['ff_b1']
            f = f * jax.nn.sigmoid(f)
            f = f @ p['ff_w2'] + p['ff_b2']
            x = (x + f) + x
            x = layernorm(x, p['ln2_g'], p['ln2_b'])
    return x[:, :1]


if __name__ == "__main__":
    # Small shapes consistent with the module: hidden widths 128/256 are fixed
    # by MLP.__init__; batch and embedding_dim kept small.
    B, E = 8, 16
    key = jax.random.PRNGKey(0)
    kq, kp, kparams = jax.random.split(key, 3)
    query = jax.random.normal(kq, (B, E), dtype=jnp.float32)
    passage = jax.random.normal(kp, (B, E), dtype=jnp.float32)
    symbol = jnp.array([0], dtype=jnp.int32)

    params = init_mlp_params(kparams, E)

    out = mlp_forward(query, passage, symbol, params)
    out = jax.block_until_ready(out)
    assert out.shape == (B, 1)

    ref = mlp_reference(query, passage, symbol, params)
    # Loose tolerance: Pallas MXU f32 matmuls and XLA f32 dots may use
    # different internal pass structures; this is a structural sanity check.
    max_diff = float(jnp.max(jnp.abs(out - ref)))
    assert jnp.allclose(out, ref, atol=5e-2, rtol=5e-2), \
        f"mismatch vs reference (max abs diff {max_diff})"

    print("KERNEL_OK")
</pallas_src>

<mosaic_0001>
module attributes {stable_mosaic.version = 11 : i64} {
  func.func @kernel(%arg0: i32, %arg1: memref<8x128xf32, #tpu.memory_space<vmem>>, %arg2: memref<128x128xf32, #tpu.memory_space<vmem>>, %arg3: memref<1x128xf32, #tpu.memory_space<vmem>>, %arg4: memref<1x128xf32, #tpu.memory_space<vmem>>, %arg5: memref<1x128xf32, #tpu.memory_space<vmem>>, %arg6: memref<128x64xf32, #tpu.memory_space<vmem>>, %arg7: memref<1x64xf32, #tpu.memory_space<vmem>>, %arg8: memref<64x128xf32, #tpu.memory_space<vmem>>, %arg9: memref<1x128xf32, #tpu.memory_space<vmem>>, %arg10: memref<1x128xf32, #tpu.memory_space<vmem>>, %arg11: memref<1x128xf32, #tpu.memory_space<vmem>>, %arg12: memref<128x256xf32, #tpu.memory_space<vmem>>, %arg13: memref<1x256xf32, #tpu.memory_space<vmem>>, %arg14: memref<1x256xf32, #tpu.memory_space<vmem>>, %arg15: memref<1x256xf32, #tpu.memory_space<vmem>>, %arg16: memref<256x64xf32, #tpu.memory_space<vmem>>, %arg17: memref<1x64xf32, #tpu.memory_space<vmem>>, %arg18: memref<64x256xf32, #tpu.memory_space<vmem>>, %arg19: memref<1x256xf32, #tpu.memory_space<vmem>>, %arg20: memref<1x256xf32, #tpu.memory_space<vmem>>, %arg21: memref<1x256xf32, #tpu.memory_space<vmem>>, %arg22: memref<256x256xf32, #tpu.memory_space<vmem>>, %arg23: memref<1x256xf32, #tpu.memory_space<vmem>>, %arg24: memref<1x256xf32, #tpu.memory_space<vmem>>, %arg25: memref<1x256xf32, #tpu.memory_space<vmem>>, %arg26: memref<256x32xf32, #tpu.memory_space<vmem>>, %arg27: memref<1x32xf32, #tpu.memory_space<vmem>>, %arg28: memref<32x256xf32, #tpu.memory_space<vmem>>, %arg29: memref<1x256xf32, #tpu.memory_space<vmem>>, %arg30: memref<1x256xf32, #tpu.memory_space<vmem>>, %arg31: memref<1x256xf32, #tpu.memory_space<vmem>>, %arg32: memref<256x256xf32, #tpu.memory_space<vmem>>, %arg33: memref<1x256xf32, #tpu.memory_space<vmem>>, %arg34: memref<1x256xf32, #tpu.memory_space<vmem>>, %arg35: memref<1x256xf32, #tpu.memory_space<vmem>>, %arg36: memref<256x32xf32, #tpu.memory_space<vmem>>, %arg37: memref<1x32xf32, #tpu.memory_space<vmem>>, %arg38: memref<32x256xf32, #tpu.memory_space<vmem>>, %arg39: memref<1x256xf32, #tpu.memory_space<vmem>>, %arg40: memref<1x256xf32, #tpu.memory_space<vmem>>, %arg41: memref<1x256xf32, #tpu.memory_space<vmem>>, %arg42: memref<256x256xf32, #tpu.memory_space<vmem>>, %arg43: memref<1x256xf32, #tpu.memory_space<vmem>>, %arg44: memref<1x256xf32, #tpu.memory_space<vmem>>, %arg45: memref<1x256xf32, #tpu.memory_space<vmem>>, %arg46: memref<256x64xf32, #tpu.memory_space<vmem>>, %arg47: memref<1x64xf32, #tpu.memory_space<vmem>>, %arg48: memref<64x256xf32, #tpu.memory_space<vmem>>, %arg49: memref<1x256xf32, #tpu.memory_space<vmem>>, %arg50: memref<1x256xf32, #tpu.memory_space<vmem>>, %arg51: memref<1x256xf32, #tpu.memory_space<vmem>>, %arg52: memref<256x128xf32, #tpu.memory_space<vmem>>, %arg53: memref<1x128xf32, #tpu.memory_space<vmem>>, %arg54: memref<1x128xf32, #tpu.memory_space<vmem>>, %arg55: memref<1x128xf32, #tpu.memory_space<vmem>>, %arg56: memref<128x64xf32, #tpu.memory_space<vmem>>, %arg57: memref<1x64xf32, #tpu.memory_space<vmem>>, %arg58: memref<64x128xf32, #tpu.memory_space<vmem>>, %arg59: memref<1x128xf32, #tpu.memory_space<vmem>>, %arg60: memref<1x128xf32, #tpu.memory_space<vmem>>, %arg61: memref<1x128xf32, #tpu.memory_space<vmem>>, %arg62: memref<128x128xf32, #tpu.memory_space<vmem>>, %arg63: memref<1x128xf32, #tpu.memory_space<vmem>>, %arg64: memref<8x128xf32, #tpu.memory_space<vmem>>) attributes {dimension_semantics = [#tpu.dimension_semantics<parallel>], iteration_bounds = array<i64: 1>, scalar_prefetch = 0 : i64, scratch_operands = 0 : i64, tpu.core_type = #tpu.core_type<tc>, window_params = [{transform_indices = @transform_0, window_bounds = array<i64: 8, 128>}, {pipeline_mode = #tpu.pipeline_mode<synchronous>, transform_indices = @transform_1, window_bounds = array<i64: 128, 128>}, {pipeline_mode = #tpu.pipeline_mode<synchronous>, transform_indices = @transform_2, window_bounds = array<i64: 1, 128>}, {pipeline_mode = #tpu.pipeline_mode<synchronous>, transform_indices = @transform_3, window_bounds = array<i64: 1, 128>}, {pipeline_mode = #tpu.pipeline_mode<synchronous>, transform_indices = @transform_4, window_bounds = array<i64: 1, 128>}, {pipeline_mode = #tpu.pipeline_mode<synchronous>, transform_indices = @transform_5, window_bounds = array<i64: 128, 64>}, {pipeline_mode = #tpu.pipeline_mode<synchronous>, transform_indices = @transform_6, window_bounds = array<i64: 1, 64>}, {pipeline_mode = #tpu.pipeline_mode<synchronous>, transform_indices = @transform_7, window_bounds = array<i64: 64, 128>}, {pipeline_mode = #tpu.pipeline_mode<synchronous>, transform_indices = @transform_8, window_bounds = array<i64: 1, 128>}, {pipeline_mode = #tpu.pipeline_mode<synchronous>, transform_indices = @transform_9, window_bounds = array<i64: 1, 128>}, {pipeline_mode = #tpu.pipeline_mode<synchronous>, transform_indices = @transform_10, window_bounds = array<i64: 1, 128>}, {pipeline_mode = #tpu.pipeline_mode<synchronous>, transform_indices = @transform_11, window_bounds = array<i64: 128, 256>}, {pipeline_mode = #tpu.pipeline_mode<synchronous>, transform_indices = @transform_12, window_bounds = array<i64: 1, 256>}, {pipeline_mode = #tpu.pipeline_mode<synchronous>, transform_indices = @transform_13, window_bounds = array<i64: 1, 256>}, {pipeline_mode = #tpu.pipeline_mode<synchronous>, transform_indices = @transform_14, window_bounds = array<i64: 1, 256>}, {pipeline_mode = #tpu.pipeline_mode<synchronous>, transform_indices = @transform_15, window_bounds = array<i64: 256, 64>}, {pipeline_mode = #tpu.pipeline_mode<synchronous>, transform_indices = @transform_16, window_bounds = array<i64: 1, 64>}, {pipeline_mode = #tpu.pipeline_mode<synchronous>, transform_indices = @transform_17, window_bounds = array<i64: 64, 256>}, {pipeline_mode = #tpu.pipeline_mode<synchronous>, transform_indices = @transform_18, window_bounds = array<i64: 1, 256>}, {pipeline_mode = #tpu.pipeline_mode<synchronous>, transform_indices = @transform_19, window_bounds = array<i64: 1, 256>}, {pipeline_mode = #tpu.pipeline_mode<synchronous>, transform_indices = @transform_20, window_bounds = array<i64: 1, 256>}, {pipeline_mode = #tpu.pipeline_mode<synchronous>, transform_indices = @transform_21, window_bounds = array<i64: 256, 256>}, {pipeline_mode = #tpu.pipeline_mode<synchronous>, transform_indices = @transform_22, window_bounds = array<i64: 1, 256>}, {pipeline_mode = #tpu.pipeline_mode<synchronous>, transform_indices = @transform_23, window_bounds = array<i64: 1, 256>}, {pipeline_mode = #tpu.pipeline_mode<synchronous>, transform_indices = @transform_24, window_bounds = array<i64: 1, 256>}, {pipeline_mode = #tpu.pipeline_mode<synchronous>, transform_indices = @transform_25, window_bounds = array<i64: 256, 32>}, {pipeline_mode = #tpu.pipeline_mode<synchronous>, transform_indices = @transform_26, window_bounds = array<i64: 1, 32>}, {pipeline_mode = #tpu.pipeline_mode<synchronous>, transform_indices = @transform_27, window_bounds = array<i64: 32, 256>}, {pipeline_mode = #tpu.pipeline_mode<synchronous>, transform_indices = @transform_28, window_bounds = array<i64: 1, 256>}, {pipeline_mode = #tpu.pipeline_mode<synchronous>, transform_indices = @transform_29, window_bounds = array<i64: 1, 256>}, {pipeline_mode = #tpu.pipeline_mode<synchronous>, transform_indices = @transform_30, window_bounds = array<i64: 1, 256>}, {pipeline_mode = #tpu.pipeline_mode<synchronous>, transform_indices = @transform_31, window_bounds = array<i64: 256, 256>}, {pipeline_mode = #tpu.pipeline_mode<synchronous>, transform_indices = @transform_32, window_bounds = array<i64: 1, 256>}, {pipeline_mode = #tpu.pipeline_mode<synchronous>, transform_indices = @transform_33, window_bounds = array<i64: 1, 256>}, {pipeline_mode = #tpu.pipeline_mode<synchronous>, transform_indices = @transform_34, window_bounds = array<i64: 1, 256>}, {pipeline_mode = #tpu.pipeline_mode<synchronous>, transform_indices = @transform_35, window_bounds = array<i64: 256, 32>}, {pipeline_mode = #tpu.pipeline_mode<synchronous>, transform_indices = @transform_36, window_bounds = array<i64: 1, 32>}, {pipeline_mode = #tpu.pipeline_mode<synchronous>, transform_indices = @transform_37, window_bounds = array<i64: 32, 256>}, {pipeline_mode = #tpu.pipeline_mode<synchronous>, transform_indices = @transform_38, window_bounds = array<i64: 1, 256>}, {pipeline_mode = #tpu.pipeline_mode<synchronous>, transform_indices = @transform_39, window_bounds = array<i64: 1, 256>}, {pipeline_mode = #tpu.pipeline_mode<synchronous>, transform_indices = @transform_40, window_bounds = array<i64: 1, 256>}, {pipeline_mode = #tpu.pipeline_mode<synchronous>, transform_indices = @transform_41, window_bounds = array<i64: 256, 256>}, {pipeline_mode = #tpu.pipeline_mode<synchronous>, transform_indices = @transform_42, window_bounds = array<i64: 1, 256>}, {pipeline_mode = #tpu.pipeline_mode<synchronous>, transform_indices = @transform_43, window_bounds = array<i64: 1, 256>}, {pipeline_mode = #tpu.pipeline_mode<synchronous>, transform_indices = @transform_44, window_bounds = array<i64: 1, 256>}, {pipeline_mode = #tpu.pipeline_mode<synchronous>, transform_indices = @transform_45, window_bounds = array<i64: 256, 64>}, {pipeline_mode = #tpu.pipeline_mode<synchronous>, transform_indices = @transform_46, window_bounds = array<i64: 1, 64>}, {pipeline_mode = #tpu.pipeline_mode<synchronous>, transform_indices = @transform_47, window_bounds = array<i64: 64, 256>}, {pipeline_mode = #tpu.pipeline_mode<synchronous>, transform_indices = @transform_48, window_bounds = array<i64: 1, 256>}, {pipeline_mode = #tpu.pipeline_mode<synchronous>, transform_indices = @transform_49, window_bounds = array<i64: 1, 256>}, {pipeline_mode = #tpu.pipeline_mode<synchronous>, transform_indices = @transform_50, window_bounds = array<i64: 1, 256>}, {pipeline_mode = #tpu.pipeline_mode<synchronous>, transform_indices = @transform_51, window_bounds = array<i64: 256, 128>}, {pipeline_mode = #tpu.pipeline_mode<synchronous>, transform_indices = @transform_52, window_bounds = array<i64: 1, 128>}, {pipeline_mode = #tpu.pipeline_mode<synchronous>, transform_indices = @transform_53, window_bounds = array<i64: 1, 128>}, {pipeline_mode = #tpu.pipeline_mode<synchronous>, transform_indices = @transform_54, window_bounds = array<i64: 1, 128>}, {pipeline_mode = #tpu.pipeline_mode<synchronous>, transform_indices = @transform_55, window_bounds = array<i64: 128, 64>}, {pipeline_mode = #tpu.pipeline_mode<synchronous>, transform_indices = @transform_56, window_bounds = array<i64: 1, 64>}, {pipeline_mode = #tpu.pipeline_mode<synchronous>, transform_indices = @transform_57, window_bounds = array<i64: 64, 128>}, {pipeline_mode = #tpu.pipeline_mode<synchronous>, transform_indices = @transform_58, window_bounds = array<i64: 1, 128>}, {pipeline_mode = #tpu.pipeline_mode<synchronous>, transform_indices = @transform_59, window_bounds = array<i64: 1, 128>}, {pipeline_mode = #tpu.pipeline_mode<synchronous>, transform_indices = @transform_60, window_bounds = array<i64: 1, 128>}, {pipeline_mode = #tpu.pipeline_mode<synchronous>, transform_indices = @transform_61, window_bounds = array<i64: 128, 128>}, {pipeline_mode = #tpu.pipeline_mode<synchronous>, transform_indices = @transform_62, window_bounds = array<i64: 1, 128>}, {transform_indices = @transform_63, window_bounds = array<i64: 8, 128>}]} {
    %c0 = arith.constant 0 : index
    %c0_0 = arith.constant 0 : index
    %0 = vector.load %arg1[%c0, %c0_0] : memref<8x128xf32, #tpu.memory_space<vmem>>, vector<8x128xf32>
    %c0_1 = arith.constant 0 : index
    %c0_2 = arith.constant 0 : index
    %1 = vector.load %arg2[%c0_1, %c0_2] : memref<128x128xf32, #tpu.memory_space<vmem>>, vector<128x128xf32>
    %cst = arith.constant dense<0.000000e+00> : vector<8x128xf32>
    %2 = tpu.matmul %0, %1, %cst {dimension_numbers = #tpu.dot_dimension_numbers<[1], [0], [0], [1], [0, 0, 1, 1], [], []>} : vector<8x128xf32>, vector<128x128xf32>, vector<8x128xf32> -> vector<8x128xf32>
    %c0_3 = arith.constant 0 : index
    %c0_4 = arith.constant 0 : index
    %3 = vector.load %arg3[%c0_3, %c0_4] : memref<1x128xf32, #tpu.memory_space<vmem>>, vector<1x128xf32>
    %4 = vector.broadcast %3 : vector<1x128xf32> to vector<8x128xf32>
    %5 = arith.addf %2, %4 : vector<8x128xf32>
    %c0_5 = arith.constant 0 : index
    %c0_6 = arith.constant 0 : index
    %6 = vector.load %arg4[%c0_5, %c0_6] : memref<1x128xf32, #tpu.memory_space<vmem>>, vector<1x128xf32>
    %c0_7 = arith.constant 0 : index
    %c0_8 = arith.constant 0 : index
    %7 = vector.load %arg5[%c0_7, %c0_8] : memref<1x128xf32, #tpu.memory_space<vmem>>, vector<1x128xf32>
    %cst_9 = arith.constant dense<0.000000e+00> : vector<8xf32>
    %8 = vector.multi_reduction <add>, %5, %cst_9 [1] : vector<8x128xf32> to vector<8xf32>
    %9 = vector.shape_cast %8 : vector<8xf32> to vector<8x1xf32>
    %cst_10 = arith.constant 1.280000e+02 : f32
    %10 = vector.broadcast %cst_10 : f32 to vector<8x1xf32>
    %11 = arith.divf %9, %10 : vector<8x1xf32>
    %12 = vector.broadcast %11 : vector<8x1xf32> to vector<8x128xf32>
    %13 = arith.subf %5, %12 : vector<8x128xf32>
    %14 = arith.mulf %13, %13 : vector<8x128xf32>
    %cst_11 = arith.constant dense<0.000000e+00> : vector<8xf32>
    %15 = vector.multi_reduction <add>, %14, %cst_11 [1] : vector<8x128xf32> to vector<8xf32>
    %16 = vector.shape_cast %15 : vector<8xf32> to vector<8x1xf32>
    %cst_12 = arith.constant 1.280000e+02 : f32
    %17 = vector.broadcast %cst_12 : f32 to vector<8x1xf32>
    %18 = arith.divf %16, %17 : vector<8x1xf32>
    %cst_13 = arith.constant 9.99999974E-6 : f32
    %19 = vector.broadcast %cst_13 : f32 to vector<8x1xf32>
    %20 = arith.addf %18, %19 : vector<8x1xf32>
    %21 = math.rsqrt %20 : vector<8x1xf32>
    %22 = vector.broadcast %21 : vector<8x1xf32> to vector<8x128xf32>
    %23 = arith.mulf %13, %22 : vector<8x128xf32>
    %24 = vector.broadcast %6 : vector<1x128xf32> to vector<8x128xf32>
    %25 = arith.mulf %23, %24 : vector<8x128xf32>
    %26 = vector.broadcast %7 : vector<1x128xf32> to vector<8x128xf32>
    %27 = arith.addf %25, %26 : vector<8x128xf32>
    %c0_14 = arith.constant 0 : index
    %c0_15 = arith.constant 0 : index
    %28 = vector.load %arg6[%c0_14, %c0_15] : memref<128x64xf32, #tpu.memory_space<vmem>>, vector<128x64xf32>
    %cst_16 = arith.constant dense<0.000000e+00> : vector<8x64xf32>
    %29 = tpu.matmul %27, %28, %cst_16 {dimension_numbers = #tpu.dot_dimension_numbers<[1], [0], [0], [1], [0, 0, 1, 1], [], []>} : vector<8x128xf32>, vector<128x64xf32>, vector<8x64xf32> -> vector<8x64xf32>
    %c0_17 = arith.constant 0 : index
    %c0_18 = arith.constant 0 : index
    %30 = vector.load %arg7[%c0_17, %c0_18] : memref<1x64xf32, #tpu.memory_space<vmem>>, vector<1x64xf32>
    %31 = vector.broadcast %30 : vector<1x64xf32> to vector<8x64xf32>
    %32 = arith.addf %29, %31 : vector<8x64xf32>
    %33 = arith.negf %32 : vector<8x64xf32>
    %34 = math.exp %33 : vector<8x64xf32>
    %cst_19 = arith.constant 1.000000e+00 : f32
    %35 = vector.broadcast %cst_19 : f32 to vector<8x64xf32>
    %36 = arith.addf %35, %34 : vector<8x64xf32>
    %37 = arith.divf %35, %36 : vector<8x64xf32>
    %38 = arith.mulf %32, %37 : vector<8x64xf32>
    %c0_20 = arith.constant 0 : index
    %c0_21 = arith.constant 0 : index
    %39 = vector.load %arg8[%c0_20, %c0_21] : memref<64x128xf32, #tpu.memory_space<vmem>>, vector<64x128xf32>
    %cst_22 = arith.constant dense<0.000000e+00> : vector<8x128xf32>
    %40 = tpu.matmul %38, %39, %cst_22 {dimension_numbers = #tpu.dot_dimension_numbers<[1], [0], [0], [1], [0, 0, 1, 1], [], []>} : vector<8x64xf32>, vector<64x128xf32>, vector<8x128xf32> -> vector<8x128xf32>
    %c0_23 = arith.constant 0 : index
    %c0_24 = arith.constant 0 : index
    %41 = vector.load %arg9[%c0_23, %c0_24] : memref<1x128xf32, #tpu.memory_space<vmem>>, vector<1x128xf32>
    %42 = vector.broadcast %41 : vector<1x128xf32> to vector<8x128xf32>
    %43 = arith.addf %40, %42 : vector<8x128xf32>
    %cst_25 = arith.constant 2.000000e+00 : f32
    %44 = vector.broadcast %cst_25 : f32 to vector<8x128xf32>
    %45 = arith.mulf %44, %27 : vector<8x128xf32>
    %46 = arith.addf %45, %43 : vector<8x128xf32>
    %c0_26 = arith.constant 0 : index
    %c0_27 = arith.constant 0 : index
    %47 = vector.load %arg10[%c0_26, %c0_27] : memref<1x128xf32, #tpu.memory_space<vmem>>, vector<1x128xf32>
    %c0_28 = arith.constant 0 : index
    %c0_29 = arith.constant 0 : index
    %48 = vector.load %arg11[%c0_28, %c0_29] : memref<1x128xf32, #tpu.memory_space<vmem>>, vector<1x128xf32>
    %cst_30 = arith.constant dense<0.000000e+00> : vector<8xf32>
    %49 = vector.multi_reduction <add>, %46, %cst_30 [1] : vector<8x128xf32> to vector<8xf32>
    %50 = vector.shape_cast %49 : vector<8xf32> to vector<8x1xf32>
    %cst_31 = arith.constant 1.280000e+02 : f32
    %51 = vector.broadcast %cst_31 : f32 to vector<8x1xf32>
    %52 = arith.divf %50, %51 : vector<8x1xf32>
    %53 = vector.broadcast %52 : vector<8x1xf32> to vector<8x128xf32>
    %54 = arith.subf %46, %53 : vector<8x128xf32>
    %55 = arith.mulf %54, %54 : vector<8x128xf32>
    %cst_32 = arith.constant dense<0.000000e+00> : vector<8xf32>
    %56 = vector.multi_reduction <add>, %55, %cst_32 [1] : vector<8x128xf32> to vector<8xf32>
    %57 = vector.shape_cast %56 : vector<8xf32> to vector<8x1xf32>
    %cst_33 = arith.constant 1.280000e+02 : f32
    %58 = vector.broadcast %cst_33 : f32 to vector<8x1xf32>
    %59 = arith.divf %57, %58 : vector<8x1xf32>
    %cst_34 = arith.constant 9.99999974E-6 : f32
    %60 = vector.broadcast %cst_34 : f32 to vector<8x1xf32>
    %61 = arith.addf %59, %60 : vector<8x1xf32>
    %62 = math.rsqrt %61 : vector<8x1xf32>
    %63 = vector.broadcast %62 : vector<8x1xf32> to vector<8x128xf32>
    %64 = arith.mulf %54, %63 : vector<8x128xf32>
    %65 = vector.broadcast %47 : vector<1x128xf32> to vector<8x128xf32>
    %66 = arith.mulf %64, %65 : vector<8x128xf32>
    %67 = vector.broadcast %48 : vector<1x128xf32> to vector<8x128xf32>
    %68 = arith.addf %66, %67 : vector<8x128xf32>
    %c0_35 = arith.constant 0 : index
    %c0_36 = arith.constant 0 : index
    %69 = vector.load %arg12[%c0_35, %c0_36] : memref<128x256xf32, #tpu.memory_space<vmem>>, vector<128x256xf32>
    %cst_37 = arith.constant dense<0.000000e+00> : vector<8x256xf32>
    %70 = tpu.matmul %68, %69, %cst_37 {dimension_numbers = #tpu.dot_dimension_numbers<[1], [0], [0], [1], [0, 0, 1, 1], [], []>} : vector<8x128xf32>, vector<128x256xf32>, vector<8x256xf32> -> vector<8x256xf32>
    %c0_38 = arith.constant 0 : index
    %c0_39 = arith.constant 0 : index
    %71 = vector.load %arg13[%c0_38, %c0_39] : memref<1x256xf32, #tpu.memory_space<vmem>>, vector<1x256xf32>
    %72 = vector.broadcast %71 : vector<1x256xf32> to vector<8x256xf32>
    %73 = arith.addf %70, %72 : vector<8x256xf32>
    %c0_40 = arith.constant 0 : index
    %c0_41 = arith.constant 0 : index
    %74 = vector.load %arg14[%c0_40, %c0_41] : memref<1x256xf32, #tpu.memory_space<vmem>>, vector<1x256xf32>
    %c0_42 = arith.constant 0 : index
    %c0_43 = arith.constant 0 : index
    %75 = vector.load %arg15[%c0_42, %c0_43] : memref<1x256xf32, #tpu.memory_space<vmem>>, vector<1x256xf32>
    %cst_44 = arith.constant dense<0.000000e+00> : vector<8xf32>
    %76 = vector.multi_reduction <add>, %73, %cst_44 [1] : vector<8x256xf32> to vector<8xf32>
    %77 = vector.shape_cast %76 : vector<8xf32> to vector<8x1xf32>
    %cst_45 = arith.constant 2.560000e+02 : f32
    %78 = vector.broadcast %cst_45 : f32 to vector<8x1xf32>
    %79 = arith.divf %77, %78 : vector<8x1xf32>
    %80 = vector.broadcast %79 : vector<8x1xf32> to vector<8x256xf32>
    %81 = arith.subf %73, %80 : vector<8x256xf32>
    %82 = arith.mulf %81, %81 : vector<8x256xf32>
    %cst_46 = arith.constant dense<0.000000e+00> : vector<8xf32>
    %83 = vector.multi_reduction <add>, %82, %cst_46 [1] : vector<8x256xf32> to vector<8xf32>
    %84 = vector.shape_cast %83 : vector<8xf32> to vector<8x1xf32>
    %cst_47 = arith.constant 2.560000e+02 : f32
    %85 = vector.broadcast %cst_47 : f32 to vector<8x1xf32>
    %86 = arith.divf %84, %85 : vector<8x1xf32>
    %cst_48 = arith.constant 9.99999974E-6 : f32
    %87 = vector.broadcast %cst_48 : f32 to vector<8x1xf32>
    %88 = arith.addf %86, %87 : vector<8x1xf32>
    %89 = math.rsqrt %88 : vector<8x1xf32>
    %90 = vector.broadcast %89 : vector<8x1xf32> to vector<8x256xf32>
    %91 = arith.mulf %81, %90 : vector<8x256xf32>
    %92 = vector.broadcast %74 : vector<1x256xf32> to vector<8x256xf32>
    %93 = arith.mulf %91, %92 : vector<8x256xf32>
    %94 = vector.broadcast %75 : vector<1x256xf32> to vector<8x256xf32>
    %95 = arith.addf %93, %94 : vector<8x256xf32>
    %c0_49 = arith.constant 0 : index
    %c0_50 = arith.constant 0 : index
    %96 = vector.load %arg16[%c0_49, %c0_50] : memref<256x64xf32, #tpu.memory_space<vmem>>, vector<256x64xf32>
    %cst_51 = arith.constant dense<0.000000e+00> : vector<8x64xf32>
    %97 = tpu.matmul %95, %96, %cst_51 {dimension_numbers = #tpu.dot_dimension_numbers<[1], [0], [0], [1], [0, 0, 1, 1], [], []>} : vector<8x256xf32>, vector<256x64xf32>, vector<8x64xf32> -> vector<8x64xf32>
    %c0_52 = arith.constant 0 : index
    %c0_53 = arith.constant 0 : index
    %98 = vector.load %arg17[%c0_52, %c0_53] : memref<1x64xf32, #tpu.memory_space<vmem>>, vector<1x64xf32>
    %99 = vector.broadcast %98 : vector<1x64xf32> to vector<8x64xf32>
    %100 = arith.addf %97, %99 : vector<8x64xf32>
    %101 = arith.negf %100 : vector<8x64xf32>
    %102 = math.exp %101 : vector<8x64xf32>
    %cst_54 = arith.constant 1.000000e+00 : f32
    %103 = vector.broadcast %cst_54 : f32 to vector<8x64xf32>
    %104 = arith.addf %103, %102 : vector<8x64xf32>
    %105 = arith.divf %103, %104 : vector<8x64xf32>
    %106 = arith.mulf %100, %105 : vector<8x64xf32>
    %c0_55 = arith.constant 0 : index
    %c0_56 = arith.constant 0 : index
    %107 = vector.load %arg18[%c0_55, %c0_56] : memref<64x256xf32, #tpu.memory_space<vmem>>, vector<64x256xf32>
    %cst_57 = arith.constant dense<0.000000e+00> : vector<8x256xf32>
    %108 = tpu.matmul %106, %107, %cst_57 {dimension_numbers = #tpu.dot_dimension_numbers<[1], [0], [0], [1], [0, 0, 1, 1], [], []>} : vector<8x64xf32>, vector<64x256xf32>, vector<8x256xf32> -> vector<8x256xf32>
    %c0_58 = arith.constant 0 : index
    %c0_59 = arith.constant 0 : index
    %109 = vector.load %arg19[%c0_58, %c0_59] : memref<1x256xf32, #tpu.memory_space<vmem>>, vector<1x256xf32>
    %110 = vector.broadcast %109 : vector<1x256xf32> to vector<8x256xf32>
    %111 = arith.addf %108, %110 : vector<8x256xf32>
    %cst_60 = arith.constant 2.000000e+00 : f32
    %112 = vector.broadcast %cst_60 : f32 to vector<8x256xf32>
    %113 = arith.mulf %112, %95 : vector<8x256xf32>
    %114 = arith.addf %113, %111 : vector<8x256xf32>
    %c0_61 = arith.constant 0 : index
    %c0_62 = arith.constant 0 : index
    %115 = vector.load %arg20[%c0_61, %c0_62] : memref<1x256xf32, #tpu.memory_space<vmem>>, vector<1x256xf32>
    %c0_63 = arith.constant 0 : index
    %c0_64 = arith.constant 0 : index
    %116 = vector.load %arg21[%c0_63, %c0_64] : memref<1x256xf32, #tpu.memory_space<vmem>>, vector<1x256xf32>
    %cst_65 = arith.constant dense<0.000000e+00> : vector<8xf32>
    %117 = vector.multi_reduction <add>, %114, %cst_65 [1] : vector<8x256xf32> to vector<8xf32>
    %118 = vector.shape_cast %117 : vector<8xf32> to vector<8x1xf32>
    %cst_66 = arith.constant 2.560000e+02 : f32
    %119 = vector.broadcast %cst_66 : f32 to vector<8x1xf32>
    %120 = arith.divf %118, %119 : vector<8x1xf32>
    %121 = vector.broadcast %120 : vector<8x1xf32> to vector<8x256xf32>
    %122 = arith.subf %114, %121 : vector<8x256xf32>
    %123 = arith.mulf %122, %122 : vector<8x256xf32>
    %cst_67 = arith.constant dense<0.000000e+00> : vector<8xf32>
    %124 = vector.multi_reduction <add>, %123, %cst_67 [1] : vector<8x256xf32> to vector<8xf32>
    %125 = vector.shape_cast %124 : vector<8xf32> to vector<8x1xf32>
    %cst_68 = arith.constant 2.560000e+02 : f32
    %126 = vector.broadcast %cst_68 : f32 to vector<8x1xf32>
    %127 = arith.divf %125, %126 : vector<8x1xf32>
    %cst_69 = arith.constant 9.99999974E-6 : f32
    %128 = vector.broadcast %cst_69 : f32 to vector<8x1xf32>
    %129 = arith.addf %127, %128 : vector<8x1xf32>
    %130 = math.rsqrt %129 : vector<8x1xf32>
    %131 = vector.broadcast %130 : vector<8x1xf32> to vector<8x256xf32>
    %132 = arith.mulf %122, %131 : vector<8x256xf32>
    %133 = vector.broadcast %115 : vector<1x256xf32> to vector<8x256xf32>
    %134 = arith.mulf %132, %133 : vector<8x256xf32>
    %135 = vector.broadcast %116 : vector<1x256xf32> to vector<8x256xf32>
    %136 = arith.addf %134, %135 : vector<8x256xf32>
    %c0_70 = arith.constant 0 : index
    %c0_71 = arith.constant 0 : index
    %137 = vector.load %arg22[%c0_70, %c0_71] : memref<256x256xf32, #tpu.memory_space<vmem>>, vector<256x256xf32>
    %cst_72 = arith.constant dense<0.000000e+00> : vector<8x256xf32>
    %138 = tpu.matmul %136, %137, %cst_72 {dimension_numbers = #tpu.dot_dimension_numbers<[1], [0], [0], [1], [0, 0, 1, 1], [], []>} : vector<8x256xf32>, vector<256x256xf32>, vector<8x256xf32> -> vector<8x256xf32>
    %c0_73 = arith.constant 0 : index
    %c0_74 = arith.constant 0 : index
    %139 = vector.load %arg23[%c0_73, %c0_74] : memref<1x256xf32, #tpu.memory_space<vmem>>, vector<1x256xf32>
    %140 = vector.broadcast %139 : vector<1x256xf32> to vector<8x256xf32>
    %141 = arith.addf %138, %140 : vector<8x256xf32>
    %c0_75 = arith.constant 0 : index
    %c0_76 = arith.constant 0 : index
    %142 = vector.load %arg24[%c0_75, %c0_76] : memref<1x256xf32, #tpu.memory_space<vmem>>, vector<1x256xf32>
    %c0_77 = arith.constant 0 : index
    %c0_78 = arith.constant 0 : index
    %143 = vector.load %arg25[%c0_77, %c0_78] : memref<1x256xf32, #tpu.memory_space<vmem>>, vector<1x256xf32>
    %cst_79 = arith.constant dense<0.000000e+00> : vector<8xf32>
    %144 = vector.multi_reduction <add>, %141, %cst_79 [1] : vector<8x256xf32> to vector<8xf32>
    %145 = vector.shape_cast %144 : vector<8xf32> to vector<8x1xf32>
    %cst_80 = arith.constant 2.560000e+02 : f32
    %146 = vector.broadcast %cst_80 : f32 to vector<8x1xf32>
    %147 = arith.divf %145, %146 : vector<8x1xf32>
    %148 = vector.broadcast %147 : vector<8x1xf32> to vector<8x256xf32>
    %149 = arith.subf %141, %148 : vector<8x256xf32>
    %150 = arith.mulf %149, %149 : vector<8x256xf32>
    %cst_81 = arith.constant dense<0.000000e+00> : vector<8xf32>
    %151 = vector.multi_reduction <add>, %150, %cst_81 [1] : vector<8x256xf32> to vector<8xf32>
    %152 = vector.shape_cast %151 : vector<8xf32> to vector<8x1xf32>
    %cst_82 = arith.constant 2.560000e+02 : f32
    %153 = vector.broadcast %cst_82 : f32 to vector<8x1xf32>
    %154 = arith.divf %152, %153 : vector<8x1xf32>
    %cst_83 = arith.constant 9.99999974E-6 : f32
    %155 = vector.broadcast %cst_83 : f32 to vector<8x1xf32>
    %156 = arith.addf %154, %155 : vector<8x1xf32>
    %157 = math.rsqrt %156 : vector<8x1xf32>
    %158 = vector.broadcast %157 : vector<8x1xf32> to vector<8x256xf32>
    %159 = arith.mulf %149, %158 : vector<8x256xf32>
    %160 = vector.broadcast %142 : vector<1x256xf32> to vector<8x256xf32>
    %161 = arith.mulf %159, %160 : vector<8x256xf32>
    %162 = vector.broadcast %143 : vector<1x256xf32> to vector<8x256xf32>
    %163 = arith.addf %161, %162 : vector<8x256xf32>
    %c0_84 = arith.constant 0 : index
    %c0_85 = arith.constant 0 : index
    %164 = vector.load %arg26[%c0_84, %c0_85] : memref<256x32xf32, #tpu.memory_space<vmem>>, vector<256x32xf32>
    %cst_86 = arith.constant dense<0.000000e+00> : vector<8x32xf32>
    %165 = tpu.matmul %163, %164, %cst_86 {dimension_numbers = #tpu.dot_dimension_numbers<[1], [0], [0], [1], [0, 0, 1, 1], [], []>} : vector<8x256xf32>, vector<256x32xf32>, vector<8x32xf32> -> vector<8x32xf32>
    %c0_87 = arith.constant 0 : index
    %c0_88 = arith.constant 0 : index
    %166 = vector.load %arg27[%c0_87, %c0_88] : memref<1x32xf32, #tpu.memory_space<vmem>>, vector<1x32xf32>
    %167 = vector.broadcast %166 : vector<1x32xf32> to vector<8x32xf32>
    %168 = arith.addf %165, %167 : vector<8x32xf32>
    %169 = arith.negf %168 : vector<8x32xf32>
    %170 = math.exp %169 : vector<8x32xf32>
    %cst_89 = arith.constant 1.000000e+00 : f32
    %171 = vector.broadcast %cst_89 : f32 to vector<8x32xf32>
    %172 = arith.addf %171, %170 : vector<8x32xf32>
    %173 = arith.divf %171, %172 : vector<8x32xf32>
    %174 = arith.mulf %168, %173 : vector<8x32xf32>
    %c0_90 = arith.constant 0 : index
    %c0_91 = arith.constant 0 : index
    %175 = vector.load %arg28[%c0_90, %c0_91] : memref<32x256xf32, #tpu.memory_space<vmem>>, vector<32x256xf32>
    %cst_92 = arith.constant dense<0.000000e+00> : vector<8x256xf32>
    %176 = tpu.matmul %174, %175, %cst_92 {dimension_numbers = #tpu.dot_dimension_numbers<[1], [0], [0], [1], [0, 0, 1, 1], [], []>} : vector<8x32xf32>, vector<32x256xf32>, vector<8x256xf32> -> vector<8x256xf32>
    %c0_93 = arith.constant 0 : index
    %c0_94 = arith.constant 0 : index
    %177 = vector.load %arg29[%c0_93, %c0_94] : memref<1x256xf32, #tpu.memory_space<vmem>>, vector<1x256xf32>
    %178 = vector.broadcast %177 : vector<1x256xf32> to vector<8x256xf32>
    %179 = arith.addf %176, %178 : vector<8x256xf32>
    %cst_95 = arith.constant 2.000000e+00 : f32
    %180 = vector.broadcast %cst_95 : f32 to vector<8x256xf32>
    %181 = arith.mulf %180, %163 : vector<8x256xf32>
    %182 = arith.addf %181, %179 : vector<8x256xf32>
    %c0_96 = arith.constant 0 : index
    %c0_97 = arith.constant 0 : index
    %183 = vector.load %arg30[%c0_96, %c0_97] : memref<1x256xf32, #tpu.memory_space<vmem>>, vector<1x256xf32>
    %c0_98 = arith.constant 0 : index
    %c0_99 = arith.constant 0 : index
    %184 = vector.load %arg31[%c0_98, %c0_99] : memref<1x256xf32, #tpu.memory_space<vmem>>, vector<1x256xf32>
    %cst_100 = arith.constant dense<0.000000e+00> : vector<8xf32>
    %185 = vector.multi_reduction <add>, %182, %cst_100 [1] : vector<8x256xf32> to vector<8xf32>
    %186 = vector.shape_cast %185 : vector<8xf32> to vector<8x1xf32>
    %cst_101 = arith.constant 2.560000e+02 : f32
    %187 = vector.broadcast %cst_101 : f32 to vector<8x1xf32>
    %188 = arith.divf %186, %187 : vector<8x1xf32>
    %189 = vector.broadcast %188 : vector<8x1xf32> to vector<8x256xf32>
    %190 = arith.subf %182, %189 : vector<8x256xf32>
    %191 = arith.mulf %190, %190 : vector<8x256xf32>
    %cst_102 = arith.constant dense<0.000000e+00> : vector<8xf32>
    %192 = vector.multi_reduction <add>, %191, %cst_102 [1] : vector<8x256xf32> to vector<8xf32>
    %193 = vector.shape_cast %192 : vector<8xf32> to vector<8x1xf32>
    %cst_103 = arith.constant 2.560000e+02 : f32
    %194 = vector.broadcast %cst_103 : f32 to vector<8x1xf32>
    %195 = arith.divf %193, %194 : vector<8x1xf32>
    %cst_104 = arith.constant 9.99999974E-6 : f32
    %196 = vector.broadcast %cst_104 : f32 to vector<8x1xf32>
    %197 = arith.addf %195, %196 : vector<8x1xf32>
    %198 = math.rsqrt %197 : vector<8x1xf32>
    %199 = vector.broadcast %198 : vector<8x1xf32> to vector<8x256xf32>
    %200 = arith.mulf %190, %199 : vector<8x256xf32>
    %201 = vector.broadcast %183 : vector<1x256xf32> to vector<8x256xf32>
    %202 = arith.mulf %200, %201 : vector<8x256xf32>
    %203 = vector.broadcast %184 : vector<1x256xf32> to vector<8x256xf32>
    %204 = arith.addf %202, %203 : vector<8x256xf32>
    %c0_105 = arith.constant 0 : index
    %c0_106 = arith.constant 0 : index
    %205 = vector.load %arg32[%c0_105, %c0_106] : memref<256x256xf32, #tpu.memory_space<vmem>>, vector<256x256xf32>
    %cst_107 = arith.constant dense<0.000000e+00> : vector<8x256xf32>
    %206 = tpu.matmul %204, %205, %cst_107 {dimension_numbers = #tpu.dot_dimension_numbers<[1], [0], [0], [1], [0, 0, 1, 1], [], []>} : vector<8x256xf32>, vector<256x256xf32>, vector<8x256xf32> -> vector<8x256xf32>
    %c0_108 = arith.constant 0 : index
    %c0_109 = arith.constant 0 : index
    %207 = vector.load %arg33[%c0_108, %c0_109] : memref<1x256xf32, #tpu.memory_space<vmem>>, vector<1x256xf32>
    %208 = vector.broadcast %207 : vector<1x256xf32> to vector<8x256xf32>
    %209 = arith.addf %206, %208 : vector<8x256xf32>
    %c0_110 = arith.constant 0 : index
    %c0_111 = arith.constant 0 : index
    %210 = vector.load %arg34[%c0_110, %c0_111] : memref<1x256xf32, #tpu.memory_space<vmem>>, vector<1x256xf32>
    %c0_112 = arith.constant 0 : index
    %c0_113 = arith.constant 0 : index
    %211 = vector.load %arg35[%c0_112, %c0_113] : memref<1x256xf32, #tpu.memory_space<vmem>>, vector<1x256xf32>
    %cst_114 = arith.constant dense<0.000000e+00> : vector<8xf32>
    %212 = vector.multi_reduction <add>, %209, %cst_114 [1] : vector<8x256xf32> to vector<8xf32>
    %213 = vector.shape_cast %212 : vector<8xf32> to vector<8x1xf32>
    %cst_115 = arith.constant 2.560000e+02 : f32
    %214 = vector.broadcast %cst_115 : f32 to vector<8x1xf32>
    %215 = arith.divf %213, %214 : vector<8x1xf32>
    %216 = vector.broadcast %215 : vector<8x1xf32> to vector<8x256xf32>
    %217 = arith.subf %209, %216 : vector<8x256xf32>
    %218 = arith.mulf %217, %217 : vector<8x256xf32>
    %cst_116 = arith.constant dense<0.000000e+00> : vector<8xf32>
    %219 = vector.multi_reduction <add>, %218, %cst_116 [1] : vector<8x256xf32> to vector<8xf32>
    %220 = vector.shape_cast %219 : vector<8xf32> to vector<8x1xf32>
    %cst_117 = arith.constant 2.560000e+02 : f32
    %221 = vector.broadcast %cst_117 : f32 to vector<8x1xf32>
    %222 = arith.divf %220, %221 : vector<8x1xf32>
    %cst_118 = arith.constant 9.99999974E-6 : f32
    %223 = vector.broadcast %cst_118 : f32 to vector<8x1xf32>
    %224 = arith.addf %222, %223 : vector<8x1xf32>
    %225 = math.rsqrt %224 : vector<8x1xf32>
    %226 = vector.broadcast %225 : vector<8x1xf32> to vector<8x256xf32>
    %227 = arith.mulf %217, %226 : vector<8x256xf32>
    %228 = vector.broadcast %210 : vector<1x256xf32> to vector<8x256xf32>
    %229 = arith.mulf %227, %228 : vector<8x256xf32>
    %230 = vector.broadcast %211 : vector<1x256xf32> to vector<8x256xf32>
    %231 = arith.addf %229, %230 : vector<8x256xf32>
    %c0_119 = arith.constant 0 : index
    %c0_120 = arith.constant 0 : index
    %232 = vector.load %arg36[%c0_119, %c0_120] : memref<256x32xf32, #tpu.memory_space<vmem>>, vector<256x32xf32>
    %cst_121 = arith.constant dense<0.000000e+00> : vector<8x32xf32>
    %233 = tpu.matmul %231, %232, %cst_121 {dimension_numbers = #tpu.dot_dimension_numbers<[1], [0], [0], [1], [0, 0, 1, 1], [], []>} : vector<8x256xf32>, vector<256x32xf32>, vector<8x32xf32> -> vector<8x32xf32>
    %c0_122 = arith.constant 0 : index
    %c0_123 = arith.constant 0 : index
    %234 = vector.load %arg37[%c0_122, %c0_123] : memref<1x32xf32, #tpu.memory_space<vmem>>, vector<1x32xf32>
    %235 = vector.broadcast %234 : vector<1x32xf32> to vector<8x32xf32>
    %236 = arith.addf %233, %235 : vector<8x32xf32>
    %237 = arith.negf %236 : vector<8x32xf32>
    %238 = math.exp %237 : vector<8x32xf32>
    %cst_124 = arith.constant 1.000000e+00 : f32
    %239 = vector.broadcast %cst_124 : f32 to vector<8x32xf32>
    %240 = arith.addf %239, %238 : vector<8x32xf32>
    %241 = arith.divf %239, %240 : vector<8x32xf32>
    %242 = arith.mulf %236, %241 : vector<8x32xf32>
    %c0_125 = arith.constant 0 : index
    %c0_126 = arith.constant 0 : index
    %243 = vector.load %arg38[%c0_125, %c0_126] : memref<32x256xf32, #tpu.memory_space<vmem>>, vector<32x256xf32>
    %cst_127 = arith.constant dense<0.000000e+00> : vector<8x256xf32>
    %244 = tpu.matmul %242, %243, %cst_127 {dimension_numbers = #tpu.dot_dimension_numbers<[1], [0], [0], [1], [0, 0, 1, 1], [], []>} : vector<8x32xf32>, vector<32x256xf32>, vector<8x256xf32> -> vector<8x256xf32>
    %c0_128 = arith.constant 0 : index
    %c0_129 = arith.constant 0 : index
    %245 = vector.load %arg39[%c0_128, %c0_129] : memref<1x256xf32, #tpu.memory_space<vmem>>, vector<1x256xf32>
    %246 = vector.broadcast %245 : vector<1x256xf32> to vector<8x256xf32>
    %247 = arith.addf %244, %246 : vector<8x256xf32>
    %cst_130 = arith.constant 2.000000e+00 : f32
    %248 = vector.broadcast %cst_130 : f32 to vector<8x256xf32>
    %249 = arith.mulf %248, %231 : vector<8x256xf32>
    %250 = arith.addf %249, %247 : vector<8x256xf32>
    %c0_131 = arith.constant 0 : index
    %c0_132 = arith.constant 0 : index
    %251 = vector.load %arg40[%c0_131, %c0_132] : memref<1x256xf32, #tpu.memory_space<vmem>>, vector<1x256xf32>
    %c0_133 = arith.constant 0 : index
    %c0_134 = arith.constant 0 : index
    %252 = vector.load %arg41[%c0_133, %c0_134] : memref<1x256xf32, #tpu.memory_space<vmem>>, vector<1x256xf32>
    %cst_135 = arith.constant dense<0.000000e+00> : vector<8xf32>
    %253 = vector.multi_reduction <add>, %250, %cst_135 [1] : vector<8x256xf32> to vector<8xf32>
    %254 = vector.shape_cast %253 : vector<8xf32> to vector<8x1xf32>
    %cst_136 = arith.constant 2.560000e+02 : f32
    %255 = vector.broadcast %cst_136 : f32 to vector<8x1xf32>
    %256 = arith.divf %254, %255 : vector<8x1xf32>
    %257 = vector.broadcast %256 : vector<8x1xf32> to vector<8x256xf32>
    %258 = arith.subf %250, %257 : vector<8x256xf32>
    %259 = arith.mulf %258, %258 : vector<8x256xf32>
    %cst_137 = arith.constant dense<0.000000e+00> : vector<8xf32>
    %260 = vector.multi_reduction <add>, %259, %cst_137 [1] : vector<8x256xf32> to vector<8xf32>
    %261 = vector.shape_cast %260 : vector<8xf32> to vector<8x1xf32>
    %cst_138 = arith.constant 2.560000e+02 : f32
    %262 = vector.broadcast %cst_138 : f32 to vector<8x1xf32>
    %263 = arith.divf %261, %262 : vector<8x1xf32>
    %cst_139 = arith.constant 9.99999974E-6 : f32
    %264 = vector.broadcast %cst_139 : f32 to vector<8x1xf32>
    %265 = arith.addf %263, %264 : vector<8x1xf32>
    %266 = math.rsqrt %265 : vector<8x1xf32>
    %267 = vector.broadcast %266 : vector<8x1xf32> to vector<8x256xf32>
    %268 = arith.mulf %258, %267 : vector<8x256xf32>
    %269 = vector.broadcast %251 : vector<1x256xf32> to vector<8x256xf32>
    %270 = arith.mulf %268, %269 : vector<8x256xf32>
    %271 = vector.broadcast %252 : vector<1x256xf32> to vector<8x256xf32>
    %272 = arith.addf %270, %271 : vector<8x256xf32>
    %c0_140 = arith.constant 0 : index
    %c0_141 = arith.constant 0 : index
    %273 = vector.load %arg42[%c0_140, %c0_141] : memref<256x256xf32, #tpu.memory_space<vmem>>, vector<256x256xf32>
    %cst_142 = arith.constant dense<0.000000e+00> : vector<8x256xf32>
    %274 = tpu.matmul %272, %273, %cst_142 {dimension_numbers = #tpu.dot_dimension_numbers<[1], [0], [0], [1], [0, 0, 1, 1], [], []>} : vector<8x256xf32>, vector<256x256xf32>, vector<8x256xf32> -> vector<8x256xf32>
    %c0_143 = arith.constant 0 : index
    %c0_144 = arith.constant 0 : index
    %275 = vector.load %arg43[%c0_143, %c0_144] : memref<1x256xf32, #tpu.memory_space<vmem>>, vector<1x256xf32>
    %276 = vector.broadcast %275 : vector<1x256xf32> to vector<8x256xf32>
    %277 = arith.addf %274, %276 : vector<8x256xf32>
    %c0_145 = arith.constant 0 : index
    %c0_146 = arith.constant 0 : index
    %278 = vector.load %arg44[%c0_145, %c0_146] : memref<1x256xf32, #tpu.memory_space<vmem>>, vector<1x256xf32>
    %c0_147 = arith.constant 0 : index
    %c0_148 = arith.constant 0 : index
    %279 = vector.load %arg45[%c0_147, %c0_148] : memref<1x256xf32, #tpu.memory_space<vmem>>, vector<1x256xf32>
    %cst_149 = arith.constant dense<0.000000e+00> : vector<8xf32>
    %280 = vector.multi_reduction <add>, %277, %cst_149 [1] : vector<8x256xf32> to vector<8xf32>
    %281 = vector.shape_cast %280 : vector<8xf32> to vector<8x1xf32>
    %cst_150 = arith.constant 2.560000e+02 : f32
    %282 = vector.broadcast %cst_150 : f32 to vector<8x1xf32>
    %283 = arith.divf %281, %282 : vector<8x1xf32>
    %284 = vector.broadcast %283 : vector<8x1xf32> to vector<8x256xf32>
    %285 = arith.subf %277, %284 : vector<8x256xf32>
    %286 = arith.mulf %285, %285 : vector<8x256xf32>
    %cst_151 = arith.constant dense<0.000000e+00> : vector<8xf32>
    %287 = vector.multi_reduction <add>, %286, %cst_151 [1] : vector<8x256xf32> to vector<8xf32>
    %288 = vector.shape_cast %287 : vector<8xf32> to vector<8x1xf32>
    %cst_152 = arith.constant 2.560000e+02 : f32
    %289 = vector.broadcast %cst_152 : f32 to vector<8x1xf32>
    %290 = arith.divf %288, %289 : vector<8x1xf32>
    %cst_153 = arith.constant 9.99999974E-6 : f32
    %291 = vector.broadcast %cst_153 : f32 to vector<8x1xf32>
    %292 = arith.addf %290, %291 : vector<8x1xf32>
    %293 = math.rsqrt %292 : vector<8x1xf32>
    %294 = vector.broadcast %293 : vector<8x1xf32> to vector<8x256xf32>
    %295 = arith.mulf %285, %294 : vector<8x256xf32>
    %296 = vector.broadcast %278 : vector<1x256xf32> to vector<8x256xf32>
    %297 = arith.mulf %295, %296 : vector<8x256xf32>
    %298 = vector.broadcast %279 : vector<1x256xf32> to vector<8x256xf32>
    %299 = arith.addf %297, %298 : vector<8x256xf32>
    %c0_154 = arith.constant 0 : index
    %c0_155 = arith.constant 0 : index
    %300 = vector.load %arg46[%c0_154, %c0_155] : memref<256x64xf32, #tpu.memory_space<vmem>>, vector<256x64xf32>
    %cst_156 = arith.constant dense<0.000000e+00> : vector<8x64xf32>
    %301 = tpu.matmul %299, %300, %cst_156 {dimension_numbers = #tpu.dot_dimension_numbers<[1], [0], [0], [1], [0, 0, 1, 1], [], []>} : vector<8x256xf32>, vector<256x64xf32>, vector<8x64xf32> -> vector<8x64xf32>
    %c0_157 = arith.constant 0 : index
    %c0_158 = arith.constant 0 : index
    %302 = vector.load %arg47[%c0_157, %c0_158] : memref<1x64xf32, #tpu.memory_space<vmem>>, vector<1x64xf32>
    %303 = vector.broadcast %302 : vector<1x64xf32> to vector<8x64xf32>
    %304 = arith.addf %301, %303 : vector<8x64xf32>
    %305 = arith.negf %304 : vector<8x64xf32>
    %306 = math.exp %305 : vector<8x64xf32>
    %cst_159 = arith.constant 1.000000e+00 : f32
    %307 = vector.broadcast %cst_159 : f32 to vector<8x64xf32>
    %308 = arith.addf %307, %306 : vector<8x64xf32>
    %309 = arith.divf %307, %308 : vector<8x64xf32>
    %310 = arith.mulf %304, %309 : vector<8x64xf32>
    %c0_160 = arith.constant 0 : index
    %c0_161 = arith.constant 0 : index
    %311 = vector.load %arg48[%c0_160, %c0_161] : memref<64x256xf32, #tpu.memory_space<vmem>>, vector<64x256xf32>
    %cst_162 = arith.constant dense<0.000000e+00> : vector<8x256xf32>
    %312 = tpu.matmul %310, %311, %cst_162 {dimension_numbers = #tpu.dot_dimension_numbers<[1], [0], [0], [1], [0, 0, 1, 1], [], []>} : vector<8x64xf32>, vector<64x256xf32>, vector<8x256xf32> -> vector<8x256xf32>
    %c0_163 = arith.constant 0 : index
    %c0_164 = arith.constant 0 : index
    %313 = vector.load %arg49[%c0_163, %c0_164] : memref<1x256xf32, #tpu.memory_space<vmem>>, vector<1x256xf32>
    %314 = vector.broadcast %313 : vector<1x256xf32> to vector<8x256xf32>
    %315 = arith.addf %312, %314 : vector<8x256xf32>
    %cst_165 = arith.constant 2.000000e+00 : f32
    %316 = vector.broadcast %cst_165 : f32 to vector<8x256xf32>
    %317 = arith.mulf %316, %299 : vector<8x256xf32>
    %318 = arith.addf %317, %315 : vector<8x256xf32>
    %c0_166 = arith.constant 0 : index
    %c0_167 = arith.constant 0 : index
    %319 = vector.load %arg50[%c0_166, %c0_167] : memref<1x256xf32, #tpu.memory_space<vmem>>, vector<1x256xf32>
    %c0_168 = arith.constant 0 : index
    %c0_169 = arith.constant 0 : index
    %320 = vector.load %arg51[%c0_168, %c0_169] : memref<1x256xf32, #tpu.memory_space<vmem>>, vector<1x256xf32>
    %cst_170 = arith.constant dense<0.000000e+00> : vector<8xf32>
    %321 = vector.multi_reduction <add>, %318, %cst_170 [1] : vector<8x256xf32> to vector<8xf32>
    %322 = vector.shape_cast %321 : vector<8xf32> to vector<8x1xf32>
    %cst_171 = arith.constant 2.560000e+02 : f32
    %323 = vector.broadcast %cst_171 : f32 to vector<8x1xf32>
    %324 = arith.divf %322, %323 : vector<8x1xf32>
    %325 = vector.broadcast %324 : vector<8x1xf32> to vector<8x256xf32>
    %326 = arith.subf %318, %325 : vector<8x256xf32>
    %327 = arith.mulf %326, %326 : vector<8x256xf32>
    %cst_172 = arith.constant dense<0.000000e+00> : vector<8xf32>
    %328 = vector.multi_reduction <add>, %327, %cst_172 [1] : vector<8x256xf32> to vector<8xf32>
    %329 = vector.shape_cast %328 : vector<8xf32> to vector<8x1xf32>
    %cst_173 = arith.constant 2.560000e+02 : f32
    %330 = vector.broadcast %cst_173 : f32 to vector<8x1xf32>
    %331 = arith.divf %329, %330 : vector<8x1xf32>
    %cst_174 = arith.constant 9.99999974E-6 : f32
    %332 = vector.broadcast %cst_174 : f32 to vector<8x1xf32>
    %333 = arith.addf %331, %332 : vector<8x1xf32>
    %334 = math.rsqrt %333 : vector<8x1xf32>
    %335 = vector.broadcast %334 : vector<8x1xf32> to vector<8x256xf32>
    %336 = arith.mulf %326, %335 : vector<8x256xf32>
    %337 = vector.broadcast %319 : vector<1x256xf32> to vector<8x256xf32>
    %338 = arith.mulf %336, %337 : vector<8x256xf32>
    %339 = vector.broadcast %320 : vector<1x256xf32> to vector<8x256xf32>
    %340 = arith.addf %338, %339 : vector<8x256xf32>
    %c0_175 = arith.constant 0 : index
    %c0_176 = arith.constant 0 : index
    %341 = vector.load %arg52[%c0_175, %c0_176] : memref<256x128xf32, #tpu.memory_space<vmem>>, vector<256x128xf32>
    %cst_177 = arith.constant dense<0.000000e+00> : vector<8x128xf32>
    %342 = tpu.matmul %340, %341, %cst_177 {dimension_numbers = #tpu.dot_dimension_numbers<[1], [0], [0], [1], [0, 0, 1, 1], [], []>} : vector<8x256xf32>, vector<256x128xf32>, vector<8x128xf32> -> vector<8x128xf32>
    %c0_178 = arith.constant 0 : index
    %c0_179 = arith.constant 0 : index
    %343 = vector.load %arg53[%c0_178, %c0_179] : memref<1x128xf32, #tpu.memory_space<vmem>>, vector<1x128xf32>
    %344 = vector.broadcast %343 : vector<1x128xf32> to vector<8x128xf32>
    %345 = arith.addf %342, %344 : vector<8x128xf32>
    %c0_180 = arith.constant 0 : index
    %c0_181 = arith.constant 0 : index
    %346 = vector.load %arg54[%c0_180, %c0_181] : memref<1x128xf32, #tpu.memory_space<vmem>>, vector<1x128xf32>
    %c0_182 = arith.constant 0 : index
    %c0_183 = arith.constant 0 : index
    %347 = vector.load %arg55[%c0_182, %c0_183] : memref<1x128xf32, #tpu.memory_space<vmem>>, vector<1x128xf32>
    %cst_184 = arith.constant dense<0.000000e+00> : vector<8xf32>
    %348 = vector.multi_reduction <add>, %345, %cst_184 [1] : vector<8x128xf32> to vector<8xf32>
    %349 = vector.shape_cast %348 : vector<8xf32> to vector<8x1xf32>
    %cst_185 = arith.constant 1.280000e+02 : f32
    %350 = vector.broadcast %cst_185 : f32 to vector<8x1xf32>
    %351 = arith.divf %349, %350 : vector<8x1xf32>
    %352 = vector.broadcast %351 : vector<8x1xf32> to vector<8x128xf32>
    %353 = arith.subf %345, %352 : vector<8x128xf32>
    %354 = arith.mulf %353, %353 : vector<8x128xf32>
    %cst_186 = arith.constant dense<0.000000e+00> : vector<8xf32>
    %355 = vector.multi_reduction <add>, %354, %cst_186 [1] : vector<8x128xf32> to vector<8xf32>
    %356 = vector.shape_cast %355 : vector<8xf32> to vector<8x1xf32>
    %cst_187 = arith.constant 1.280000e+02 : f32
    %357 = vector.broadcast %cst_187 : f32 to vector<8x1xf32>
    %358 = arith.divf %356, %357 : vector<8x1xf32>
    %cst_188 = arith.constant 9.99999974E-6 : f32
    %359 = vector.broadcast %cst_188 : f32 to vector<8x1xf32>
    %360 = arith.addf %358, %359 : vector<8x1xf32>
    %361 = math.rsqrt %360 : vector<8x1xf32>
    %362 = vector.broadcast %361 : vector<8x1xf32> to vector<8x128xf32>
    %363 = arith.mulf %353, %362 : vector<8x128xf32>
    %364 = vector.broadcast %346 : vector<1x128xf32> to vector<8x128xf32>
    %365 = arith.mulf %363, %364 : vector<8x128xf32>
    %366 = vector.broadcast %347 : vector<1x128xf32> to vector<8x128xf32>
    %367 = arith.addf %365, %366 : vector<8x128xf32>
    %c0_189 = arith.constant 0 : index
    %c0_190 = arith.constant 0 : index
    %368 = vector.load %arg56[%c0_189, %c0_190] : memref<128x64xf32, #tpu.memory_space<vmem>>, vector<128x64xf32>
    %cst_191 = arith.constant dense<0.000000e+00> : vector<8x64xf32>
    %369 = tpu.matmul %367, %368, %cst_191 {dimension_numbers = #tpu.dot_dimension_numbers<[1], [0], [0], [1], [0, 0, 1, 1], [], []>} : vector<8x128xf32>, vector<128x64xf32>, vector<8x64xf32> -> vector<8x64xf32>
    %c0_192 = arith.constant 0 : index
    %c0_193 = arith.constant 0 : index
    %370 = vector.load %arg57[%c0_192, %c0_193] : memref<1x64xf32, #tpu.memory_space<vmem>>, vector<1x64xf32>
    %371 = vector.broadcast %370 : vector<1x64xf32> to vector<8x64xf32>
    %372 = arith.addf %369, %371 : vector<8x64xf32>
    %373 = arith.negf %372 : vector<8x64xf32>
    %374 = math.exp %373 : vector<8x64xf32>
    %cst_194 = arith.constant 1.000000e+00 : f32
    %375 = vector.broadcast %cst_194 : f32 to vector<8x64xf32>
    %376 = arith.addf %375, %374 : vector<8x64xf32>
    %377 = arith.divf %375, %376 : vector<8x64xf32>
    %378 = arith.mulf %372, %377 : vector<8x64xf32>
    %c0_195 = arith.constant 0 : index
    %c0_196 = arith.constant 0 : index
    %379 = vector.load %arg58[%c0_195, %c0_196] : memref<64x128xf32, #tpu.memory_space<vmem>>, vector<64x128xf32>
    %cst_197 = arith.constant dense<0.000000e+00> : vector<8x128xf32>
    %380 = tpu.matmul %378, %379, %cst_197 {dimension_numbers = #tpu.dot_dimension_numbers<[1], [0], [0], [1], [0, 0, 1, 1], [], []>} : vector<8x64xf32>, vector<64x128xf32>, vector<8x128xf32> -> vector<8x128xf32>
    %c0_198 = arith.constant 0 : index
    %c0_199 = arith.constant 0 : index
    %381 = vector.load %arg59[%c0_198, %c0_199] : memref<1x128xf32, #tpu.memory_space<vmem>>, vector<1x128xf32>
    %382 = vector.broadcast %381 : vector<1x128xf32> to vector<8x128xf32>
    %383 = arith.addf %380, %382 : vector<8x128xf32>
    %cst_200 = arith.constant 2.000000e+00 : f32
    %384 = vector.broadcast %cst_200 : f32 to vector<8x128xf32>
    %385 = arith.mulf %384, %367 : vector<8x128xf32>
    %386 = arith.addf %385, %383 : vector<8x128xf32>
    %c0_201 = arith.constant 0 : index
    %c0_202 = arith.constant 0 : index
    %387 = vector.load %arg60[%c0_201, %c0_202] : memref<1x128xf32, #tpu.memory_space<vmem>>, vector<1x128xf32>
    %c0_203 = arith.constant 0 : index
    %c0_204 = arith.constant 0 : index
    %388 = vector.load %arg61[%c0_203, %c0_204] : memref<1x128xf32, #tpu.memory_space<vmem>>, vector<1x128xf32>
    %cst_205 = arith.constant dense<0.000000e+00> : vector<8xf32>
    %389 = vector.multi_reduction <add>, %386, %cst_205 [1] : vector<8x128xf32> to vector<8xf32>
    %390 = vector.shape_cast %389 : vector<8xf32> to vector<8x1xf32>
    %cst_206 = arith.constant 1.280000e+02 : f32
    %391 = vector.broadcast %cst_206 : f32 to vector<8x1xf32>
    %392 = arith.divf %390, %391 : vector<8x1xf32>
    %393 = vector.broadcast %392 : vector<8x1xf32> to vector<8x128xf32>
    %394 = arith.subf %386, %393 : vector<8x128xf32>
    %395 = arith.mulf %394, %394 : vector<8x128xf32>
    %cst_207 = arith.constant dense<0.000000e+00> : vector<8xf32>
    %396 = vector.multi_reduction <add>, %395, %cst_207 [1] : vector<8x128xf32> to vector<8xf32>
    %397 = vector.shape_cast %396 : vector<8xf32> to vector<8x1xf32>
    %cst_208 = arith.constant 1.280000e+02 : f32
    %398 = vector.broadcast %cst_208 : f32 to vector<8x1xf32>
    %399 = arith.divf %397, %398 : vector<8x1xf32>
    %cst_209 = arith.constant 9.99999974E-6 : f32
    %400 = vector.broadcast %cst_209 : f32 to vector<8x1xf32>
    %401 = arith.addf %399, %400 : vector<8x1xf32>
    %402 = math.rsqrt %401 : vector<8x1xf32>
    %403 = vector.broadcast %402 : vector<8x1xf32> to vector<8x128xf32>
    %404 = arith.mulf %394, %403 : vector<8x128xf32>
    %405 = vector.broadcast %387 : vector<1x128xf32> to vector<8x128xf32>
    %406 = arith.mulf %404, %405 : vector<8x128xf32>
    %407 = vector.broadcast %388 : vector<1x128xf32> to vector<8x128xf32>
    %408 = arith.addf %406, %407 : vector<8x128xf32>
    %c0_210 = arith.constant 0 : index
    %c0_211 = arith.constant 0 : index
    %409 = vector.load %arg62[%c0_210, %c0_211] : memref<128x128xf32, #tpu.memory_space<vmem>>, vector<128x128xf32>
    %cst_212 = arith.constant dense<0.000000e+00> : vector<8x128xf32>
    %410 = tpu.matmul %408, %409, %cst_212 {dimension_numbers = #tpu.dot_dimension_numbers<[1], [0], [0], [1], [0, 0, 1, 1], [], []>} : vector<8x128xf32>, vector<128x128xf32>, vector<8x128xf32> -> vector<8x128xf32>
    %c0_213 = arith.constant 0 : index
    %c0_214 = arith.constant 0 : index
    %411 = vector.load %arg63[%c0_213, %c0_214] : memref<1x128xf32, #tpu.memory_space<vmem>>, vector<1x128xf32>
    %412 = vector.broadcast %411 : vector<1x128xf32> to vector<8x128xf32>
    %413 = arith.addf %410, %412 : vector<8x128xf32>
    %414 = arith.negf %413 : vector<8x128xf32>
    %415 = math.exp %414 : vector<8x128xf32>
    %cst_215 = arith.constant 1.000000e+00 : f32
    %416 = vector.broadcast %cst_215 : f32 to vector<8x128xf32>
    %417 = arith.addf %416, %415 : vector<8x128xf32>
    %418 = arith.divf %416, %417 : vector<8x128xf32>
    %c0_216 = arith.constant 0 : index
    %c0_217 = arith.constant 0 : index
    %419 = vector.load %arg64[%c0_216, %c0_217] : memref<8x128xf32, #tpu.memory_space<vmem>>, vector<8x128xf32>
    tpu.vector_store %arg64[%c0_216, %c0_217], %418 {strides = array<i32>} : memref<8x128xf32, #tpu.memory_space<vmem>>, vector<8x128xf32>,
    return
  }
  func.func @transform_0(%arg0: i32) -> (i32, i32) {
    %c0_i32 = arith.constant 0 : i32
    %c0_i32_0 = arith.constant 0 : i32
    return %arg0, %c0_i32 : i32, i32
  }
  func.func @transform_1(%arg0: i32) -> (i32, i32) {
    %c0_i32 = arith.constant 0 : i32
    %c0_i32_0 = arith.constant 0 : i32
    %c0_i32_1 = arith.constant 0 : i32
    return %c0_i32, %c0_i32_0 : i32, i32
  }
  func.func @transform_2(%arg0: i32) -> (i32, i32) {
    %c0_i32 = arith.constant 0 : i32
    %c0_i32_0 = arith.constant 0 : i32
    %c0_i32_1 = arith.constant 0 : i32
    return %c0_i32, %c0_i32_0 : i32, i32
  }
  func.func @transform_3(%arg0: i32) -> (i32, i32) {
    %c0_i32 = arith.constant 0 : i32
    %c0_i32_0 = arith.constant 0 : i32
    %c0_i32_1 = arith.constant 0 : i32
    return %c0_i32, %c0_i32_0 : i32, i32
  }
  func.func @transform_4(%arg0: i32) -> (i32, i32) {
    %c0_i32 = arith.constant 0 : i32
    %c0_i32_0 = arith.constant 0 : i32
    %c0_i32_1 = arith.constant 0 : i32
    return %c0_i32, %c0_i32_0 : i32, i32
  }
  func.func @transform_5(%arg0: i32) -> (i32, i32) {
    %c0_i32 = arith.constant 0 : i32
    %c0_i32_0 = arith.constant 0 : i32
    %c0_i32_1 = arith.constant 0 : i32
    return %c0_i32, %c0_i32_0 : i32, i32
  }
  func.func @transform_6(%arg0: i32) -> (i32, i32) {
    %c0_i32 = arith.constant 0 : i32
    %c0_i32_0 = arith.constant 0 : i32
    %c0_i32_1 = arith.constant 0 : i32
    return %c0_i32, %c0_i32_0 : i32, i32
  }
  func.func @transform_7(%arg0: i32) -> (i32, i32) {
    %c0_i32 = arith.constant 0 : i32
    %c0_i32_0 = arith.constant 0 : i32
    %c0_i32_1 = arith.constant 0 : i32
    return %c0_i32, %c0_i32_0 : i32, i32
  }
  func.func @transform_8(%arg0: i32) -> (i32, i32) {
    %c0_i32 = arith.constant 0 : i32
    %c0_i32_0 = arith.constant 0 : i32
    %c0_i32_1 = arith.constant 0 : i32
    return %c0_i32, %c0_i32_0 : i32, i32
  }
  func.func @transform_9(%arg0: i32) -> (i32, i32) {
    %c0_i32 = arith.constant 0 : i32
    %c0_i32_0 = arith.constant 0 : i32
    %c0_i32_1 = arith.constant 0 : i32
    return %c0_i32, %c0_i32_0 : i32, i32
  }
  func.func @transform_10(%arg0: i32) -> (i32, i32) {
    %c0_i32 = arith.constant 0 : i32
    %c0_i32_0 = arith.constant 0 : i32
    %c0_i32_1 = arith.constant 0 : i32
    return %c0_i32, %c0_i32_0 : i32, i32
  }
  func.func @transform_11(%arg0: i32) -> (i32, i32) {
    %c0_i32 = arith.constant 0 : i32
    %c0_i32_0 = arith.constant 0 : i32
    %c0_i32_1 = arith.constant 0 : i32
    return %c0_i32, %c0_i32_0 : i32, i32
  }
  func.func @transform_12(%arg0: i32) -> (i32, i32) {
    %c0_i32 = arith.constant 0 : i32
    %c0_i32_0 = arith.constant 0 : i32
    %c0_i32_1 = arith.constant 0 : i32
    return %c0_i32, %c0_i32_0 : i32, i32
  }
  func.func @transform_13(%arg0: i32) -> (i32, i32) {
    %c0_i32 = arith.constant 0 : i32
    %c0_i32_0 = arith.constant 0 : i32
    %c0_i32_1 = arith.constant 0 : i32
    return %c0_i32, %c0_i32_0 : i32, i32
  }
  func.func @transform_14(%arg0: i32) -> (i32, i32) {
    %c0_i32 = arith.constant 0 : i32
    %c0_i32_0 = arith.constant 0 : i32
    %c0_i32_1 = arith.constant 0 : i32
    return %c0_i32, %c0_i32_0 : i32, i32
  }
  func.func @transform_15(%arg0: i32) -> (i32, i32) {
    %c0_i32 = arith.constant 0 : i32
    %c0_i32_0 = arith.constant 0 : i32
    %c0_i32_1 = arith.constant 0 : i32
    return %c0_i32, %c0_i32_0 : i32, i32
  }
  func.func @transform_16(%arg0: i32) -> (i32, i32) {
    %c0_i32 = arith.constant 0 : i32
    %c0_i32_0 = arith.constant 0 : i32
    %c0_i32_1 = arith.constant 0 : i32
    return %c0_i32, %c0_i32_0 : i32, i32
  }
  func.func @transform_17(%arg0: i32) -> (i32, i32) {
    %c0_i32 = arith.constant 0 : i32
    %c0_i32_0 = arith.constant 0 : i32
    %c0_i32_1 = arith.constant 0 : i32
    return %c0_i32, %c0_i32_0 : i32, i32
  }
  func.func @transform_18(%arg0: i32) -> (i32, i32) {
    %c0_i32 = arith.constant 0 : i32
    %c0_i32_0 = arith.constant 0 : i32
    %c0_i32_1 = arith.constant 0 : i32
    return %c0_i32, %c0_i32_0 : i32, i32
  }
  func.func @transform_19(%arg0: i32) -> (i32, i32) {
    %c0_i32 = arith.constant 0 : i32
    %c0_i32_0 = arith.constant 0 : i32
    %c0_i32_1 = arith.constant 0 : i32
    return %c0_i32, %c0_i32_0 : i32, i32
  }
  func.func @transform_20(%arg0: i32) -> (i32, i32) {
    %c0_i32 = arith.constant 0 : i32
    %c0_i32_0 = arith.constant 0 : i32
    %c0_i32_1 = arith.constant 0 : i32
    return %c0_i32, %c0_i32_0 : i32, i32
  }
  func.func @transform_21(%arg0: i32) -> (i32, i32) {
    %c0_i32 = arith.constant 0 : i32
    %c0_i32_0 = arith.constant 0 : i32
    %c0_i32_1 = arith.constant 0 : i32
    return %c0_i32, %c0_i32_0 : i32, i32
  }
  func.func @transform_22(%arg0: i32) -> (i32, i32) {
    %c0_i32 = arith.constant 0 : i32
    %c0_i32_0 = arith.constant 0 : i32
    %c0_i32_1 = arith.constant 0 : i32
    return %c0_i32, %c0_i32_0 : i32, i32
  }
  func.func @transform_23(%arg0: i32) -> (i32, i32) {
    %c0_i32 = arith.constant 0 : i32
    %c0_i32_0 = arith.constant 0 : i32
    %c0_i32_1 = arith.constant 0 : i32
    return %c0_i32, %c0_i32_0 : i32, i32
  }
  func.func @transform_24(%arg0: i32) -> (i32, i32) {
    %c0_i32 = arith.constant 0 : i32
    %c0_i32_0 = arith.constant 0 : i32
    %c0_i32_1 = arith.constant 0 : i32
    return %c0_i32, %c0_i32_0 : i32, i32
  }
  func.func @transform_25(%arg0: i32) -> (i32, i32) {
    %c0_i32 = arith.constant 0 : i32
    %c0_i32_0 = arith.constant 0 : i32
    %c0_i32_1 = arith.constant 0 : i32
    return %c0_i32, %c0_i32_0 : i32, i32
  }
  func.func @transform_26(%arg0: i32) -> (i32, i32) {
    %c0_i32 = arith.constant 0 : i32
    %c0_i32_0 = arith.constant 0 : i32
    %c0_i32_1 = arith.constant 0 : i32
    return %c0_i32, %c0_i32_0 : i32, i32
  }
  func.func @transform_27(%arg0: i32) -> (i32, i32) {
    %c0_i32 = arith.constant 0 : i32
    %c0_i32_0 = arith.constant 0 : i32
    %c0_i32_1 = arith.constant 0 : i32
    return %c0_i32, %c0_i32_0 : i32, i32
  }
  func.func @transform_28(%arg0: i32) -> (i32, i32) {
    %c0_i32 = arith.constant 0 : i32
    %c0_i32_0 = arith.constant 0 : i32
    %c0_i32_1 = arith.constant 0 : i32
    return %c0_i32, %c0_i32_0 : i32, i32
  }
  func.func @transform_29(%arg0: i32) -> (i32, i32) {
    %c0_i32 = arith.constant 0 : i32
    %c0_i32_0 = arith.constant 0 : i32
    %c0_i32_1 = arith.constant 0 : i32
    return %c0_i32, %c0_i32_0 : i32, i32
  }
  func.func @transform_30(%arg0: i32) -> (i32, i32) {
    %c0_i32 = arith.constant 0 : i32
    %c0_i32_0 = arith.constant 0 : i32
    %c0_i32_1 = arith.constant 0 : i32
    return %c0_i32, %c0_i32_0 : i32, i32
  }
  func.func @transform_31(%arg0: i32) -> (i32, i32) {
    %c0_i32 = arith.constant 0 : i32
    %c0_i32_0 = arith.constant 0 : i32
    %c0_i32_1 = arith.constant 0 : i32
    return %c0_i32, %c0_i32_0 : i32, i32
  }
  func.func @transform_32(%arg0: i32) -> (i32, i32) {
    %c0_i32 = arith.constant 0 : i32
    %c0_i32_0 = arith.constant 0 : i32
    %c0_i32_1 = arith.constant 0 : i32
    return %c0_i32, %c0_i32_0 : i32, i32
  }
  func.func @transform_33(%arg0: i32) -> (i32, i32) {
    %c0_i32 = arith.constant 0 : i32
    %c0_i32_0 = arith.constant 0 : i32
    %c0_i32_1 = arith.constant 0 : i32
    return %c0_i32, %c0_i32_0 : i32, i32
  }
  func.func @transform_34(%arg0: i32) -> (i32, i32) {
    %c0_i32 = arith.constant 0 : i32
    %c0_i32_0 = arith.constant 0 : i32
    %c0_i32_1 = arith.constant 0 : i32
    return %c0_i32, %c0_i32_0 : i32, i32
  }
  func.func @transform_35(%arg0: i32) -> (i32, i32) {
    %c0_i32 = arith.constant 0 : i32
    %c0_i32_0 = arith.constant 0 : i32
    %c0_i32_1 = arith.constant 0 : i32
    return %c0_i32, %c0_i32_0 : i32, i32
  }
  func.func @transform_36(%arg0: i32) -> (i32, i32) {
    %c0_i32 = arith.constant 0 : i32
    %c0_i32_0 = arith.constant 0 : i32
    %c0_i32_1 = arith.constant 0 : i32
    return %c0_i32, %c0_i32_0 : i32, i32
  }
  func.func @transform_37(%arg0: i32) -> (i32, i32) {
    %c0_i32 = arith.constant 0 : i32
    %c0_i32_0 = arith.constant 0 : i32
    %c0_i32_1 = arith.constant 0 : i32
    return %c0_i32, %c0_i32_0 : i32, i32
  }
  func.func @transform_38(%arg0: i32) -> (i32, i32) {
    %c0_i32 = arith.constant 0 : i32
    %c0_i32_0 = arith.constant 0 : i32
    %c0_i32_1 = arith.constant 0 : i32
    return %c0_i32, %c0_i32_0 : i32, i32
  }
  func.func @transform_39(%arg0: i32) -> (i32, i32) {
    %c0_i32 = arith.constant 0 : i32
    %c0_i32_0 = arith.constant 0 : i32
    %c0_i32_1 = arith.constant 0 : i32
    return %c0_i32, %c0_i32_0 : i32, i32
  }
  func.func @transform_40(%arg0: i32) -> (i32, i32) {
    %c0_i32 = arith.constant 0 : i32
    %c0_i32_0 = arith.constant 0 : i32
    %c0_i32_1 = arith.constant 0 : i32
    return %c0_i32, %c0_i32_0 : i32, i32
  }
  func.func @transform_41(%arg0: i32) -> (i32, i32) {
    %c0_i32 = arith.constant 0 : i32
    %c0_i32_0 = arith.constant 0 : i32
    %c0_i32_1 = arith.constant 0 : i32
    return %c0_i32, %c0_i32_0 : i32, i32
  }
  func.func @transform_42(%arg0: i32) -> (i32, i32) {
    %c0_i32 = arith.constant 0 : i32
    %c0_i32_0 = arith.constant 0 : i32
    %c0_i32_1 = arith.constant 0 : i32
    return %c0_i32, %c0_i32_0 : i32, i32
  }
  func.func @transform_43(%arg0: i32) -> (i32, i32) {
    %c0_i32 = arith.constant 0 : i32
    %c0_i32_0 = arith.constant 0 : i32
    %c0_i32_1 = arith.constant 0 : i32
    return %c0_i32, %c0_i32_0 : i32, i32
  }
  func.func @transform_44(%arg0: i32) -> (i32, i32) {
    %c0_i32 = arith.constant 0 : i32
    %c0_i32_0 = arith.constant 0 : i32
    %c0_i32_1 = arith.constant 0 : i32
    return %c0_i32, %c0_i32_0 : i32, i32
  }
  func.func @transform_45(%arg0: i32) -> (i32, i32) {
    %c0_i32 = arith.constant 0 : i32
    %c0_i32_0 = arith.constant 0 : i32
    %c0_i32_1 = arith.constant 0 : i32
    return %c0_i32, %c0_i32_0 : i32, i32
  }
  func.func @transform_46(%arg0: i32) -> (i32, i32) {
    %c0_i32 = arith.constant 0 : i32
    %c0_i32_0 = arith.constant 0 : i32
    %c0_i32_1 = arith.constant 0 : i32
    return %c0_i32, %c0_i32_0 : i32, i32
  }
  func.func @transform_47(%arg0: i32) -> (i32, i32) {
    %c0_i32 = arith.constant 0 : i32
    %c0_i32_0 = arith.constant 0 : i32
    %c0_i32_1 = arith.constant 0 : i32
    return %c0_i32, %c0_i32_0 : i32, i32
  }
  func.func @transform_48(%arg0: i32) -> (i32, i32) {
    %c0_i32 = arith.constant 0 : i32
    %c0_i32_0 = arith.constant 0 : i32
    %c0_i32_1 = arith.constant 0 : i32
    return %c0_i32, %c0_i32_0 : i32, i32
  }
  func.func @transform_49(%arg0: i32) -> (i32, i32) {
    %c0_i32 = arith.constant 0 : i32
    %c0_i32_0 = arith.constant 0 : i32
    %c0_i32_1 = arith.constant 0 : i32
    return %c0_i32, %c0_i32_0 : i32, i32
  }
  func.func @transform_50(%arg0: i32) -> (i32, i32) {
    %c0_i32 = arith.constant 0 : i32
    %c0_i32_0 = arith.constant 0 : i32
    %c0_i32_1 = arith.constant 0 : i32
    return %c0_i32, %c0_i32_0 : i32, i32
  }
  func.func @transform_51(%arg0: i32) -> (i32, i32) {
    %c0_i32 = arith.constant 0 : i32
    %c0_i32_0 = arith.constant 0 : i32
    %c0_i32_1 = arith.constant 0 : i32
    return %c0_i32, %c0_i32_0 : i32, i32
  }
  func.func @transform_52(%arg0: i32) -> (i32, i32) {
    %c0_i32 = arith.constant 0 : i32
    %c0_i32_0 = arith.constant 0 : i32
    %c0_i32_1 = arith.constant 0 : i32
    return %c0_i32, %c0_i32_0 : i32, i32
  }
  func.func @transform_53(%arg0: i32) -> (i32, i32) {
    %c0_i32 = arith.constant 0 : i32
    %c0_i32_0 = arith.constant 0 : i32
    %c0_i32_1 = arith.constant 0 : i32
    return %c0_i32, %c0_i32_0 : i32, i32
  }
  func.func @transform_54(%arg0: i32) -> (i32, i32) {
    %c0_i32 = arith.constant 0 : i32
    %c0_i32_0 = arith.constant 0 : i32
    %c0_i32_1 = arith.constant 0 : i32
    return %c0_i32, %c0_i32_0 : i32, i32
  }
  func.func @transform_55(%arg0: i32) -> (i32, i32) {
    %c0_i32 = arith.constant 0 : i32
    %c0_i32_0 = arith.constant 0 : i32
    %c0_i32_1 = arith.constant 0 : i32
    return %c0_i32, %c0_i32_0 : i32, i32
  }
  func.func @transform_56(%arg0: i32) -> (i32, i32) {
    %c0_i32 = arith.constant 0 : i32
    %c0_i32_0 = arith.constant 0 : i32
    %c0_i32_1 = arith.constant 0 : i32
    return %c0_i32, %c0_i32_0 : i32, i32
  }
  func.func @transform_57(%arg0: i32) -> (i32, i32) {
    %c0_i32 = arith.constant 0 : i32
    %c0_i32_0 = arith.constant 0 : i32
    %c0_i32_1 = arith.constant 0 : i32
    return %c0_i32, %c0_i32_0 : i32, i32
  }
  func.func @transform_58(%arg0: i32) -> (i32, i32) {
    %c0_i32 = arith.constant 0 : i32
    %c0_i32_0 = arith.constant 0 : i32
    %c0_i32_1 = arith.constant 0 : i32
    return %c0_i32, %c0_i32_0 : i32, i32
  }
  func.func @transform_59(%arg0: i32) -> (i32, i32) {
    %c0_i32 = arith.constant 0 : i32
    %c0_i32_0 = arith.constant 0 : i32
    %c0_i32_1 = arith.constant 0 : i32
    return %c0_i32, %c0_i32_0 : i32, i32
  }
  func.func @transform_60(%arg0: i32) -> (i32, i32) {
    %c0_i32 = arith.constant 0 : i32
    %c0_i32_0 = arith.constant 0 : i32
    %c0_i32_1 = arith.constant 0 : i32
    return %c0_i32, %c0_i32_0 : i32, i32
  }
  func.func @transform_61(%arg0: i32) -> (i32, i32) {
    %c0_i32 = arith.constant 0 : i32
    %c0_i32_0 = arith.constant 0 : i32
    %c0_i32_1 = arith.constant 0 : i32
    return %c0_i32, %c0_i32_0 : i32, i32
  }
  func.func @transform_62(%arg0: i32) -> (i32, i32) {
    %c0_i32 = arith.constant 0 : i32
    %c0_i32_0 = arith.constant 0 : i32
    %c0_i32_1 = arith.constant 0 : i32
    return %c0_i32, %c0_i32_0 : i32, i32
  }
  func.func @transform_63(%arg0: i32) -> (i32, i32) {
    %c0_i32 = arith.constant 0 : i32
    %c0_i32_0 = arith.constant 0 : i32
    return %arg0, %c0_i32 : i32, i32
  }
}

</mosaic_0001>

<bundles_post_ra>
// kernel: tpu_custom_call.1
= control target key start
LH: loop header
LB: loop body
LE: loop exit
PB: predicated region body
PF: predicated region fallthrough
CT: control target
= control target key end

     0   :  { %s5685_s6 = smov 1   ;;  %s5686_s10 = smov 2   ;;  %s6903_s0 = inlined_call_operand.smem [shape: u32[64], index: -1, kind: input, shape index: {}] }
   0x1   :  { %s5808_s5 = sld [smem:[%s6903_s0]]   ;;  %s5687_s14 = smov 3  }
   0x2   :  { %s5813_s9 = sld [smem:[%s6903_s0 + %s5685_s6]]   ;;  %s5688_s18 = smov 4  }
   0x3   :  { %s5818_s13 = sld [smem:[%s6903_s0 + %s5686_s10]]   ;;  %s5689_s22 = smov 5  }
   0x4   :  { %s5823_s17 = sld [smem:[%s6903_s0 + %s5687_s14]]   ;;  %s5690_s26 = smov 6  }
   0x5   :  { %s5828_s21 = sld [smem:[%s6903_s0 + %s5688_s18]]   ;;  %s5691_s30 = smov 7  }
   0x6   :  { %s5833_s25 = sld [smem:[%s6903_s0 + %s5689_s22]]   ;;  %s5692_s4 = smov 8  }
   0x7   :  { %6944 = sst [smem:[#allocation95_spill]] %s5808_s5  ;;  %s5693_s10 = smov 9  }
   0x8   :  { %s5838_s29 = sld [smem:[%s6903_s0 + %s5690_s26]]   ;;  %s5694_s15 = smov 10  }
   0x9   :  { %6945 = sst [smem:[#allocation96_spill]] %s5818_s13  ;;  %s5695_s20 = smov 11  }
   0xa   :  { %s5843_s3 = sld [smem:[%s6903_s0 + %s5691_s30]]   ;;  %s5696_s26 = smov 12  }
   0xb   :  { %6946 = sst [smem:[#allocation97_spill]] %s5828_s21  ;;  %s5697_s1 = smov 13  }
   0xc   :  { %6947 = sst [smem:[#allocation98_spill]] %s5833_s25  ;;  %s5698_s7 = smov 14  }
   0xd   :  { %s5848_s8 = sld [smem:[%s6903_s0 + %s5692_s4]]   ;;  %s5700_s22 = smov 16  }
   0xe   :  { %s5853_s14 = sld [smem:[%s6903_s0 + %s5693_s10]]   ;;  %s5701_s28 = smov 17  }
   0xf   :  { %s5858_s19 = sld [smem:[%s6903_s0 + %s5694_s15]]   ;;  %s5699_s15 = smov 15  }
  0x10   :  { %6948 = sst [smem:[#allocation99_spill]] %s5843_s3 }
  0x11   :  { %s5863_s24 = sld [smem:[%s6903_s0 + %s5695_s20]]  }
  0x12   :  { %s5868_s30 = sld [smem:[%s6903_s0 + %s5696_s26]]  }
  0x13   :  { %s5873_s6 = sld [smem:[%s6903_s0 + %s5697_s1]]  }
  0x14   :  { %6949 = sst [smem:[#allocation100_spill]] %s5853_s14 }
  0x15   :  { %s5878_s12 = sld [smem:[%s6903_s0 + %s5698_s7]]   ;;  %s5702_s7 = smov 18  }
  0x16   :  { %s5883_s20 = sld [smem:[%s6903_s0 + %s5699_s15]]   ;;  %s5703_s15 = smov 19  }
  0x17   :  { %6950 = sst [smem:[#allocation101_spill]] %s5863_s24 }
  0x18   :  { %6951 = sst [smem:[#allocation102_spill]] %s5868_s30 }
  0x19   :  { %6952 = sst [smem:[#allocation103_spill]] %s5873_s6 }
  0x1a   :  { %s5888_s27 = sld [smem:[%s6903_s0 + %s5700_s22]]   ;;  %s5704_s22 = smov 20  }
  0x1b   :  { %6953 = sst [smem:[#allocation104_spill]] %s5878_s12 }
  0x1c   :  { %6954 = sst [smem:[#allocation105_spill]] %s5883_s20 }
  0x1d   :  { %s5893_s4 = sld [smem:[%s6903_s0 + %s5701_s28]]   ;;  %s5705_s28 = smov 21  }
  0x1e   :  { %s5898_s6 = sld [smem:[%s6903_s0 + %s5702_s7]]   ;;  %s5706_s7 = smov 22  }
  0x1f   :  { %s5903_s20 = sld [smem:[%s6903_s0 + %s5703_s15]]   ;;  %s5707_s15 = smov 23  }
  0x20   :  { %s5908_s30 = sld [smem:[%s6903_s0 + %s5704_s22]]   ;;  %s5708_s22 = smov 24  }
  0x21   :  { %s5913_s24 = sld [smem:[%s6903_s0 + %s5705_s28]]   ;;  %s5709_s28 = smov 25  }
  0x22   :  { %s5918_s25 = sld [smem:[%s6903_s0 + %s5706_s7]]   ;;  %s5710_s7 = smov 26  }
  0x23   :  { %6955 = sst [smem:[#allocation106_spill]] %s5893_s4 }
  0x24   :  { %s5928_s4 = sld [smem:[%s6903_s0 + %s5708_s22]]   ;;  %s5712_s22 = smov 28  }
  0x25   :  { %6956 = sst [smem:[#allocation107_spill]] %s5903_s20 }
  0x26   :  { %s5923_s20 = sld [smem:[%s6903_s0 + %s5707_s15]]   ;;  %s5711_s15 = smov 27  }
  0x27   :  { %6957 = sst [smem:[#allocation108_spill]] %s5913_s24 }
  0x28   :  { %6958 = sst [smem:[#allocation109_spill]] %s5918_s25 }
  0x29   :  { %s5933_s24 = sld [smem:[%s6903_s0 + %s5709_s28]]   ;;  %s5713_s28 = smov 29  }
  0x2a   :  { %6959 = sst [smem:[#allocation110_spill]] %s5928_s4 }
  0x2b   :  { %s5938_s25 = sld [smem:[%s6903_s0 + %s5710_s7]]   ;;  %s5714_s7 = smov 30  }
  0x2c   :  { %s5943_s12 = sld [smem:[%s6903_s0 + %s5711_s15]]   ;;  %s5715_s15 = smov 31  }
  0x2d   :  { %s5948_s4 = sld [smem:[%s6903_s0 + %s5712_s22]]   ;;  %s5716_s22 = smov 32  }
  0x2e   :  { %s5958_s14 = sld [smem:[%s6903_s0 + %s5714_s7]]   ;;  %s5718_s7 = smov 34  }
  0x2f   :  { %6960 = sst [smem:[#allocation111_spill]] %s5933_s24 }
  0x30   :  { %s5953_s24 = sld [smem:[%s6903_s0 + %s5713_s28]]   ;;  %s5717_s28 = smov 33  }
  0x31   :  { %s5968_s3 = sld [smem:[%s6903_s0 + %s5716_s22]]   ;;  %s5720_s22 = smov 36  }
  0x32   :  { %6961 = sst [smem:[#allocation112_spill]] %s5943_s12 }
  0x33   :  { %s5963_s12 = sld [smem:[%s6903_s0 + %s5715_s15]]   ;;  %s5719_s15 = smov 35  }
  0x34   :  { %s5978_s21 = sld [smem:[%s6903_s0 + %s5718_s7]]   ;;  %s5722_s7 = smov 38  }
  0x36   :  { %6962 = sst [smem:[#allocation113_spill]] %s5953_s24 }
  0x37   :  { %6964 = sst [smem:[#allocation115_spill]] %s5968_s3 }
  0x38   :  { %s5973_s24 = sld [smem:[%s6903_s0 + %s5717_s28]]   ;;  %s5721_s28 = smov 37  }
  0x39   :  { %6963 = sst [smem:[#allocation114_spill]] %s5963_s12 }
  0x3a   :  { %6965 = sst [smem:[#allocation116_spill]] %s5978_s21 }
  0x3b   :  { %s5983_s12 = sld [smem:[%s6903_s0 + %s5719_s15]]   ;;  %s5723_s15 = smov 39  }
  0x3c   :  { %s5988_s3 = sld [smem:[%s6903_s0 + %s5720_s22]]   ;;  %s5724_s22 = smov 40  }
  0x3d   :  { %s5993_s13 = sld [smem:[%s6903_s0 + %s5721_s28]]   ;;  %s5725_s28 = smov 41  }
  0x3e   :  { %s5998_s21 = sld [smem:[%s6903_s0 + %s5722_s7]]   ;;  %s5726_s7 = smov 42  }
  0x3f   :  { %s6008_s5 = sld [smem:[%s6903_s0 + %s5724_s22]]   ;;  %s5728_s22 = smov 44  }
  0x41   :  { %6966 = sst [smem:[#allocation117_spill]] %s5983_s12 }
  0x42   :  { %s6003_s12 = sld [smem:[%s6903_s0 + %s5723_s15]]   ;;  %s5727_s15 = smov 43  }
  0x43   :  { %6967 = sst [smem:[#allocation118_spill]] %s5993_s13 }
  0x44   :  { %6968 = sst [smem:[#allocation119_spill]] %s5998_s21 }
  0x45   :  { %6970 = sst [smem:[#allocation121_spill]] %s6008_s5 }
  0x46   :  { %s6013_s13 = sld [smem:[%s6903_s0 + %s5725_s28]]   ;;  %s5729_s28 = smov 45  }
  0x47   :  { %s6018_s21 = sld [smem:[%s6903_s0 + %s5726_s7]]   ;;  %s5730_s7 = smov 46  }
  0x48   :  { %6969 = sst [smem:[#allocation120_spill]] %s6003_s12 }
  0x49   :  { %s6023_s12 = sld [smem:[%s6903_s0 + %s5727_s15]]   ;;  %s5731_s15 = smov 47  }
  0x4a   :  { %s6028_s5 = sld [smem:[%s6903_s0 + %s5728_s22]]   ;;  %s5732_s22 = smov 48  }
  0x4c   :  { %6971 = sst [smem:[#allocation122_spill]] %s6013_s13 }
  0x4d   :  { %6972 = sst [smem:[#allocation123_spill]] %s6018_s21 }
  0x4e   :  { %s6033_s13 = sld [smem:[%s6903_s0 + %s5729_s28]]   ;;  %s5733_s28 = smov 49  }
  0x4f   :  { %6973 = sst [smem:[#allocation124_spill]] %s6023_s12 }
  0x50   :  { %6974 = sst [smem:[#allocation125_spill]] %s6028_s5 }
  0x51   :  { %s6038_s21 = sld [smem:[%s6903_s0 + %s5730_s7]]   ;;  %s5734_s7 = smov 50  }
  0x52   :  { %s6043_s12 = sld [smem:[%s6903_s0 + %s5731_s15]]   ;;  %s5735_s15 = smov 51  }
  0x53   :  { %s6048_s5 = sld [smem:[%s6903_s0 + %s5732_s22]]   ;;  %s5736_s22 = smov 52  }
  0x54   :  { %6975 = sst [smem:[#allocation126_spill]] %s6033_s13 }
  0x55   :  { %s6053_s13 = sld [smem:[%s6903_s0 + %s5733_s28]]   ;;  %s5737_s28 = smov 53  }
  0x57   :  { %6976 = sst [smem:[#allocation127_spill]] %s6038_s21 }
  0x58   :  { %6977 = sst [smem:[#allocation128_spill]] %s6043_s12 }
  0x59   :  { %6978 = sst [smem:[#allocation129_spill]] %s6048_s5 }
  0x5a   :  { %s6058_s21 = sld [smem:[%s6903_s0 + %s5734_s7]]   ;;  %s5738_s7 = smov 54  }
  0x5b   :  { %6979 = sst [smem:[#allocation130_spill]] %s6053_s13 }
  0x5c   :  { %s6063_s12 = sld [smem:[%s6903_s0 + %s5735_s15]]   ;;  %s5739_s15 = smov 55  }
  0x5d   :  { %s6068_s5 = sld [smem:[%s6903_s0 + %s5736_s22]]   ;;  %s5740_s22 = smov 56  }
  0x5e   :  { %s6073_s13 = sld [smem:[%s6903_s0 + %s5737_s28]]   ;;  %s5741_s28 = smov 57  }
  0x60   :  { %6980 = sst [smem:[#allocation131_spill]] %s6058_s21 }
  0x61   :  { %s6078_s21 = sld [smem:[%s6903_s0 + %s5738_s7]]   ;;  %s5742_s7 = smov 58  }
  0x62   :  { %6981 = sst [smem:[#allocation132_spill]] %s6063_s12 }
  0x63   :  { %6982 = sst [smem:[#allocation133_spill]] %s6068_s5 }
  0x64   :  { %6983 = sst [smem:[#allocation134_spill]] %s6073_s13 }
  0x65   :  { %s6083_s12 = sld [smem:[%s6903_s0 + %s5739_s15]]   ;;  %s5743_s15 = smov 59  }
  0x66   :  { %s6088_s5 = sld [smem:[%s6903_s0 + %s5740_s22]]   ;;  %s5744_s22 = smov 60  }
  0x67   :  { %6984 = sst [smem:[#allocation135_spill]] %s6078_s21 }
  0x68   :  { %s6093_s13 = sld [smem:[%s6903_s0 + %s5741_s28]]   ;;  %s5745_s28 = smov 61  }
  0x69   :  { %s6098_s21 = sld [smem:[%s6903_s0 + %s5742_s7]]   ;;  %s5746_s7 = smov 62  }
  0x6b   :  { %6985 = sst [smem:[#allocation136_spill]] %s6083_s12 }
  0x6c   :  { %6986 = sst [smem:[#allocation137_spill]] %s6088_s5 }
  0x6d   :  { %s6103_s12 = sld [smem:[%s6903_s0 + %s5743_s15]]   ;;  %s5747_s15 = smov 63  }
  0x6e   :  { %6987 = sst [smem:[#allocation138_spill]] %s6093_s13 }
  0x6f   :  { %6988 = sst [smem:[#allocation139_spill]] %s6098_s21 }
  0x70   :  { %s6108_s5 = sld [smem:[%s6903_s0 + %s5744_s22]]  }
  0x71   :  { %s6113_s13 = sld [smem:[%s6903_s0 + %s5745_s28]]  }
  0x72   :  { %s6118_s21 = sld [smem:[%s6903_s0 + %s5746_s7]]  }
  0x73   :  { %6989 = sst [smem:[#allocation140_spill]] %s6103_s12 }
  0x74   :  { %s6123_s12 = sld [smem:[%s6903_s0 + %s5747_s15]]  }
  0x75   :  { %132 = vsyncpa [#allocation3], 0 }
  0x76   :  { %133 = vsyncpa [#allocation6], 0 }
  0x77   :  { %134 = vsyncpa [#allocation9], 0 }
  0x78   :  { %135 = vsyncpa [#allocation12], 0 }
  0x79   :  { %136 = vsyncpa [#allocation15], 0 }
  0x7a   :  { %137 = vsyncpa [#allocation18], 0 }
  0x7b   :  { %138 = vsyncpa [#allocation21], 0 }
  0x7c   :  { %139 = vsyncpa [#allocation24], 0 }
  0x7d   :  { %140 = vsyncpa [#allocation27], 0 }
  0x7e   :  { %141 = vsyncpa [#allocation30], 0 }
  0x7f   :  { %142 = vsyncpa [#allocation33], 0 }
  0x80   :  { %143 = vsyncpa [#allocation36], 0 }
  0x81   :  { %144 = vsyncpa [#allocation39], 0 }
  0x82   :  { %145 = vsyncpa [#allocation42], 0 }
  0x83   :  { %146 = vsyncpa [#allocation45], 0 }
  0x84   :  { %147 = vsyncpa [#allocation48], 0 }
  0x85   :  { %148 = vsyncpa [#allocation51], 0 }
  0x86   :  { %149 = vsyncpa [#allocation54], 0 }
  0x87   :  { %150 = vsyncpa [#allocation57], 0 }
  0x88   :  { %151 = vsyncpa [#allocation60], 0 }
  0x89   :  { %152 = vsyncpa [#allocation63], 0 }
  0x8a   :  { %153 = vsyncpa [#allocation66], 0 }
  0x8b   :  { %154 = vsyncpa [#allocation69], 0 }
  0x8c   :  { %155 = vsyncpa [#allocation4], 0  ;;  %s5748_s0 = smov [#allocation5]   ;;  %s4647_s23 = scalar_lea.hbm %s5813_s9, 2048 }
  0x8d   :  { %s171_s22 = sshll.u32 %s5748_s0, 4  ;;  %p4648_p0 = scmp.ne.s32.totalorder %s5813_s9, %s4647_s23  ;;  %s172_s22 = int_to_ptr.vmem [resolvable:$true] %s171_s22 }
  0x8e   :  { %p4651_p1 = scmp.lt.u32.totalorder %s4647_s23, %s5813_s9 }
  0x90   :  { %p4653_p2 = pnand %p4651_p1, %p4648_p0 }
  0x92   :  { %4656 = shalt.err (!%p4653_p2)
}
  0x93   :  { %s4657_s26 = scalar_lea.vmem %s172_s22, 2048  ;;  %p4662_p4 = scmp.lt.s32.totalorder %s172_s22, %s172_s22 }
  0x94   :  { %p4658_p3 = scmp.ne.s32.totalorder %s172_s22, %s4657_s26  ;;  %p4663_p5 = scmp.lt.s32.totalorder %s4657_s26, %s4657_s26 }
  0x96   :  { %p4664_p6 = por %p4663_p5, %p4662_p4 }
  0x98   :  { %p4665_p7 = pnand %p4664_p6, %p4658_p3 }
  0x9a   :  { %4668 = shalt.err (!%p4665_p7)
}
  0x9b   :  { %s5749_s28 = smov 128   ;;  %s5750_s1 = smov 8  }
  0x9c   :  { %177 = dma.hbm_to_vmem [thread:$0]  %s5813_s9, 2048, %s172_s22, [#allocation6], %s5749_s28, %s5749_s28, %s5750_s1  }
  0x9d   :  { %s5751_s2 = smov [#allocation8]   ;;  %s5752_s10 = smov [#allocation11]  }
  0x9e   :  { %s194_s7 = sshll.u32 %s5751_s2, 4  ;;  %s216_s11 = sshll.u32 %s5752_s10, 4  ;;  %s195_s7 = int_to_ptr.vmem [resolvable:$true] %s194_s7  ;;  %s217_s11 = int_to_ptr.vmem [resolvable:$true] %s216_s11 }
  0x9f   :  { %s4669_s15 = scalar_lea.hbm %s5823_s17, 16 }
  0xa0   :  { %p4670_p8 = scmp.ne.s32.totalorder %s5823_s17, %s4669_s15  ;;  %p4673_p9 = scmp.lt.u32.totalorder %s4669_s15, %s5823_s17 }
  0xa2   :  { %p4675_p10 = pnand %p4673_p9, %p4670_p8 }
  0xa4   :  { %4678 = shalt.err (!%p4675_p10)
}
  0xa5   :  { %s4679_s16 = scalar_lea.vmem %s195_s7, 16  ;;  %s4683_s18 = scalar_lea.vmem %s195_s7, 32 }
  0xa6   :  { %p4680_p11 = scmp.ne.s32.totalorder %s195_s7, %s4679_s16  ;;  %p4684_p12 = scmp.lt.s32.totalorder %s195_s7, %s195_s7 }
  0xa7   :  { %p4685_p13 = scmp.lt.s32.totalorder %s4683_s18, %s4679_s16 }
  0xa9   :  { %p4686_p0 = por %p4685_p13, %p4684_p12 }
  0xab   :  { %p4687_p1 = pnand %p4686_p0, %p4680_p11 }
  0xad   :  { %4690 = shalt.err (!%p4687_p1)
}
  0xae   :  { %197 = dma.hbm_to_vmem [thread:$0]  %s5823_s17, 16, %s195_s7, [#allocation9]  }
  0xaf   :  { %s4691_s9 = scalar_lea.hbm %s5838_s29, 16 }
  0xb0   :  { %p4692_p2 = scmp.ne.s32.totalorder %s5838_s29, %s4691_s9  ;;  %p4695_p3 = scmp.lt.u32.totalorder %s4691_s9, %s5838_s29 }
  0xb2   :  { %p4697_p4 = pnand %p4695_p3, %p4692_p2 }
  0xb4   :  { %4700 = shalt.err (!%p4697_p4)
}
  0xb5   :  { %s4701_s0 = scalar_lea.vmem %s217_s11, 16  ;;  %s4705_s22 = scalar_lea.vmem %s217_s11, 32 }
  0xb6   :  { %p4702_p5 = scmp.ne.s32.totalorder %s217_s11, %s4701_s0  ;;  %p4706_p6 = scmp.lt.s32.totalorder %s217_s11, %s217_s11 }
  0xb7   :  { %p4707_p7 = scmp.lt.s32.totalorder %s4705_s22, %s4701_s0 }
  0xb9   :  { %p4708_p8 = por %p4707_p7, %p4706_p6 }
  0xbb   :  { %p4709_p9 = pnand %p4708_p8, %p4702_p5 }
  0xbd   :  { %4712 = shalt.err (!%p4709_p9)
}
  0xbe   :  { %219 = dma.hbm_to_vmem [thread:$0]  %s5838_s29, 16, %s217_s11, [#allocation12]  }
  0xbf   :  { %s5753_s17 = smov [#allocation14]   ;;  %s5754_s26 = smov [#allocation17]  }
  0xc0   :  { %s238_s23 = sshll.u32 %s5753_s17, 4  ;;  %s258_s2 = sshll.u32 %s5754_s26, 4  ;;  %s239_s23 = int_to_ptr.vmem [resolvable:$true] %s238_s23  ;;  %s259_s2 = int_to_ptr.vmem [resolvable:$true] %s258_s2 }
  0xc1   :  { %s4713_s7 = scalar_lea.hbm %s5848_s8, 16 }
  0xc2   :  { %p4714_p10 = scmp.ne.s32.totalorder %s5848_s8, %s4713_s7  ;;  %p4717_p11 = scmp.lt.u32.totalorder %s4713_s7, %s5848_s8 }
  0xc4   :  { %p4719_p12 = pnand %p4717_p11, %p4714_p10 }
  0xc6   :  { %4722 = shalt.err (!%p4719_p12)
}
  0xc7   :  { %s4723_s10 = scalar_lea.vmem %s239_s23, 16  ;;  %s4727_s15 = scalar_lea.vmem %s239_s23, 32 }
  0xc8   :  { %p4724_p13 = scmp.ne.s32.totalorder %s239_s23, %s4723_s10  ;;  %p4728_p0 = scmp.lt.s32.totalorder %s239_s23, %s239_s23 }
  0xc9   :  { %p4729_p1 = scmp.lt.s32.totalorder %s4727_s15, %s4723_s10 }
  0xcb   :  { %p4730_p2 = por %p4729_p1, %p4728_p0 }
  0xcd   :  { %p4731_p3 = pnand %p4730_p2, %p4724_p13 }
  0xcf   :  { %4734 = shalt.err (!%p4731_p3)
}
  0xd0   :  { %241 = dma.hbm_to_vmem [thread:$0]  %s5848_s8, 16, %s239_s23, [#allocation15]  }
  0xd1   :  { %s4735_s29 = scalar_lea.hbm %s5858_s19, 16 }
  0xd2   :  { %p4736_p4 = scmp.ne.s32.totalorder %s5858_s19, %s4735_s29  ;;  %p4739_p5 = scmp.lt.u32.totalorder %s4735_s29, %s5858_s19 }
  0xd4   :  { %p4741_p6 = pnand %p4739_p5, %p4736_p4 }
  0xd6   :  { %4744 = shalt.err (!%p4741_p6)
}
  0xd7   :  { %s4745_s11 = scalar_lea.vmem %s259_s2, 16  ;;  %s4749_s16 = scalar_lea.vmem %s259_s2, 32 }
  0xd8   :  { %p4746_p7 = scmp.ne.s32.totalorder %s259_s2, %s4745_s11  ;;  %p4750_p8 = scmp.lt.s32.totalorder %s259_s2, %s259_s2 }
  0xd9   :  { %p4751_p9 = scmp.lt.s32.totalorder %s4749_s16, %s4745_s11 }
  0xdb   :  { %p4752_p10 = por %p4751_p9, %p4750_p8 }
  0xdd   :  { %p4753_p11 = pnand %p4752_p10, %p4746_p7 }
  0xdf   :  { %4756 = shalt.err (!%p4753_p11)
}
  0xe0   :  { %261 = dma.hbm_to_vmem [thread:$0]  %s5858_s19, 16, %s259_s2, [#allocation18]  }
  0xe1   :  { %s5755_s8 = smov [#allocation20]   ;;  %s5756_s9 = smov [#allocation23]  }
  0xe2   :  { %s286_s18 = sshll.u32 %s5755_s8, 4  ;;  %s308_s0 = sshll.u32 %s5756_s9, 4  ;;  %s287_s18 = int_to_ptr.vmem [resolvable:$true] %s286_s18  ;;  %s309_s0 = int_to_ptr.vmem [resolvable:$true] %s308_s0 }
  0xe3   :  { %s4757_s22 = scalar_lea.hbm %s5888_s27, 16 }
  0xe4   :  { %p4758_p12 = scmp.ne.s32.totalorder %s5888_s27, %s4757_s22  ;;  %p4761_p13 = scmp.lt.u32.totalorder %s4757_s22, %s5888_s27 }
  0xe6   :  { %p4763_p0 = pnand %p4761_p13, %p4758_p12 }
  0xe8   :  { %4766 = shalt.err (!%p4763_p0)
}
  0xe9   :  { %s4767_s17 = scalar_lea.vmem %s287_s18, 16  ;;  %s4771_s23 = scalar_lea.vmem %s287_s18, 32 }
  0xea   :  { %p4768_p1 = scmp.ne.s32.totalorder %s287_s18, %s4767_s17  ;;  %p4772_p2 = scmp.lt.s32.totalorder %s287_s18, %s287_s18 }
  0xeb   :  { %p4773_p3 = scmp.lt.s32.totalorder %s4771_s23, %s4767_s17 }
  0xed   :  { %p4774_p4 = por %p4773_p3, %p4772_p2 }
  0xef   :  { %p4775_p5 = pnand %p4774_p4, %p4768_p1 }
  0xf1   :  { %4778 = shalt.err (!%p4775_p5)
}
  0xf2   :  { %289 = dma.hbm_to_vmem [thread:$0]  %s5888_s27, 16, %s287_s18, [#allocation21]  }
  0xf3   :  { %s4779_s19 = scalar_lea.hbm %s5898_s6, 32 }
  0xf4   :  { %p4780_p6 = scmp.ne.s32.totalorder %s5898_s6, %s4779_s19  ;;  %p4783_p7 = scmp.lt.u32.totalorder %s4779_s19, %s5898_s6 }
  0xf6   :  { %p4785_p8 = pnand %p4783_p7, %p4780_p6 }
  0xf8   :  { %4788 = shalt.err (!%p4785_p8)
}
  0xf9   :  { %s4789_s26 = scalar_lea.vmem %s309_s0, 32  ;;  %p4794_p10 = scmp.lt.s32.totalorder %s309_s0, %s309_s0 }
  0xfa   :  { %p4790_p9 = scmp.ne.s32.totalorder %s309_s0, %s4789_s26  ;;  %p4795_p11 = scmp.lt.s32.totalorder %s4789_s26, %s4789_s26 }
  0xfc   :  { %p4796_p12 = por %p4795_p11, %p4794_p10 }
  0xfe   :  { %p4797_p13 = pnand %p4796_p12, %p4790_p9 }
 0x100   :  { %4800 = shalt.err (!%p4797_p13)
}
 0x101   :  { %311 = dma.hbm_to_vmem [thread:$0]  %s5898_s6, 32, %s309_s0, [#allocation24]  }
 0x102   :  { %s5757_s2 = smov [#allocation26]   ;;  %s5758_s7 = smov [#allocation29]  }
 0x103   :  { %s328_s27 = sshll.u32 %s5757_s2, 4  ;;  %s350_s10 = sshll.u32 %s5758_s7, 4  ;;  %s329_s27 = int_to_ptr.vmem [resolvable:$true] %s328_s27  ;;  %s351_s10 = int_to_ptr.vmem [resolvable:$true] %s350_s10 }
 0x104   :  { %s4801_s15 = scalar_lea.hbm %s5908_s30, 32 }
 0x105   :  { %p4802_p0 = scmp.ne.s32.totalorder %s5908_s30, %s4801_s15  ;;  %p4805_p1 = scmp.lt.u32.totalorder %s4801_s15, %s5908_s30 }
 0x107   :  { %p4807_p2 = pnand %p4805_p1, %p4802_p0 }
 0x109   :  { %4810 = shalt.err (!%p4807_p2)
}
 0x10a   :  { %s4811_s29 = scalar_lea.vmem %s329_s27, 32  ;;  %p4816_p4 = scmp.lt.s32.totalorder %s329_s27, %s329_s27 }
 0x10b   :  { %p4812_p3 = scmp.ne.s32.totalorder %s329_s27, %s4811_s29  ;;  %p4817_p5 = scmp.lt.s32.totalorder %s4811_s29, %s4811_s29 }
 0x10d   :  { %p4818_p6 = por %p4817_p5, %p4816_p4 }
 0x10f   :  { %p4819_p7 = pnand %p4818_p6, %p4812_p3 }
 0x111   :  { %4822 = shalt.err (!%p4819_p7)
}
 0x112   :  { %331 = dma.hbm_to_vmem [thread:$0]  %s5908_s30, 32, %s329_s27, [#allocation27]  }
 0x113   :  { %s4823_s6 = scalar_lea.hbm %s5923_s20, 32 }
 0x114   :  { %p4824_p8 = scmp.ne.s32.totalorder %s5923_s20, %s4823_s6  ;;  %p4827_p9 = scmp.lt.u32.totalorder %s4823_s6, %s5923_s20 }
 0x116   :  { %p4829_p10 = pnand %p4827_p9, %p4824_p8 }
 0x118   :  { %4832 = shalt.err (!%p4829_p10)
}
 0x119   :  { %s4833_s11 = scalar_lea.vmem %s351_s10, 32  ;;  %p4838_p12 = scmp.lt.s32.totalorder %s351_s10, %s351_s10 }
 0x11a   :  { %p4834_p11 = scmp.ne.s32.totalorder %s351_s10, %s4833_s11  ;;  %p4839_p13 = scmp.lt.s32.totalorder %s4833_s11, %s4833_s11 }
 0x11c   :  { %p4840_p0 = por %p4839_p13, %p4838_p12 }
 0x11e   :  { %p4841_p1 = pnand %p4840_p0, %p4834_p11 }
 0x120   :  { %4844 = shalt.err (!%p4841_p1)
}
 0x121   :  { %353 = dma.hbm_to_vmem [thread:$0]  %s5923_s20, 32, %s351_s10, [#allocation30]  }
 0x122   :  { %s5759_s16 = smov [#allocation32]   ;;  %s5760_s8 = smov [#allocation35]  }
 0x123   :  { %s372_s30 = sshll.u32 %s5759_s16, 4  ;;  %s394_s18 = sshll.u32 %s5760_s8, 4  ;;  %s373_s30 = int_to_ptr.vmem [resolvable:$true] %s372_s30  ;;  %s395_s18 = int_to_ptr.vmem [resolvable:$true] %s394_s18 }
 0x124   :  { %s4845_s9 = scalar_lea.hbm %s5938_s25, 16 }
 0x125   :  { %p4846_p2 = scmp.ne.s32.totalorder %s5938_s25, %s4845_s9  ;;  %p4849_p3 = scmp.lt.u32.totalorder %s4845_s9, %s5938_s25 }
 0x127   :  { %p4851_p4 = pnand %p4849_p3, %p4846_p2 }
 0x129   :  { %4854 = shalt.err (!%p4851_p4)
}
 0x12a   :  { %s4855_s0 = scalar_lea.vmem %s373_s30, 16  ;;  %s4859_s22 = scalar_lea.vmem %s373_s30, 32 }
 0x12b   :  { %p4856_p5 = scmp.ne.s32.totalorder %s373_s30, %s4855_s0  ;;  %p4860_p6 = scmp.lt.s32.totalorder %s373_s30, %s373_s30 }
 0x12c   :  { %p4861_p7 = scmp.lt.s32.totalorder %s4859_s22, %s4855_s0 }
 0x12e   :  { %p4862_p8 = por %p4861_p7, %p4860_p6 }
 0x130   :  { %p4863_p9 = pnand %p4862_p8, %p4856_p5 }
 0x132   :  { %4866 = shalt.err (!%p4863_p9)
}
 0x133   :  { %375 = dma.hbm_to_vmem [thread:$0]  %s5938_s25, 16, %s373_s30, [#allocation33]  }
 0x134   :  { %s4867_s20 = scalar_lea.hbm %s5948_s4, 32 }
 0x135   :  { %p4868_p10 = scmp.ne.s32.totalorder %s5948_s4, %s4867_s20  ;;  %p4871_p11 = scmp.lt.u32.totalorder %s4867_s20, %s5948_s4 }
 0x137   :  { %p4873_p12 = pnand %p4871_p11, %p4868_p10 }
 0x139   :  { %4876 = shalt.err (!%p4873_p12)
}
 0x13a   :  { %s4877_s17 = scalar_lea.vmem %s395_s18, 32  ;;  %p4882_p0 = scmp.lt.s32.totalorder %s395_s18, %s395_s18 }
 0x13b   :  { %p4878_p13 = scmp.ne.s32.totalorder %s395_s18, %s4877_s17  ;;  %p4883_p1 = scmp.lt.s32.totalorder %s4877_s17, %s4877_s17 }
 0x13d   :  { %p4884_p2 = por %p4883_p1, %p4882_p0 }
 0x13f   :  { %p4885_p3 = pnand %p4884_p2, %p4878_p13 }
 0x141   :  { %4888 = shalt.err (!%p4885_p3)
}
 0x142   :  { %397 = dma.hbm_to_vmem [thread:$0]  %s5948_s4, 32, %s395_s18, [#allocation36]  }
 0x143   :  { %s5761_s23 = smov [#allocation38]   ;;  %s5762_s19 = smov [#allocation41]  }
 0x144   :  { %s414_s25 = sshll.u32 %s5761_s23, 4  ;;  %s436_s26 = sshll.u32 %s5762_s19, 4  ;;  %s415_s25 = int_to_ptr.vmem [resolvable:$true] %s414_s25  ;;  %s437_s26 = int_to_ptr.vmem [resolvable:$true] %s436_s26 }
 0x145   :  { %s4889_s2 = scalar_lea.hbm %s5958_s14, 32 }
 0x146   :  { %p4890_p4 = scmp.ne.s32.totalorder %s5958_s14, %s4889_s2  ;;  %p4893_p5 = scmp.lt.u32.totalorder %s4889_s2, %s5958_s14 }
 0x148   :  { %p4895_p6 = pnand %p4893_p5, %p4890_p4 }
 0x14a   :  { %4898 = shalt.err (!%p4895_p6)
}
 0x14b   :  { %s4899_s27 = scalar_lea.vmem %s415_s25, 32  ;;  %p4904_p8 = scmp.lt.s32.totalorder %s415_s25, %s415_s25 }
 0x14c   :  { %p4900_p7 = scmp.ne.s32.totalorder %s415_s25, %s4899_s27  ;;  %p4905_p9 = scmp.lt.s32.totalorder %s4899_s27, %s4899_s27 }
 0x14e   :  { %p4906_p10 = por %p4905_p9, %p4904_p8 }
 0x150   :  { %p4907_p11 = pnand %p4906_p10, %p4900_p7 }
 0x152   :  { %4910 = shalt.err (!%p4907_p11)
}
 0x153   :  { %417 = dma.hbm_to_vmem [thread:$0]  %s5958_s14, 32, %s415_s25, [#allocation39]  }
 0x154   :  { %s4911_s4 = scalar_lea.hbm %s5973_s24, 32 }
 0x155   :  { %p4912_p12 = scmp.ne.s32.totalorder %s5973_s24, %s4911_s4  ;;  %p4915_p13 = scmp.lt.u32.totalorder %s4911_s4, %s5973_s24 }
 0x157   :  { %p4917_p0 = pnand %p4915_p13, %p4912_p12 }
 0x159   :  { %4920 = shalt.err (!%p4917_p0)
}
 0x15a   :  { %s4921_s7 = scalar_lea.vmem %s437_s26, 32  ;;  %p4926_p2 = scmp.lt.s32.totalorder %s437_s26, %s437_s26 }
 0x15b   :  { %p4922_p1 = scmp.ne.s32.totalorder %s437_s26, %s4921_s7  ;;  %p4927_p3 = scmp.lt.s32.totalorder %s4921_s7, %s4921_s7 }
 0x15d   :  { %p4928_p4 = por %p4927_p3, %p4926_p2 }
 0x15f   :  { %p4929_p5 = pnand %p4928_p4, %p4922_p1 }
 0x161   :  { %4932 = shalt.err (!%p4929_p5)
}
 0x162   :  { %439 = dma.hbm_to_vmem [thread:$0]  %s5973_s24, 32, %s437_s26, [#allocation42]  }
 0x163   :  { %s5763_s10 = smov [#allocation44]   ;;  %s5764_s15 = smov [#allocation47]  }
 0x164   :  { %s458_s14 = sshll.u32 %s5763_s10, 4  ;;  %s484_s29 = sshll.u32 %s5764_s15, 4  ;;  %s459_s14 = int_to_ptr.vmem [resolvable:$true] %s458_s14  ;;  %s485_s29 = int_to_ptr.vmem [resolvable:$true] %s484_s29 }
 0x165   :  { %s4933_s6 = scalar_lea.hbm %s5988_s3, 16 }
 0x166   :  { %p4934_p6 = scmp.ne.s32.totalorder %s5988_s3, %s4933_s6  ;;  %p4937_p7 = scmp.lt.u32.totalorder %s4933_s6, %s5988_s3 }
 0x168   :  { %p4939_p8 = pnand %p4937_p7, %p4934_p6 }
 0x16a   :  { %4942 = shalt.err (!%p4939_p8)
}
 0x16b   :  { %s4943_s11 = scalar_lea.vmem %s459_s14, 16  ;;  %s4947_s16 = scalar_lea.vmem %s459_s14, 32 }
 0x16c   :  { %p4944_p9 = scmp.ne.s32.totalorder %s459_s14, %s4943_s11  ;;  %p4948_p10 = scmp.lt.s32.totalorder %s459_s14, %s459_s14 }
 0x16d   :  { %p4949_p11 = scmp.lt.s32.totalorder %s4947_s16, %s4943_s11 }
 0x16f   :  { %p4950_p12 = por %p4949_p11, %p4948_p10 }
 0x171   :  { %p4951_p13 = pnand %p4950_p12, %p4944_p9 }
 0x173   :  { %4954 = shalt.err (!%p4951_p13)
}
 0x174   :  { %s6990_s24 = sld [smem:[#allocation121_spill]] }
 0x175   :  { %461 = dma.hbm_to_vmem [thread:$0]  %s5988_s3, 16, %s459_s14, [#allocation45]  }
 0x17a   :  { %s4955_s30 = scalar_lea.hbm %s6990_s24, 32 }
 0x17b   :  { %p4956_p0 = scmp.ne.s32.totalorder %s6990_s24, %s4955_s30  ;;  %p4959_p1 = scmp.lt.u32.totalorder %s4955_s30, %s6990_s24 }
 0x17d   :  { %p4961_p2 = pnand %p4959_p1, %p4956_p0 }
 0x17f   :  { %4964 = shalt.err (!%p4961_p2)
}
 0x180   :  { %s4965_s8 = scalar_lea.vmem %s485_s29, 32  ;;  %p4970_p4 = scmp.lt.s32.totalorder %s485_s29, %s485_s29 }
 0x181   :  { %p4966_p3 = scmp.ne.s32.totalorder %s485_s29, %s4965_s8  ;;  %p4971_p5 = scmp.lt.s32.totalorder %s4965_s8, %s4965_s8 }
 0x183   :  { %p4972_p6 = por %p4971_p5, %p4970_p4 }
 0x185   :  { %p4973_p7 = pnand %p4972_p6, %p4966_p3 }
 0x187   :  { %4976 = shalt.err (!%p4973_p7)
}
 0x188   :  { %s6991_s18 = sld [smem:[#allocation127_spill]]  ;;  %s5765_s9 = smov [#allocation50]  }
 0x189   :  { %487 = dma.hbm_to_vmem [thread:$0]  %s6990_s24, 32, %s485_s29, [#allocation48]  }
 0x18a   :  { %s512_s3 = sshll.u32 %s5765_s9, 4  ;;  %s5766_s0 = smov [#allocation53]   ;;  %s513_s3 = int_to_ptr.vmem [resolvable:$true] %s512_s3 }
 0x18b   :  { %s534_s22 = sshll.u32 %s5766_s0, 4  ;;  %s535_s22 = int_to_ptr.vmem [resolvable:$true] %s534_s22 }
 0x18e   :  { %s4977_s20 = scalar_lea.hbm %s6991_s18, 16 }
 0x18f   :  { %p4978_p8 = scmp.ne.s32.totalorder %s6991_s18, %s4977_s20  ;;  %p4981_p9 = scmp.lt.u32.totalorder %s4977_s20, %s6991_s18 }
 0x191   :  { %p4983_p10 = pnand %p4981_p9, %p4978_p8 }
 0x193   :  { %4986 = shalt.err (!%p4983_p10)
}
 0x194   :  { %s4987_s17 = scalar_lea.vmem %s513_s3, 16  ;;  %s4991_s23 = scalar_lea.vmem %s513_s3, 32 }
 0x195   :  { %p4988_p11 = scmp.ne.s32.totalorder %s513_s3, %s4987_s17  ;;  %p4992_p12 = scmp.lt.s32.totalorder %s513_s3, %s513_s3 }
 0x196   :  { %p4993_p13 = scmp.lt.s32.totalorder %s4991_s23, %s4987_s17 }
 0x198   :  { %p4994_p0 = por %p4993_p13, %p4992_p12 }
 0x19a   :  { %p4995_p1 = pnand %p4994_p0, %p4988_p11 }
 0x19c   :  { %4998 = shalt.err (!%p4995_p1)
}
 0x19d   :  { %s6992_s25 = sld [smem:[#allocation129_spill]] }
 0x19e   :  { %515 = dma.hbm_to_vmem [thread:$0]  %s6991_s18, 16, %s513_s3, [#allocation51]  }
 0x1a3   :  { %s4999_s19 = scalar_lea.hbm %s6992_s25, 32 }
 0x1a4   :  { %p5000_p2 = scmp.ne.s32.totalorder %s6992_s25, %s4999_s19  ;;  %p5003_p3 = scmp.lt.u32.totalorder %s4999_s19, %s6992_s25 }
 0x1a6   :  { %p5005_p4 = pnand %p5003_p3, %p5000_p2 }
 0x1a8   :  { %5008 = shalt.err (!%p5005_p4)
}
 0x1a9   :  { %s5009_s26 = scalar_lea.vmem %s535_s22, 32  ;;  %p5014_p6 = scmp.lt.s32.totalorder %s535_s22, %s535_s22 }
 0x1aa   :  { %p5010_p5 = scmp.ne.s32.totalorder %s535_s22, %s5009_s26  ;;  %p5015_p7 = scmp.lt.s32.totalorder %s5009_s26, %s5009_s26 }
 0x1ac   :  { %p5016_p8 = por %p5015_p7, %p5014_p6 }
 0x1ae   :  { %p5017_p9 = pnand %p5016_p8, %p5010_p5 }
 0x1b0   :  { %5020 = shalt.err (!%p5017_p9)
}
 0x1b1   :  { %s6993_s2 = sld [smem:[#allocation131_spill]]  ;;  %s5767_s27 = smov [#allocation56]  }
 0x1b2   :  { %537 = dma.hbm_to_vmem [thread:$0]  %s6992_s25, 32, %s535_s22, [#allocation54]  }
 0x1b3   :  { %s554_s4 = sshll.u32 %s5767_s27, 4  ;;  %s5768_s7 = smov [#allocation59]   ;;  %s555_s4 = int_to_ptr.vmem [resolvable:$true] %s554_s4 }
 0x1b4   :  { %s576_s10 = sshll.u32 %s5768_s7, 4  ;;  %s577_s10 = int_to_ptr.vmem [resolvable:$true] %s576_s10 }
 0x1b7   :  { %s5021_s14 = scalar_lea.hbm %s6993_s2, 32 }
 0x1b8   :  { %p5022_p10 = scmp.ne.s32.totalorder %s6993_s2, %s5021_s14  ;;  %p5025_p11 = scmp.lt.u32.totalorder %s5021_s14, %s6993_s2 }
 0x1ba   :  { %p5027_p12 = pnand %p5025_p11, %p5022_p10 }
 0x1bc   :  { %5030 = shalt.err (!%p5027_p12)
}
 0x1bd   :  { %s5031_s15 = scalar_lea.vmem %s555_s4, 32  ;;  %p5036_p0 = scmp.lt.s32.totalorder %s555_s4, %s555_s4 }
 0x1be   :  { %p5032_p13 = scmp.ne.s32.totalorder %s555_s4, %s5031_s15  ;;  %p5037_p1 = scmp.lt.s32.totalorder %s5031_s15, %s5031_s15 }
 0x1c0   :  { %p5038_p2 = por %p5037_p1, %p5036_p0 }
 0x1c2   :  { %p5039_p3 = pnand %p5038_p2, %p5032_p13 }
 0x1c4   :  { %5042 = shalt.err (!%p5039_p3)
}
 0x1c5   :  { %s6994_s29 = sld [smem:[#allocation133_spill]] }
 0x1c6   :  { %557 = dma.hbm_to_vmem [thread:$0]  %s6993_s2, 32, %s555_s4, [#allocation57]  }
 0x1cb   :  { %s5043_s6 = scalar_lea.hbm %s6994_s29, 16 }
 0x1cc   :  { %p5044_p4 = scmp.ne.s32.totalorder %s6994_s29, %s5043_s6  ;;  %p5047_p5 = scmp.lt.u32.totalorder %s5043_s6, %s6994_s29 }
 0x1ce   :  { %p5049_p6 = pnand %p5047_p5, %p5044_p4 }
 0x1d0   :  { %5052 = shalt.err (!%p5049_p6)
}
 0x1d1   :  { %s5053_s11 = scalar_lea.vmem %s577_s10, 16  ;;  %s5057_s16 = scalar_lea.vmem %s577_s10, 32 }
 0x1d2   :  { %p5054_p7 = scmp.ne.s32.totalorder %s577_s10, %s5053_s11  ;;  %p5058_p8 = scmp.lt.s32.totalorder %s577_s10, %s577_s10 }
 0x1d3   :  { %p5059_p9 = scmp.lt.s32.totalorder %s5057_s16, %s5053_s11 }
 0x1d5   :  { %p5060_p10 = por %p5059_p9, %p5058_p8 }
 0x1d7   :  { %p5061_p11 = pnand %p5060_p10, %p5054_p7 }
 0x1d9   :  { %5064 = shalt.err (!%p5061_p11)
}
 0x1da   :  { %s6995_s24 = sld [smem:[#allocation135_spill]]  ;;  %s5769_s30 = smov [#allocation62]  }
 0x1db   :  { %579 = dma.hbm_to_vmem [thread:$0]  %s6994_s29, 16, %s577_s10, [#allocation60]  }
 0x1dc   :  { %s596_s8 = sshll.u32 %s5769_s30, 4  ;;  %s5770_s18 = smov [#allocation65]   ;;  %s597_s8 = int_to_ptr.vmem [resolvable:$true] %s596_s8 }
 0x1dd   :  { %s620_s9 = sshll.u32 %s5770_s18, 4  ;;  %s621_s9 = int_to_ptr.vmem [resolvable:$true] %s620_s9 }
 0x1e0   :  { %s5065_s3 = scalar_lea.hbm %s6995_s24, 16 }
 0x1e1   :  { %p5066_p12 = scmp.ne.s32.totalorder %s6995_s24, %s5065_s3  ;;  %p5069_p13 = scmp.lt.u32.totalorder %s5065_s3, %s6995_s24 }
 0x1e3   :  { %p5071_p0 = pnand %p5069_p13, %p5066_p12 }
 0x1e5   :  { %5074 = shalt.err (!%p5071_p0)
}
 0x1e6   :  { %s5075_s0 = scalar_lea.vmem %s597_s8, 16  ;;  %s5079_s22 = scalar_lea.vmem %s597_s8, 32 }
 0x1e7   :  { %p5076_p1 = scmp.ne.s32.totalorder %s597_s8, %s5075_s0  ;;  %p5080_p2 = scmp.lt.s32.totalorder %s597_s8, %s597_s8 }
 0x1e8   :  { %p5081_p3 = scmp.lt.s32.totalorder %s5079_s22, %s5075_s0 }
 0x1ea   :  { %p5082_p4 = por %p5081_p3, %p5080_p2 }
 0x1ec   :  { %p5083_p5 = pnand %p5082_p4, %p5076_p1 }
 0x1ee   :  { %5086 = shalt.err (!%p5083_p5)
}
 0x1ef   :  { %s6996_s20 = sld [smem:[#allocation139_spill]] }
 0x1f0   :  { %599 = dma.hbm_to_vmem [thread:$0]  %s6995_s24, 16, %s597_s8, [#allocation63]  }
 0x1f5   :  { %s5087_s17 = scalar_lea.hbm %s6996_s20, 16 }
 0x1f6   :  { %p5088_p6 = scmp.ne.s32.totalorder %s6996_s20, %s5087_s17  ;;  %p5091_p7 = scmp.lt.u32.totalorder %s5087_s17, %s6996_s20 }
 0x1f8   :  { %p5093_p8 = pnand %p5091_p7, %p5088_p6 }
 0x1fa   :  { %5096 = shalt.err (!%p5093_p8)
}
 0x1fb   :  { %s5097_s23 = scalar_lea.vmem %s621_s9, 16  ;;  %s5101_s25 = scalar_lea.vmem %s621_s9, 32 }
 0x1fc   :  { %p5098_p9 = scmp.ne.s32.totalorder %s621_s9, %s5097_s23  ;;  %p5102_p10 = scmp.lt.s32.totalorder %s621_s9, %s621_s9 }
 0x1fd   :  { %p5103_p11 = scmp.lt.s32.totalorder %s5101_s25, %s5097_s23 }
 0x1ff   :  { %p5104_p12 = por %p5103_p11, %p5102_p10 }
 0x201   :  { %p5105_p13 = pnand %p5104_p12, %p5098_p9 }
 0x203   :  { %5108 = shalt.err (!%p5105_p13)
}
 0x204   :  { %s6997_s19 = sld [smem:[#allocation95_spill]]  ;;  %s5771_s26 = smov [#allocation2]  }
 0x205   :  { %623 = dma.hbm_to_vmem [thread:$0]  %s6996_s20, 16, %s621_s9, [#allocation66]  }
 0x206   :  { %s162_s2 = sshll.u32 %s5771_s26, 4  ;;  %s5772_s27 = smov [#allocation7]   ;;  %s163_s2 = int_to_ptr.vmem [resolvable:$true] %s162_s2 }
 0x207   :  { %s184_s4 = sshll.u32 %s5772_s27, 4  ;;  %s185_s4 = int_to_ptr.vmem [resolvable:$true] %s184_s4 }
 0x20a   :  { %s5109_s7 = scalar_lea.hbm %s6997_s19, 128 }
 0x20b   :  { %p5110_p0 = scmp.ne.s32.totalorder %s6997_s19, %s5109_s7  ;;  %p5113_p1 = scmp.lt.u32.totalorder %s5109_s7, %s6997_s19 }
 0x20d   :  { %p5115_p2 = pnand %p5113_p1, %p5110_p0 }
 0x20f   :  { %5118 = shalt.err (!%p5115_p2)
}
 0x210   :  { %s5119_s10 = scalar_lea.vmem %s163_s2, 128  ;;  %p5124_p4 = scmp.lt.s32.totalorder %s163_s2, %s163_s2 }
 0x211   :  { %p5120_p3 = scmp.ne.s32.totalorder %s163_s2, %s5119_s10  ;;  %p5125_p5 = scmp.lt.s32.totalorder %s5119_s10, %s5119_s10 }
 0x213   :  { %p5126_p6 = por %p5125_p5, %p5124_p4 }
 0x215   :  { %p5127_p7 = pnand %p5126_p6, %p5120_p3 }
 0x217   :  { %5130 = shalt.err (!%p5127_p7)
}
 0x218   :  { %s6998_s14 = sld [smem:[#allocation96_spill]] }
 0x219   :  { %165 = dma.hbm_to_vmem [thread:$0]  %s6997_s19, 128, %s163_s2, [#allocation3]  }
 0x21e   :  { %s5131_s15 = scalar_lea.hbm %s6998_s14, 16 }
 0x21f   :  { %p5132_p8 = scmp.ne.s32.totalorder %s6998_s14, %s5131_s15  ;;  %p5135_p9 = scmp.lt.u32.totalorder %s5131_s15, %s6998_s14 }
 0x221   :  { %p5137_p10 = pnand %p5135_p9, %p5132_p8 }
 0x223   :  { %5140 = shalt.err (!%p5137_p10)
}
 0x224   :  { %s5141_s29 = scalar_lea.vmem %s185_s4, 16  ;;  %s5145_s6 = scalar_lea.vmem %s185_s4, 32 }
 0x225   :  { %p5142_p11 = scmp.ne.s32.totalorder %s185_s4, %s5141_s29  ;;  %p5146_p12 = scmp.lt.s32.totalorder %s185_s4, %s185_s4 }
 0x226   :  { %p5147_p13 = scmp.lt.s32.totalorder %s5145_s6, %s5141_s29 }
 0x228   :  { %p5148_p0 = por %p5147_p13, %p5146_p12 }
 0x22a   :  { %p5149_p1 = pnand %p5148_p0, %p5142_p11 }
 0x22c   :  { %5152 = shalt.err (!%p5149_p1)
}
 0x22d   :  { %s6999_s11 = sld [smem:[#allocation97_spill]]  ;;  %s5773_s16 = smov [#allocation10]  }
 0x22e   :  { %187 = dma.hbm_to_vmem [thread:$0]  %s6998_s14, 16, %s185_s4, [#allocation6]  }
 0x22f   :  { %s204_s24 = sshll.u32 %s5773_s16, 4  ;;  %s5774_s30 = smov [#allocation13]   ;;  %s205_s24 = int_to_ptr.vmem [resolvable:$true] %s204_s24 }
 0x230   :  { %s225_s8 = sshll.u32 %s5774_s30, 4  ;;  %s226_s8 = int_to_ptr.vmem [resolvable:$true] %s225_s8 }
 0x233   :  { %s5153_s18 = scalar_lea.hbm %s6999_s11, 16 }
 0x234   :  { %p5154_p2 = scmp.ne.s32.totalorder %s6999_s11, %s5153_s18  ;;  %p5157_p3 = scmp.lt.u32.totalorder %s5153_s18, %s6999_s11 }
 0x236   :  { %p5159_p4 = pnand %p5157_p3, %p5154_p2 }
 0x238   :  { %5162 = shalt.err (!%p5159_p4)
}
 0x239   :  { %s5163_s9 = scalar_lea.vmem %s205_s24, 16  ;;  %s5167_s3 = scalar_lea.vmem %s205_s24, 32 }
 0x23a   :  { %p5164_p5 = scmp.ne.s32.totalorder %s205_s24, %s5163_s9  ;;  %p5168_p6 = scmp.lt.s32.totalorder %s205_s24, %s205_s24 }
 0x23b   :  { %p5169_p7 = scmp.lt.s32.totalorder %s5167_s3, %s5163_s9 }
 0x23d   :  { %p5170_p8 = por %p5169_p7, %p5168_p6 }
 0x23f   :  { %p5171_p9 = pnand %p5170_p8, %p5164_p5 }
 0x241   :  { %5174 = shalt.err (!%p5171_p9)
}
 0x242   :  { %s7000_s0 = sld [smem:[#allocation99_spill]] }
 0x243   :  { %207 = dma.hbm_to_vmem [thread:$0]  %s6999_s11, 16, %s205_s24, [#allocation9]  }
 0x248   :  { %s5175_s22 = scalar_lea.hbm %s7000_s0, 1024 }
 0x249   :  { %p5176_p10 = scmp.ne.s32.totalorder %s7000_s0, %s5175_s22  ;;  %p5179_p11 = scmp.lt.u32.totalorder %s5175_s22, %s7000_s0 }
 0x24b   :  { %p5181_p12 = pnand %p5179_p11, %p5176_p10 }
 0x24d   :  { %5184 = shalt.err (!%p5181_p12)
}
 0x24e   :  { %s5185_s20 = scalar_lea.vmem %s226_s8, 1024  ;;  %p5190_p0 = scmp.lt.s32.totalorder %s226_s8, %s226_s8 }
 0x24f   :  { %p5186_p13 = scmp.ne.s32.totalorder %s226_s8, %s5185_s20  ;;  %p5191_p1 = scmp.lt.s32.totalorder %s5185_s20, %s5185_s20 }
 0x251   :  { %p5192_p2 = por %p5191_p1, %p5190_p0 }
 0x253   :  { %p5193_p3 = pnand %p5192_p2, %p5186_p13 }
 0x255   :  { %5196 = shalt.err (!%p5193_p3)
}
 0x256   :  { %s7001_s17 = sld [smem:[#allocation100_spill]]  ;;  %s5775_s23 = smov [#allocation16]  }
 0x257   :  { %231 = dma.hbm_to_vmem [thread:$0]  %s7000_s0, 1024, %s226_s8, [#allocation12], %s5749_s28, %s5749_s28, %s5750_s1  }
 0x258   :  { %s248_s25 = sshll.u32 %s5775_s23, 4  ;;  %s5776_s19 = smov [#allocation19]   ;;  %s249_s25 = int_to_ptr.vmem [resolvable:$true] %s248_s25 }
 0x259   :  { %s274_s26 = sshll.u32 %s5776_s19, 4  ;;  %s275_s26 = int_to_ptr.vmem [resolvable:$true] %s274_s26 }
 0x25c   :  { %s5197_s2 = scalar_lea.hbm %s7001_s17, 16 }
 0x25d   :  { %p5198_p4 = scmp.ne.s32.totalorder %s7001_s17, %s5197_s2  ;;  %p5201_p5 = scmp.lt.u32.totalorder %s5197_s2, %s7001_s17 }
 0x25f   :  { %p5203_p6 = pnand %p5201_p5, %p5198_p4 }
 0x261   :  { %5206 = shalt.err (!%p5203_p6)
}
 0x262   :  { %s5207_s27 = scalar_lea.vmem %s249_s25, 16  ;;  %s5211_s4 = scalar_lea.vmem %s249_s25, 32 }
 0x263   :  { %p5208_p7 = scmp.ne.s32.totalorder %s249_s25, %s5207_s27  ;;  %p5212_p8 = scmp.lt.s32.totalorder %s249_s25, %s249_s25 }
 0x264   :  { %p5213_p9 = scmp.lt.s32.totalorder %s5211_s4, %s5207_s27 }
 0x266   :  { %p5214_p10 = por %p5213_p9, %p5212_p8 }
 0x268   :  { %p5215_p11 = pnand %p5214_p10, %p5208_p7 }
 0x26a   :  { %5218 = shalt.err (!%p5215_p11)
}
 0x26b   :  { %s7002_s7 = sld [smem:[#allocation104_spill]] }
 0x26c   :  { %251 = dma.hbm_to_vmem [thread:$0]  %s7001_s17, 16, %s249_s25, [#allocation15]  }
 0x271   :  { %s5219_s10 = scalar_lea.hbm %s7002_s7, 32 }
 0x272   :  { %p5220_p12 = scmp.ne.s32.totalorder %s7002_s7, %s5219_s10  ;;  %p5223_p13 = scmp.lt.u32.totalorder %s5219_s10, %s7002_s7 }
 0x274   :  { %p5225_p0 = pnand %p5223_p13, %p5220_p12 }
 0x276   :  { %5228 = shalt.err (!%p5225_p0)
}
 0x277   :  { %s5229_s14 = scalar_lea.vmem %s275_s26, 32  ;;  %p5234_p2 = scmp.lt.s32.totalorder %s275_s26, %s275_s26 }
 0x278   :  { %p5230_p1 = scmp.ne.s32.totalorder %s275_s26, %s5229_s14  ;;  %p5235_p3 = scmp.lt.s32.totalorder %s5229_s14, %s5229_s14 }
 0x27a   :  { %p5236_p4 = por %p5235_p3, %p5234_p2 }
 0x27c   :  { %p5237_p5 = pnand %p5236_p4, %p5230_p1 }
 0x27e   :  { %5240 = shalt.err (!%p5237_p5)
}
 0x27f   :  { %s7003_s15 = sld [smem:[#allocation106_spill]]  ;;  %s5777_s29 = smov [#allocation22]  }
 0x280   :  { %277 = dma.hbm_to_vmem [thread:$0]  %s7002_s7, 32, %s275_s26, [#allocation18]  }
 0x281   :  { %s295_s6 = sshll.u32 %s5777_s29, 4  ;;  %s296_s6 = int_to_ptr.vmem [resolvable:$true] %s295_s6 }
 0x285   :  { %s5241_s11 = scalar_lea.hbm %s7003_s15, 2048 }
 0x286   :  { %p5242_p6 = scmp.ne.s32.totalorder %s7003_s15, %s5241_s11  ;;  %p5245_p7 = scmp.lt.u32.totalorder %s5241_s11, %s7003_s15 }
 0x288   :  { %p5247_p8 = pnand %p5245_p7, %p5242_p6 }
 0x28a   :  { %5250 = shalt.err (!%p5247_p8)
}
 0x28b   :  { %s5251_s16 = scalar_lea.vmem %s296_s6, 2048  ;;  %p5256_p10 = scmp.lt.s32.totalorder %s296_s6, %s296_s6 }
 0x28c   :  { %p5252_p9 = scmp.ne.s32.totalorder %s296_s6, %s5251_s16  ;;  %p5257_p11 = scmp.lt.s32.totalorder %s5251_s16, %s5251_s16 }
 0x28e   :  { %p5258_p12 = por %p5257_p11, %p5256_p10 }
 0x290   :  { %p5259_p13 = pnand %p5258_p12, %p5252_p9 }
 0x292   :  { %5262 = shalt.err (!%p5259_p13)
}
 0x293   :  { %s5778_s24 = smov 256   ;;  %s7004_s30 = sld [smem:[#allocation107_spill]] }
 0x294   :  { %s5779_s8 = smov 16   ;;  %s5780_s18 = smov [#allocation25]  }
 0x295   :  { %301 = dma.hbm_to_vmem [thread:$0]  %s7003_s15, 2048, %s296_s6, [#allocation21], %s5778_s24, %s5778_s24, %s5779_s8  }
 0x296   :  { %s318_s9 = sshll.u32 %s5780_s18, 4  ;;  %s5781_s3 = smov [#allocation28]   ;;  %s319_s9 = int_to_ptr.vmem [resolvable:$true] %s318_s9 }
 0x297   :  { %s340_s0 = sshll.u32 %s5781_s3, 4  ;;  %s341_s0 = int_to_ptr.vmem [resolvable:$true] %s340_s0 }
 0x299   :  { %s5263_s22 = scalar_lea.hbm %s7004_s30, 32 }
 0x29a   :  { %p5264_p0 = scmp.ne.s32.totalorder %s7004_s30, %s5263_s22  ;;  %p5267_p1 = scmp.lt.u32.totalorder %s5263_s22, %s7004_s30 }
 0x29c   :  { %p5269_p2 = pnand %p5267_p1, %p5264_p0 }
 0x29e   :  { %5272 = shalt.err (!%p5269_p2)
}
 0x29f   :  { %s5273_s20 = scalar_lea.vmem %s319_s9, 32  ;;  %p5278_p4 = scmp.lt.s32.totalorder %s319_s9, %s319_s9 }
 0x2a0   :  { %p5274_p3 = scmp.ne.s32.totalorder %s319_s9, %s5273_s20  ;;  %p5279_p5 = scmp.lt.s32.totalorder %s5273_s20, %s5273_s20 }
 0x2a2   :  { %p5280_p6 = por %p5279_p5, %p5278_p4 }
 0x2a4   :  { %p5281_p7 = pnand %p5280_p6, %p5274_p3 }
 0x2a6   :  { %5284 = shalt.err (!%p5281_p7)
}
 0x2a7   :  { %s7005_s17 = sld [smem:[#allocation109_spill]] }
 0x2a8   :  { %321 = dma.hbm_to_vmem [thread:$0]  %s7004_s30, 32, %s319_s9, [#allocation24]  }
 0x2ad   :  { %s5285_s23 = scalar_lea.hbm %s7005_s17, 32 }
 0x2ae   :  { %p5286_p8 = scmp.ne.s32.totalorder %s7005_s17, %s5285_s23  ;;  %p5289_p9 = scmp.lt.u32.totalorder %s5285_s23, %s7005_s17 }
 0x2b0   :  { %p5291_p10 = pnand %p5289_p9, %p5286_p8 }
 0x2b2   :  { %5294 = shalt.err (!%p5291_p10)
}
 0x2b3   :  { %s5295_s25 = scalar_lea.vmem %s341_s0, 32  ;;  %p5300_p12 = scmp.lt.s32.totalorder %s341_s0, %s341_s0 }
 0x2b4   :  { %p5296_p11 = scmp.ne.s32.totalorder %s341_s0, %s5295_s25  ;;  %p5301_p13 = scmp.lt.s32.totalorder %s5295_s25, %s5295_s25 }
 0x2b6   :  { %p5302_p0 = por %p5301_p13, %p5300_p12 }
 0x2b8   :  { %p5303_p1 = pnand %p5302_p0, %p5296_p11 }
 0x2ba   :  { %5306 = shalt.err (!%p5303_p1)
}
 0x2bb   :  { %s7006_s19 = sld [smem:[#allocation110_spill]]  ;;  %s5782_s26 = smov [#allocation31]  }
 0x2bc   :  { %343 = dma.hbm_to_vmem [thread:$0]  %s7005_s17, 32, %s341_s0, [#allocation27]  }
 0x2bd   :  { %s360_s2 = sshll.u32 %s5782_s26, 4  ;;  %s5783_s27 = smov [#allocation34]   ;;  %s361_s2 = int_to_ptr.vmem [resolvable:$true] %s360_s2 }
 0x2be   :  { %s381_s4 = sshll.u32 %s5783_s27, 4  ;;  %s6254_s4 = int_to_ptr.vmem [resolvable:$true] %s381_s4 }
 0x2c1   :  { %s5307_s7 = scalar_lea.hbm %s7006_s19, 32 }
 0x2c2   :  { %p5308_p2 = scmp.ne.s32.totalorder %s7006_s19, %s5307_s7  ;;  %p5311_p3 = scmp.lt.u32.totalorder %s5307_s7, %s7006_s19 }
 0x2c4   :  { %p5313_p4 = pnand %p5311_p3, %p5308_p2 }
 0x2c6   :  { %5316 = shalt.err (!%p5313_p4)
}
 0x2c7   :  { %s5317_s10 = scalar_lea.vmem %s361_s2, 32  ;;  %p5322_p6 = scmp.lt.s32.totalorder %s361_s2, %s361_s2 }
 0x2c8   :  { %p5318_p5 = scmp.ne.s32.totalorder %s361_s2, %s5317_s10  ;;  %p5323_p7 = scmp.lt.s32.totalorder %s5317_s10, %s5317_s10 }
 0x2ca   :  { %p5324_p8 = por %p5323_p7, %p5322_p6 }
 0x2cc   :  { %p5325_p9 = pnand %p5324_p8, %p5318_p5 }
 0x2ce   :  { %5328 = shalt.err (!%p5325_p9)
}
 0x2cf   :  { %s7007_s14 = sld [smem:[#allocation112_spill]] }
 0x2d0   :  { %363 = dma.hbm_to_vmem [thread:$0]  %s7006_s19, 32, %s361_s2, [#allocation30]  }
 0x2d5   :  { %s5329_s15 = scalar_lea.hbm %s7007_s14, 1024 }
 0x2d6   :  { %p5330_p10 = scmp.ne.s32.totalorder %s7007_s14, %s5329_s15  ;;  %p5333_p11 = scmp.lt.u32.totalorder %s5329_s15, %s7007_s14 }
 0x2d8   :  { %p5335_p12 = pnand %p5333_p11, %p5330_p10 }
 0x2da   :  { %5338 = shalt.err (!%p5335_p12)
}
 0x2db   :  { %s5339_s29 = scalar_lea.vmem %s6254_s4, 1024  ;;  %p5344_p0 = scmp.lt.s32.totalorder %s6254_s4, %s6254_s4 }
 0x2dc   :  { %p5340_p13 = scmp.ne.s32.totalorder %s6254_s4, %s5339_s29  ;;  %p5345_p1 = scmp.lt.s32.totalorder %s5339_s29, %s5339_s29 }
 0x2de   :  { %p5346_p2 = por %p5345_p1, %p5344_p0 }
 0x2e0   :  { %p5347_p3 = pnand %p5346_p2, %p5340_p13 }
 0x2e2   :  { %5350 = shalt.err (!%p5347_p3)
}
 0x2e3   :  { %s7008_s6 = sld [smem:[#allocation113_spill]]  ;;  %s5784_s11 = smov [#allocation37]  }
 0x2e4   :  { %387 = dma.hbm_to_vmem [thread:$0]  %s7007_s14, 1024, %s6254_s4, [#allocation33], %s5778_s24, %s5778_s24, %s5779_s8  }
 0x2e5   :  { %s404_s16 = sshll.u32 %s5784_s11, 4  ;;  %s5785_s30 = smov [#allocation40]   ;;  %s405_s16 = int_to_ptr.vmem [resolvable:$true] %s404_s16 }
 0x2e6   :  { %s426_s18 = sshll.u32 %s5785_s30, 4  ;;  %s427_s18 = int_to_ptr.vmem [resolvable:$true] %s426_s18 }
 0x2e9   :  { %s5351_s9 = scalar_lea.hbm %s7008_s6, 32 }
 0x2ea   :  { %p5352_p4 = scmp.ne.s32.totalorder %s7008_s6, %s5351_s9  ;;  %p5355_p5 = scmp.lt.u32.totalorder %s5351_s9, %s7008_s6 }
 0x2ec   :  { %p5357_p6 = pnand %p5355_p5, %p5352_p4 }
 0x2ee   :  { %5360 = shalt.err (!%p5357_p6)
}
 0x2ef   :  { %s5361_s3 = scalar_lea.vmem %s405_s16, 32  ;;  %p5366_p8 = scmp.lt.s32.totalorder %s405_s16, %s405_s16 }
 0x2f0   :  { %p5362_p7 = scmp.ne.s32.totalorder %s405_s16, %s5361_s3  ;;  %p5367_p9 = scmp.lt.s32.totalorder %s5361_s3, %s5361_s3 }
 0x2f2   :  { %p5368_p10 = por %p5367_p9, %p5366_p8 }
 0x2f4   :  { %p5369_p11 = pnand %p5368_p10, %p5362_p7 }
 0x2f6   :  { %5372 = shalt.err (!%p5369_p11)
}
 0x2f7   :  { %s7009_s0 = sld [smem:[#allocation115_spill]] }
 0x2f8   :  { %407 = dma.hbm_to_vmem [thread:$0]  %s7008_s6, 32, %s405_s16, [#allocation36]  }
 0x2fd   :  { %s5373_s22 = scalar_lea.hbm %s7009_s0, 32 }
 0x2fe   :  { %p5374_p12 = scmp.ne.s32.totalorder %s7009_s0, %s5373_s22  ;;  %p5377_p13 = scmp.lt.u32.totalorder %s5373_s22, %s7009_s0 }
 0x300   :  { %p5379_p0 = pnand %p5377_p13, %p5374_p12 }
 0x302   :  { %5382 = shalt.err (!%p5379_p0)
}
 0x303   :  { %s5383_s20 = scalar_lea.vmem %s427_s18, 32  ;;  %p5388_p2 = scmp.lt.s32.totalorder %s427_s18, %s427_s18 }
 0x304   :  { %p5384_p1 = scmp.ne.s32.totalorder %s427_s18, %s5383_s20  ;;  %p5389_p3 = scmp.lt.s32.totalorder %s5383_s20, %s5383_s20 }
 0x306   :  { %p5390_p4 = por %p5389_p3, %p5388_p2 }
 0x308   :  { %p5391_p5 = pnand %p5390_p4, %p5384_p1 }
 0x30a   :  { %5394 = shalt.err (!%p5391_p5)
}
 0x30b   :  { %s7010_s17 = sld [smem:[#allocation116_spill]]  ;;  %s5786_s23 = smov [#allocation43]  }
 0x30c   :  { %429 = dma.hbm_to_vmem [thread:$0]  %s7009_s0, 32, %s427_s18, [#allocation39]  }
 0x30d   :  { %s446_s25 = sshll.u32 %s5786_s23, 4  ;;  %s5787_s19 = smov [#allocation46]   ;;  %s447_s25 = int_to_ptr.vmem [resolvable:$true] %s446_s25 }
 0x30e   :  { %s467_s26 = sshll.u32 %s5787_s19, 4  ;;  %s6280_s26 = int_to_ptr.vmem [resolvable:$true] %s467_s26 }
 0x311   :  { %s5395_s2 = scalar_lea.hbm %s7010_s17, 32 }
 0x312   :  { %p5396_p6 = scmp.ne.s32.totalorder %s7010_s17, %s5395_s2  ;;  %p5399_p7 = scmp.lt.u32.totalorder %s5395_s2, %s7010_s17 }
 0x314   :  { %p5401_p8 = pnand %p5399_p7, %p5396_p6 }
 0x316   :  { %5404 = shalt.err (!%p5401_p8)
}
 0x317   :  { %s5405_s27 = scalar_lea.vmem %s447_s25, 32  ;;  %p5410_p10 = scmp.lt.s32.totalorder %s447_s25, %s447_s25 }
 0x318   :  { %p5406_p9 = scmp.ne.s32.totalorder %s447_s25, %s5405_s27  ;;  %p5411_p11 = scmp.lt.s32.totalorder %s5405_s27, %s5405_s27 }
 0x31a   :  { %p5412_p12 = por %p5411_p11, %p5410_p10 }
 0x31c   :  { %p5413_p13 = pnand %p5412_p12, %p5406_p9 }
 0x31e   :  { %5416 = shalt.err (!%p5413_p13)
}
 0x31f   :  { %s7011_s4 = sld [smem:[#allocation118_spill]] }
 0x320   :  { %449 = dma.hbm_to_vmem [thread:$0]  %s7010_s17, 32, %s447_s25, [#allocation42]  }
 0x325   :  { %s5417_s7 = scalar_lea.hbm %s7011_s4, 1024 }
 0x326   :  { %p5418_p0 = scmp.ne.s32.totalorder %s7011_s4, %s5417_s7  ;;  %p5421_p1 = scmp.lt.u32.totalorder %s5417_s7, %s7011_s4 }
 0x328   :  { %p5423_p2 = pnand %p5421_p1, %p5418_p0 }
 0x32a   :  { %5426 = shalt.err (!%p5423_p2)
}
 0x32b   :  { %s5427_s10 = scalar_lea.vmem %s6280_s26, 1024  ;;  %p5432_p4 = scmp.lt.s32.totalorder %s6280_s26, %s6280_s26 }
 0x32c   :  { %p5428_p3 = scmp.ne.s32.totalorder %s6280_s26, %s5427_s10  ;;  %p5433_p5 = scmp.lt.s32.totalorder %s5427_s10, %s5427_s10 }
 0x32e   :  { %p5434_p6 = por %p5433_p5, %p5432_p4 }
 0x330   :  { %p5435_p7 = pnand %p5434_p6, %p5428_p3 }
 0x332   :  { %5438 = shalt.err (!%p5435_p7)
}
 0x333   :  { %s7012_s14 = sld [smem:[#allocation125_spill]]  ;;  %s5788_s15 = smov [#allocation49]  }
 0x334   :  { %473 = dma.hbm_to_vmem [thread:$0]  %s7011_s4, 1024, %s6280_s26, [#allocation45], %s5778_s24, %s5778_s24, %s5779_s8  }
 0x335   :  { %s500_s29 = sshll.u32 %s5788_s15, 4  ;;  %s5789_s6 = smov [#allocation52]   ;;  %s501_s29 = int_to_ptr.vmem [resolvable:$true] %s500_s29 }
 0x336   :  { %s521_s11 = sshll.u32 %s5789_s6, 4  ;;  %s6298_s11 = int_to_ptr.vmem [resolvable:$true] %s521_s11 }
 0x339   :  { %s5439_s16 = scalar_lea.hbm %s7012_s14, 32 }
 0x33a   :  { %p5440_p8 = scmp.ne.s32.totalorder %s7012_s14, %s5439_s16  ;;  %p5443_p9 = scmp.lt.u32.totalorder %s5439_s16, %s7012_s14 }
 0x33c   :  { %p5445_p10 = pnand %p5443_p9, %p5440_p8 }
 0x33e   :  { %5448 = shalt.err (!%p5445_p10)
}
 0x33f   :  { %s5449_s30 = scalar_lea.vmem %s501_s29, 32  ;;  %p5454_p12 = scmp.lt.s32.totalorder %s501_s29, %s501_s29 }
 0x340   :  { %p5450_p11 = scmp.ne.s32.totalorder %s501_s29, %s5449_s30  ;;  %p5455_p13 = scmp.lt.s32.totalorder %s5449_s30, %s5449_s30 }
 0x342   :  { %p5456_p0 = por %p5455_p13, %p5454_p12 }
 0x344   :  { %p5457_p1 = pnand %p5456_p0, %p5450_p11 }
 0x346   :  { %5460 = shalt.err (!%p5457_p1)
}
 0x347   :  { %s7013_s18 = sld [smem:[#allocation128_spill]] }
 0x348   :  { %503 = dma.hbm_to_vmem [thread:$0]  %s7012_s14, 32, %s501_s29, [#allocation48]  }
 0x34d   :  { %s5461_s9 = scalar_lea.hbm %s7013_s18, 2048 }
 0x34e   :  { %p5462_p2 = scmp.ne.s32.totalorder %s7013_s18, %s5461_s9  ;;  %p5465_p3 = scmp.lt.u32.totalorder %s5461_s9, %s7013_s18 }
 0x350   :  { %p5467_p4 = pnand %p5465_p3, %p5462_p2 }
 0x352   :  { %5470 = shalt.err (!%p5467_p4)
}
 0x353   :  { %s5471_s3 = scalar_lea.vmem %s6298_s11, 2048  ;;  %p5476_p6 = scmp.lt.s32.totalorder %s6298_s11, %s6298_s11 }
 0x354   :  { %p5472_p5 = scmp.ne.s32.totalorder %s6298_s11, %s5471_s3  ;;  %p5477_p7 = scmp.lt.s32.totalorder %s5471_s3, %s5471_s3 }
 0x356   :  { %p5478_p8 = por %p5477_p7, %p5476_p6 }
 0x358   :  { %p5479_p9 = pnand %p5478_p8, %p5472_p5 }
 0x35a   :  { %5482 = shalt.err (!%p5479_p9)
}
 0x35b   :  { %s7014_s0 = sld [smem:[#allocation130_spill]]  ;;  %s5790_s22 = smov [#allocation55]  }
 0x35c   :  { %527 = dma.hbm_to_vmem [thread:$0]  %s7013_s18, 2048, %s6298_s11, [#allocation51], %s5778_s24, %s5778_s24, %s5779_s8  }
 0x35d   :  { %s544_s20 = sshll.u32 %s5790_s22, 4  ;;  %s5791_s17 = smov [#allocation58]   ;;  %s545_s20 = int_to_ptr.vmem [resolvable:$true] %s544_s20 }
 0x35e   :  { %s563_s23 = sshll.u32 %s5791_s17, 4  ;;  %s6316_s23 = int_to_ptr.vmem [resolvable:$true] %s563_s23 }
 0x361   :  { %s5483_s25 = scalar_lea.hbm %s7014_s0, 32 }
 0x362   :  { %p5484_p10 = scmp.ne.s32.totalorder %s7014_s0, %s5483_s25  ;;  %p5487_p11 = scmp.lt.u32.totalorder %s5483_s25, %s7014_s0 }
 0x364   :  { %p5489_p12 = pnand %p5487_p11, %p5484_p10 }
 0x366   :  { %5492 = shalt.err (!%p5489_p12)
}
 0x367   :  { %s5493_s19 = scalar_lea.vmem %s545_s20, 32  ;;  %p5498_p0 = scmp.lt.s32.totalorder %s545_s20, %s545_s20 }
 0x368   :  { %p5494_p13 = scmp.ne.s32.totalorder %s545_s20, %s5493_s19  ;;  %p5499_p1 = scmp.lt.s32.totalorder %s5493_s19, %s5493_s19 }
 0x36a   :  { %p5500_p2 = por %p5499_p1, %p5498_p0 }
 0x36c   :  { %p5501_p3 = pnand %p5500_p2, %p5494_p13 }
 0x36e   :  { %5504 = shalt.err (!%p5501_p3)
}
 0x36f   :  { %s7015_s24 = sld [smem:[#allocation132_spill]] }
 0x370   :  { %547 = dma.hbm_to_vmem [thread:$0]  %s7014_s0, 32, %s545_s20, [#allocation54]  }
 0x375   :  { %s5505_s8 = scalar_lea.hbm %s7015_s24, 4096 }
 0x376   :  { %p5506_p4 = scmp.ne.s32.totalorder %s7015_s24, %s5505_s8  ;;  %p5509_p5 = scmp.lt.u32.totalorder %s5505_s8, %s7015_s24 }
 0x378   :  { %p5511_p6 = pnand %p5509_p5, %p5506_p4 }
 0x37a   :  { %5514 = shalt.err (!%p5511_p6)
}
 0x37b   :  { %s5515_s26 = scalar_lea.vmem %s6316_s23, 4096  ;;  %p5520_p8 = scmp.lt.s32.totalorder %s6316_s23, %s6316_s23 }
 0x37c   :  { %p5516_p7 = scmp.ne.s32.totalorder %s6316_s23, %s5515_s26  ;;  %p5521_p9 = scmp.lt.s32.totalorder %s5515_s26, %s5515_s26 }
 0x37e   :  { %p5522_p10 = por %p5521_p9, %p5520_p8 }
 0x380   :  { %p5523_p11 = pnand %p5522_p10, %p5516_p7 }
 0x382   :  { %5526 = shalt.err (!%p5523_p11)
}
 0x383   :  { %s7016_s2 = sld [smem:[#allocation134_spill]]  ;;  %s5792_s27 = smov [#allocation61]  }
 0x384   :  { %569 = dma.hbm_to_vmem [thread:$0]  %s7015_s24, 4096, %s6316_s23, [#allocation57], %s5749_s28, %s5749_s28, %s5750_s1  }
 0x385   :  { %s586_s4 = sshll.u32 %s5792_s27, 4  ;;  %s5793_s7 = smov [#allocation64]   ;;  %s587_s4 = int_to_ptr.vmem [resolvable:$true] %s586_s4 }
 0x386   :  { %s608_s10 = sshll.u32 %s5793_s7, 4  ;;  %s609_s10 = int_to_ptr.vmem [resolvable:$true] %s608_s10 }
 0x389   :  { %s5527_s14 = scalar_lea.hbm %s7016_s2, 16 }
 0x38a   :  { %p5528_p12 = scmp.ne.s32.totalorder %s7016_s2, %s5527_s14  ;;  %p5531_p13 = scmp.lt.u32.totalorder %s5527_s14, %s7016_s2 }
 0x38c   :  { %p5533_p0 = pnand %p5531_p13, %p5528_p12 }
 0x38e   :  { %5536 = shalt.err (!%p5533_p0)
}
 0x38f   :  { %s5537_s15 = scalar_lea.vmem %s587_s4, 16  ;;  %s5541_s29 = scalar_lea.vmem %s587_s4, 32 }
 0x390   :  { %p5538_p1 = scmp.ne.s32.totalorder %s587_s4, %s5537_s15  ;;  %p5542_p2 = scmp.lt.s32.totalorder %s587_s4, %s587_s4 }
 0x391   :  { %p5543_p3 = scmp.lt.s32.totalorder %s5541_s29, %s5537_s15 }
 0x393   :  { %p5544_p4 = por %p5543_p3, %p5542_p2 }
 0x395   :  { %p5545_p5 = pnand %p5544_p4, %p5538_p1 }
 0x397   :  { %5548 = shalt.err (!%p5545_p5)
}
 0x398   :  { %s7017_s6 = sld [smem:[#allocation137_spill]] }
 0x399   :  { %589 = dma.hbm_to_vmem [thread:$0]  %s7016_s2, 16, %s587_s4, [#allocation60]  }
 0x39e   :  { %s5549_s11 = scalar_lea.hbm %s7017_s6, 16 }
 0x39f   :  { %p5550_p6 = scmp.ne.s32.totalorder %s7017_s6, %s5549_s11  ;;  %p5553_p7 = scmp.lt.u32.totalorder %s5549_s11, %s7017_s6 }
 0x3a1   :  { %p5555_p8 = pnand %p5553_p7, %p5550_p6 }
 0x3a3   :  { %5558 = shalt.err (!%p5555_p8)
}
 0x3a4   :  { %s5559_s16 = scalar_lea.vmem %s609_s10, 16  ;;  %s5563_s30 = scalar_lea.vmem %s609_s10, 32 }
 0x3a5   :  { %p5560_p9 = scmp.ne.s32.totalorder %s609_s10, %s5559_s16  ;;  %p5564_p10 = scmp.lt.s32.totalorder %s609_s10, %s609_s10 }
 0x3a6   :  { %p5565_p11 = scmp.lt.s32.totalorder %s5563_s30, %s5559_s16 }
 0x3a8   :  { %p5566_p12 = por %p5565_p11, %p5564_p10 }
 0x3aa   :  { %p5567_p13 = pnand %p5566_p12, %p5560_p9 }
 0x3ac   :  { %5570 = shalt.err (!%p5567_p13)
}
 0x3ad   :  { %s7018_s18 = sld [smem:[#allocation140_spill]]  ;;  %s5794_s9 = smov [#allocation67]  }
 0x3ae   :  { %611 = dma.hbm_to_vmem [thread:$0]  %s7017_s6, 16, %s609_s10, [#allocation63]  }
 0x3af   :  { %s630_s3 = sshll.u32 %s5794_s9, 4  ;;  %s5795_s0 = smov [#allocation68]   ;;  %s631_s3 = int_to_ptr.vmem [resolvable:$true] %s630_s3 }
 0x3b0   :  { %s641_s22 = sshll.u32 %s5795_s0, 4  ;;  %s6342_s22 = int_to_ptr.vmem [resolvable:$true] %s641_s22 }
 0x3b3   :  { %s5571_s20 = scalar_lea.hbm %s7018_s18, 16 }
 0x3b4   :  { %p5572_p0 = scmp.ne.s32.totalorder %s7018_s18, %s5571_s20  ;;  %p5575_p1 = scmp.lt.u32.totalorder %s5571_s20, %s7018_s18 }
 0x3b6   :  { %p5577_p2 = pnand %p5575_p1, %p5572_p0 }
 0x3b8   :  { %5580 = shalt.err (!%p5577_p2)
}
 0x3b9   :  { %s5581_s17 = scalar_lea.vmem %s631_s3, 16  ;;  %s5585_s23 = scalar_lea.vmem %s631_s3, 32 }
 0x3ba   :  { %p5582_p3 = scmp.ne.s32.totalorder %s631_s3, %s5581_s17  ;;  %p5586_p4 = scmp.lt.s32.totalorder %s631_s3, %s631_s3 }
 0x3bb   :  { %p5587_p5 = scmp.lt.s32.totalorder %s5585_s23, %s5581_s17 }
 0x3bd   :  { %p5588_p6 = por %p5587_p5, %p5586_p4 }
 0x3bf   :  { %p5589_p7 = pnand %p5588_p6, %p5582_p3 }
 0x3c1   :  { %5592 = shalt.err (!%p5589_p7)
}
 0x3c2   :  { %633 = dma.hbm_to_vmem [thread:$0]  %s7018_s18, 16, %s631_s3, [#allocation66]  }
 0x3c3   :  { %s5593_s25 = scalar_lea.hbm %s6113_s13, 2048 }
 0x3c4   :  { %p5594_p8 = scmp.ne.s32.totalorder %s6113_s13, %s5593_s25  ;;  %p5597_p9 = scmp.lt.u32.totalorder %s5593_s25, %s6113_s13 }
 0x3c6   :  { %p5599_p10 = pnand %p5597_p9, %p5594_p8 }
 0x3c8   :  { %5602 = shalt.err (!%p5599_p10)
}
 0x3c9   :  { %s5603_s19 = scalar_lea.vmem %s6342_s22, 2048  ;;  %p5608_p12 = scmp.lt.s32.totalorder %s6342_s22, %s6342_s22 }
 0x3ca   :  { %p5604_p11 = scmp.ne.s32.totalorder %s6342_s22, %s5603_s19  ;;  %p5609_p13 = scmp.lt.s32.totalorder %s5603_s19, %s5603_s19 }
 0x3cc   :  { %p5610_p0 = por %p5609_p13, %p5608_p12 }
 0x3ce   :  { %p5611_p1 = pnand %p5610_p0, %p5604_p11 }
 0x3d0   :  { %5614 = shalt.err (!%p5611_p1)
}
 0x3d1   :  { %647 = dma.hbm_to_vmem [thread:$0]  %s6113_s13, 2048, %s6342_s22, [#allocation69], %s5749_s28, %s5749_s28, %s5750_s1  }
 0x3d2   :  { %5637 = dma.done.wait [#allocation3], 128  }
 0x3d3   :  { %5638 = vsyncadd [#allocation3], 4294967168 }
 0x3d4   :  { %5639 = dma.done.wait [#allocation6], 2064  }
 0x3d5   :  { %5640 = vsyncadd [#allocation6], 4294965232 }
 0x3d6   :  { %5641 = dma.done.wait [#allocation9], 32  }
 0x3d7   :  { %5642 = vsyncadd [#allocation9], 4294967264 }
 0x3d8   :  { %5643 = dma.done.wait [#allocation12], 1040  }
 0x3d9   :  { %5644 = vsyncadd [#allocation12], 4294966256 }
 0x3da   :  { %5645 = dma.done.wait [#allocation15], 32  }
 0x3db   :  { %5646 = vsyncadd [#allocation15], 4294967264 }
 0x3dc   :  { %5647 = dma.done.wait [#allocation18], 48  }
 0x3dd   :  { %5648 = vsyncadd [#allocation18], 4294967248 }
 0x3de   :  { %5649 = dma.done.wait [#allocation21], 2064  }
 0x3df   :  { %5650 = vsyncadd [#allocation21], 4294965232 }
 0x3e0   :  { %5651 = dma.done.wait [#allocation24], 64  }
 0x3e1   :  { %5652 = vsyncadd [#allocation24], 4294967232 }
 0x3e2   :  { %5653 = dma.done.wait [#allocation27], 64  }
 0x3e3   :  { %5654 = vsyncadd [#allocation27], 4294967232 }
 0x3e4   :  { %5655 = dma.done.wait [#allocation30], 64  }
 0x3e5   :  { %5656 = vsyncadd [#allocation30], 4294967232 }
 0x3e6   :  { %5657 = dma.done.wait [#allocation33], 1040  }
 0x3e7   :  { %5658 = vsyncadd [#allocation33], 4294966256 }
 0x3e8   :  { %5659 = dma.done.wait [#allocation36], 64  }
 0x3e9   :  { %5660 = vsyncadd [#allocation36], 4294967232 }
 0x3ea   :  { %5661 = dma.done.wait [#allocation39], 64  }
 0x3eb   :  { %5662 = vsyncadd [#allocation39], 4294967232 }
 0x3ec   :  { %5663 = dma.done.wait [#allocation42], 64  }
 0x3ed   :  { %5664 = vsyncadd [#allocation42], 4294967232 }
 0x3ee   :  { %5665 = dma.done.wait [#allocation45], 1040  }
 0x3ef   :  { %5666 = vsyncadd [#allocation45], 4294966256 }
 0x3f0   :  { %5667 = dma.done.wait [#allocation48], 64  }
 0x3f1   :  { %5668 = vsyncadd [#allocation48], 4294967232 }
 0x3f2   :  { %5669 = dma.done.wait [#allocation51], 2064  }
 0x3f3   :  { %5670 = vsyncadd [#allocation51], 4294965232 }
 0x3f4   :  { %5671 = dma.done.wait [#allocation54], 64  }
 0x3f5   :  { %5672 = vsyncadd [#allocation54], 4294967232 }
 0x3f6   :  { %5673 = dma.done.wait [#allocation57], 4128  }
 0x3f7   :  { %5674 = vsyncadd [#allocation57], 4294963168 }
 0x3f8   :  { %5675 = dma.done.wait [#allocation60], 32  }
 0x3f9   :  { %5676 = vsyncadd [#allocation60], 4294967264 }
 0x3fa   :  { %5677 = dma.done.wait [#allocation63], 32  }
 0x3fb   :  { %5678 = vsyncadd [#allocation63], 4294967264 }
 0x3fc   :  { %5679 = dma.done.wait [#allocation66], 32  }
 0x3fd   :  { %5680 = vsyncadd [#allocation66], 4294967264 }
 0x3fe   :  { %5681 = dma.done.wait [#allocation69], 2048  }
 0x3ff   :  { %5682 = vsyncadd [#allocation69], 4294965248  ;;  %v5796_v0 = vmov 0.0|0.0   ;;  %vm5797_vm0 = vmmov 0   ;;  %v5798_v1 = vmov 0.0   ;;  %v783_v2 = vld [vmem:[#allocation5] sm:$0xff] }
 0x400   :  { %3928 = vmatprep.subr.bf16.mxu0 %v5796_v0  ;;  %3782 = vmatprep.mubr.msk.f32.mxu0 %vm5797_vm0, %v5798_v1  ;;  %v784_v3 = vld [vmem:[#allocation5 + $0x8] sm:$0xff]  ;;  %v785_v4 = vld [vmem:[#allocation5 + $0x10] sm:$0xff]  ;;  %v786_v6 = vld [vmem:[#allocation5 + $0x18] sm:$0xff]  ;;  %s7019_s13 = sld [smem:[#allocation98_spill]]  ;;  %s7020_s28 = sld [smem:[#allocation101_spill]]  ;;  %vm1019_vm1 = vcmask 523264  }
 0x401   :  { %3952 = vmatprep.subr.bf16.mxu1 %v5796_v0  ;;  %3817 = vmatprep.mubr.msk.f32.mxu1 %vm5797_vm0, %v5798_v1  ;;  %v3929_v5 = vpack.c.bf16 %v784_v3, %v783_v2  ;;  %v3932_v7 = vpack.c.bf16 %v786_v6, %v785_v4  ;;  %v787_v8 = vld [vmem:[#allocation5 + $0x20] sm:$0xff]  ;;  %v788_v9 = vld [vmem:[#allocation5 + $0x28] sm:$0xff]  ;;  %v789_v11 = vld [vmem:[#allocation5 + $0x30] sm:$0xff]  ;;  %s7021_s1 = sld [smem:[#allocation102_spill]]  ;;  %s7022_s24 = sld [smem:[#allocation105_spill]]  ;;  %vm1875_vm2 = vcmask 261120  }
 0x402   :  { %v3935_v10 = vpack.c.bf16 %v788_v9, %v787_v8  ;;  %v790_v12 = vld [vmem:[#allocation5 + $0x38] sm:$0xff]  ;;  %v791_v14 = vld [vmem:[#allocation5 + $0x40] sm:$0xff]  ;;  %v792_v15 = vld [vmem:[#allocation5 + $0x48] sm:$0xff]  ;;  %s7023_s8 = sld [smem:[#allocation103_spill]]  ;;  %s7024_s26 = sld [smem:[#allocation108_spill]] }
 0x403   :  { %3930 = vmatpush3.bf16.msra.mxu0 %v3929_v5  ;;  %v3938_v13 = vpack.c.bf16 %v790_v12, %v789_v11  ;;  %v3941_v16 = vpack.c.bf16 %v792_v15, %v791_v14  ;;  %v793_v17 = vld [vmem:[#allocation5 + $0x50] sm:$0xff]  ;;  %v794_v18 = vld [vmem:[#allocation5 + $0x58] sm:$0xff]  ;;  %v795_v20 = vld [vmem:[#allocation5 + $0x60] sm:$0xff]  ;;  %s7025_s2 = sld [smem:[#allocation111_spill]]  ;;  %s7026_s27 = sld [smem:[#allocation114_spill]] }
 0x404   :  { %3931 = vmatprep.subr.bf16.mxu0 %v5796_v0  ;;  %v3944_v19 = vpack.c.bf16 %v794_v18, %v793_v17  ;;  %v796_v21 = vld [vmem:[#allocation5 + $0x68] sm:$0xff]  ;;  %v797_v23 = vld [vmem:[#allocation5 + $0x70] sm:$0xff]  ;;  %v798_v24 = vld [vmem:[#allocation5 + $0x78] sm:$0xff]  ;;  %s7027_s4 = sld [smem:[#allocation117_spill]]  ;;  %s7028_s7 = sld [smem:[#allocation119_spill]] }
 0x405   :  { %v3947_v22 = vpack.c.bf16 %v796_v21, %v795_v20  ;;  %v3950_v25 = vpack.c.bf16 %v798_v24, %v797_v23  ;;  %v782_v26 = vld [vmem:[#allocation2] sm:$0xff]  ;;  %v3457_v27 = vld [vmem:[#allocation7] ss:$0 sm:$0xff]  ;;  %v3458_v63 = vld [vmem:[#allocation8] ss:$0 sm:$0xff]  ;;  %s7029_s10 = sld [smem:[#allocation122_spill]] }
 0x406   :  { %v904_v31 = vld [vmem:[%s7019_s13] sm:$0xff]  ;;  %v905_v32 = vld [vmem:[%s7019_s13 + $0x8] sm:$0xff]  ;;  %v906_v33 = vld [vmem:[%s7019_s13 + $0x10] sm:$0xff]  ;;  %s7030_s14 = sld [smem:[#allocation120_spill]]  ;;  %s7031_s15 = sld [smem:[#allocation123_spill]] }
 0x407   :  { %3933 = vmatpush3.bf16.msra.mxu0 %v3932_v7  ;;  %v3953_v34 = vpack.c.bf16 %v905_v32, %v904_v31  ;;  %v907_v35 = vld [vmem:[%s7019_s13 + $0x18] sm:$0xff]  ;;  %v908_v37 = vld [vmem:[%s7019_s13 + $0x20] sm:$0xff]  ;;  %v909_v38 = vld [vmem:[%s7019_s13 + $0x28] sm:$0xff]  ;;  %s7032_s29 = sld [smem:[#allocation126_spill]]  ;;  %s7033_s6 = sld [smem:[#allocation124_spill]] }
 0x408   :  { %3934 = vmatprep.subr.bf16.mxu0 %v5796_v0  ;;  %v3956_v36 = vpack.c.bf16 %v907_v35, %v906_v33  ;;  %v3959_v39 = vpack.c.bf16 %v909_v38, %v908_v37  ;;  %v910_v44 = vld [vmem:[%s7019_s13 + $0x30] sm:$0xff]  ;;  %v911_v45 = vld [vmem:[%s7019_s13 + $0x38] sm:$0xff]  ;;  %v912_v47 = vld [vmem:[%s7019_s13 + $0x40] sm:$0xff]  ;;  %s7034_s11 = sld [smem:[#allocation136_spill]]  ;;  %s7035_s16 = sld [smem:[#allocation138_spill]] }
 0x409   :  { %3954 = vmatpush3.bf16.msra.mxu1 %v3953_v34  ;;  %v3962_v46 = vpack.c.bf16 %v911_v45, %v910_v44  ;;  %v913_v48 = vld [vmem:[%s7019_s13 + $0x48] sm:$0xff]  ;;  %v914_v50 = vld [vmem:[%s7019_s13 + $0x50] sm:$0xff]  ;;  %v915_v51 = vld [vmem:[%s7019_s13 + $0x58] sm:$0xff]  ;;  %s5799_s30 = smov [#allocation70]  }
 0x40a   :  { %3955 = vmatprep.subr.bf16.mxu1 %v5796_v0  ;;  %v3965_v49 = vpack.c.bf16 %v913_v48, %v912_v47  ;;  %v3968_v52 = vpack.c.bf16 %v915_v51, %v914_v50  ;;  %v916_v53 = vld [vmem:[%s7019_s13 + $0x60] sm:$0xff]  ;;  %v917_v54 = vld [vmem:[%s7019_s13 + $0x68] sm:$0xff]  ;;  %v918_v56 = vld [vmem:[%s7019_s13 + $0x70] sm:$0xff]  ;;  %s3363_s18 = sshll.u32 %s5799_s30, 4  ;;  %s3364_s18 = int_to_ptr.vmem [resolvable:$true] %s3363_s18 }
 0x40b   :  { %3936 = vmatpush3.bf16.msra.mxu0 %v3935_v10  ;;  %v3971_v55 = vpack.c.bf16 %v917_v54, %v916_v53  ;;  %v919_v57 = vld [vmem:[%s7019_s13 + $0x78] sm:$0xff]  ;;  %v3459_v3 = vld [vmem:[#allocation10] ss:$0 sm:$0xff]  ;;  %v1004_v6 = vld [vmem:[#allocation13] sm:$0xff]  ;;  %s5615_s9 = scalar_lea.vmem %s3364_s18, 128  ;;  %p5620_p3 = scmp.lt.s32.totalorder %s3364_s18, %s3364_s18 }
 0x40c   :  { %3937 = vmatprep.subr.bf16.mxu0 %v5796_v0  ;;  %v3974_v58 = vpack.c.bf16 %v919_v57, %v918_v56  ;;  %v1005_v7 = vld [vmem:[#allocation13 + $0x8] sm:$0xff]  ;;  %v1006_v9 = vld [vmem:[#allocation13 + $0x10] sm:$0xff]  ;;  %v1007_v10 = vld [vmem:[#allocation13 + $0x18] sm:$0xff]  ;;  %p5616_p2 = scmp.ne.s32.totalorder %s3364_s18, %s5615_s9  ;;  %p5621_p4 = scmp.lt.s32.totalorder %s5615_s9, %s5615_s9 }
 0x40d   :  { %3957 = vmatpush3.bf16.msra.mxu1 %v3956_v36  ;;  %v3977_v8 = vpack.c.bf16 %v1005_v7, %v1004_v6  ;;  %v3980_v11 = vpack.c.bf16 %v1007_v10, %v1006_v9  ;;  %v1008_v12 = vld [vmem:[#allocation13 + $0x20] sm:$0xff]  ;;  %v1010_v15 = vld [vmem:[#allocation13 + $0x30] sm:$0xff]  ;;  %v3460_v18 = vld [vmem:[#allocation11] ss:$0 sm:$0xff] }
 0x40e   :  { %3958 = vmatprep.subr.bf16.mxu1 %v5796_v0  ;;  %v1123_v33 = vld [vmem:[%s7020_s28 + $0x8] sm:$0xff]  ;;  %v1125_v34 = vld [vmem:[%s7020_s28 + $0x18] sm:$0xff]  ;;  %v1122_v35 = vld [vmem:[%s7020_s28] sm:$0xff]  ;;  %p5622_p5 = por %p5621_p4, %p5620_p3 }
 0x40f   :  { %3939 = vmatpush3.bf16.msra.mxu0 %v3938_v13  ;;  %v1009_v13 = vld [vmem:[#allocation13 + $0x28] sm:$0xff]  ;;  %v3988_v36 = vpack.c.bf16 %v1125_v34, %v1123_v33  ;;  %v1124_v37 = vld [vmem:[%s7020_s28 + $0x10] sm:$0xff]  ;;  %v1127_v38 = vld [vmem:[%s7020_s28 + $0x28] sm:$0xff] }
 0x410   :  { %3940 = vmatprep.subr.bf16.mxu0 %v5796_v0  ;;  %v3983_v14 = vpack.c.bf16 %v1009_v13, %v1008_v12  ;;  %v1131_v44 = vld [vmem:[%s7020_s28 + $0x48] sm:$0xff]  ;;  %v1133_v45 = vld [vmem:[%s7020_s28 + $0x58] sm:$0xff]  ;;  %v1130_v48 = vld [vmem:[%s7020_s28 + $0x40] sm:$0xff]  ;;  %p5623_p6 = pnand %p5622_p5, %p5616_p2 }
 0x411   :  { %3960 = vmatpush3.bf16.msra.mxu1 %v3959_v39  ;;  %v1129_v39 = vld [vmem:[%s7020_s28 + $0x38] sm:$0xff]  ;;  %v3996_v47 = vpack.c.bf16 %v1133_v45, %v1131_v44  ;;  %v1142_v7 = vld [vmem:[%s7020_s28 + $0xa0] sm:$0xff]  ;;  %v1144_v9 = vld [vmem:[%s7020_s28 + $0xb0] sm:$0xff] }
 0x412   :  { %3961 = vmatprep.subr.bf16.mxu1 %v5796_v0  ;;  %v1137_v56 = vld [vmem:[%s7020_s28 + $0x78] sm:$0xff]  ;;  %v1147_v10 = vld [vmem:[%s7020_s28 + $0xc8] sm:$0xff]  ;;  %v4010_v12 = vpack.c.bf16 %v1144_v9, %v1142_v7  ;;  %v1298_v44 = vld [vmem:[%s7022_s24 + $0x80] sm:$0xff] }
 0x413   :  { %3942 = vmatpush3.bf16.msra.mxu0 %v3941_v16  ;;  %v1011_v16 = vld [vmem:[#allocation13 + $0x38] sm:$0xff]  ;;  %v1145_v6 = vld [vmem:[%s7020_s28 + $0xb8] sm:$0xff]  ;;  %v1304_v7 = vld [vmem:[%s7022_s24 + $0xb0] sm:$0xff] }
 0x414   :  { %3943 = vmatprep.subr.bf16.mxu0 %v5796_v0  ;;  %v3986_v17 = vpack.c.bf16 %v1011_v16, %v1010_v15  ;;  %v1148_v15 = vld [vmem:[%s7020_s28 + $0xd0] sm:$0xff]  ;;  %v1151_v16 = vld [vmem:[%s7020_s28 + $0xe8] sm:$0xff] }
 0x415   :  { %3963 = vmatpush3.bf16.msra.mxu1 %v3962_v46  ;;  %v1299_v45 = vld [vmem:[%s7022_s24 + $0x88] sm:$0xff] }
 0x416   :  { %3964 = vmatprep.subr.bf16.mxu1 %v5796_v0 }
 0x417   :  { %3945 = vmatpush3.bf16.msra.mxu0 %v3944_v19 }
 0x418   :  { %3946 = vmatprep.subr.bf16.mxu0 %v5796_v0 }
 0x419   :  { %3966 = vmatpush3.bf16.msra.mxu1 %v3965_v49  ;;  %v1132_v49 = vld [vmem:[%s7020_s28 + $0x50] sm:$0xff] }
 0x41a   :  { %3967 = vmatprep.subr.bf16.mxu1 %v5796_v0  ;;  %v3998_v50 = vpack.c.bf16 %v1132_v49, %v1130_v48  ;;  %v1283_v48 = vld [vmem:[%s7022_s24 + $0x8] sm:$0xff]  ;;  %v1300_v49 = vld [vmem:[%s7022_s24 + $0x90] sm:$0xff] }
 0x41b   :  { %3948 = vmatpush3.bf16.msra.mxu0 %v3947_v22 }
 0x41c   :  { %3949 = vmatprep.subr.bf16.mxu0 %v5796_v0 }
 0x41d   :  { %3969 = vmatpush3.bf16.msra.mxu1 %v3968_v52 }
 0x41e   :  { %3970 = vmatprep.subr.bf16.mxu1 %v5796_v0 }
 0x41f   :  { %3951 = vmatpush3.bf16.msra.mxu0 %v3950_v25 }
 0x421   :  { %3972 = vmatpush3.bf16.msra.mxu1 %v3971_v55  ;;  %v1135_v55 = vld [vmem:[%s7020_s28 + $0x68] sm:$0xff] }
 0x422   :  { %3783 = vmatmul.mubr.f32.vlgmr.msra.gmra.mrb[0].mxu0 %v782_v26  ;;  %3973 = vmatprep.subr.bf16.mxu1 %v5796_v0  ;;  %v4000_v57 = vpack.c.bf16 %v1137_v56, %v1135_v55  ;;  %v1302_v55 = vld [vmem:[%s7022_s24 + $0xa0] sm:$0xff]  ;;  %v1303_v56 = vld [vmem:[%s7022_s24 + $0xa8] sm:$0xff] }
 0x425   :  { %3975 = vmatpush3.bf16.msra.mxu1 %v3974_v58  ;;  %v1134_v58 = vld [vmem:[%s7020_s28 + $0x60] sm:$0xff] }
 0x426   :  { %3976 = vmatprep.subr.bf16.mxu1 %v5796_v0 }
 0x4f5   :  { %v872_v28 = vpop.f32.mrb[0].mxu0 }
 0x4f6   :  { %v873_v29 = vadd.f32 %v3457_v27, %v872_v28  ;;  %v3784_v30 = vpop.f32.mrb[1].mxu0  ;;  %v3462_v27 = vld [vmem:[#allocation14] ss:$0 sm:$0xff] }
 0x4f8   :  { %878 = vadd.xlane.f32.xlu0 %v873_v29 }
 0x585   :  { %v879_v40 = vpop.xlane.xlu0 %878 }
 0x586   :  { %v881_v41 = vmul.f32 0.0078125, %v879_v40  ;;  %v3990_v40 = vpack.c.bf16 %v1124_v37, %v1122_v35  ;;  %v1154_v35 = vld [vmem:[%s7021_s1] sm:$0x3] }
 0x588   :  { %v882_v42 = vsub.f32 %v873_v29, %v881_v41  ;;  %v3992_v41 = vpack.c.bf16 %v1129_v39, %v1127_v38 }
 0x58a   :  { %v883_v43 = vmul.f32 %v882_v42, %v882_v42 }
 0x58c   :  { %884 = vadd.xlane.f32.xlu0 %v883_v43  ;;  %v1128_v43 = vld [vmem:[%s7020_s28 + $0x30] sm:$0xff] }
 0x619   :  { %v885_v59 = vpop.xlane.xlu0 %884 }
 0x61a   :  { %v886_v60 = vmul.f32 0.0078125, %v885_v59  ;;  %v1136_v59 = vld [vmem:[%s7020_s28 + $0x70] sm:$0xff] }
 0x61c   :  { %v887_v61 = vadd.f32 1e-05, %v886_v60  ;;  %v4002_v60 = vpack.c.bf16 %v1136_v59, %v1134_v58  ;;  %v4028_v58 = vpack.c.bf16 %v1303_v56, %v1302_v55  ;;  %v1286_v59 = vld [vmem:[%s7022_s24 + $0x20] sm:$0xff]  ;;  %v1401_v56 = vld [vmem:[#allocation22 + $0x18] sm:$0xff] }
 0x61d   :  { %v1399_v55 = vld [vmem:[#allocation22 + $0x8] sm:$0xff] }
 0x61e   :  { %4595 = vrsqrt.f32 %v887_v61  ;;  %v1139_v61 = vld [vmem:[%s7020_s28 + $0x88] sm:$0xff] }
 0x628   :  { %v4596_v62 = vpop.eup %4595 }
 0x629   :  { %v889_v2 = vmul.f32 %v4596_v62, %v882_v42  ;;  %v1126_v42 = vld [vmem:[%s7020_s28 + $0x20] sm:$0xff]  ;;  %v1141_v62 = vld [vmem:[%s7020_s28 + $0x98] sm:$0xff] }
 0x62a   :  { %v3994_v46 = vpack.c.bf16 %v1128_v43, %v1126_v42 }
 0x62b   :  { %v896_v4 = vmul.f32 %v3458_v63, %v889_v2  ;;  %v4004_v63 = vpack.c.bf16 %v1141_v62, %v1139_v61  ;;  %v1138_v2 = vld [vmem:[%s7020_s28 + $0x80] sm:$0xff] }
 0x62d   :  { %v903_v5 = vadd.f32 %v3459_v3, %v896_v4  ;;  %v1140_v3 = vld [vmem:[%s7020_s28 + $0x90] sm:$0xff] }
 0x62e   :  { %v4006_v4 = vpack.c.bf16 %v1140_v3, %v1138_v2 }
 0x62f   :  { %3818 = vmatmul.mubr.f32.vlgmr.msra.gmra.mrb[0].mxu1 %v903_v5  ;;  %v1093_v31 = vmul.f32 2.0, %v903_v5  ;;  %v1143_v5 = vld [vmem:[%s7020_s28 + $0xa8] sm:$0xff] }
 0x630   :  { %3836 = vmatprep.mubr.msk.f32.mxu1 %vm5797_vm0, %v5798_v1  ;;  %3978 = vmatpush3.bf16.msra.mxu1 %v3977_v8  ;;  %v4008_v8 = vpack.c.bf16 %v1145_v6, %v1143_v5 }
 0x631   :  { %3979 = vmatprep.subr.bf16.mxu1 %v5796_v0 }
 0x634   :  { %3981 = vmatpush3.bf16.msra.mxu1 %v3980_v11  ;;  %v1149_v11 = vld [vmem:[%s7020_s28 + $0xd8] sm:$0xff] }
 0x635   :  { %3982 = vmatprep.subr.bf16.mxu1 %v5796_v0  ;;  %v4012_v13 = vpack.c.bf16 %v1149_v11, %v1147_v10  ;;  %v1288_v10 = vld [vmem:[%s7022_s24 + $0x30] sm:$0xff]  ;;  %v1289_v11 = vld [vmem:[%s7022_s24 + $0x38] sm:$0xff] }
 0x638   :  { %3984 = vmatpush3.bf16.msra.mxu1 %v3983_v14  ;;  %v1146_v14 = vld [vmem:[%s7020_s28 + $0xc0] sm:$0xff] }
 0x639   :  { %3985 = vmatprep.subr.bf16.mxu1 %v5796_v0 }
 0x63c   :  { %3987 = vmatpush3.bf16.msra.mxu1 %v3986_v17  ;;  %v1153_v17 = vld [vmem:[%s7020_s28 + $0xf8] sm:$0xff] }
 0x63d   :  { %3989 = vmatprep.subr.bf16.mxu1 %v3988_v36 }
 0x702   :  { %v993_v19 = vpop.f32.mrb[0].mxu1 }
 0x703   :  { %v994_v20 = vadd.f32 %v3460_v18, %v993_v19  ;;  %v3819_v21 = vpop.f32.mrb[1].mxu1  ;;  %v4014_v18 = vpack.c.bf16 %v1148_v15, %v1146_v14  ;;  %v4016_v19 = vpack.c.bf16 %v1153_v17, %v1151_v16  ;;  %v1307_v14 = vld [vmem:[%s7022_s24 + $0xc8] sm:$0xff]  ;;  %v1290_v16 = vld [vmem:[%s7022_s24 + $0x40] sm:$0xff] }
 0x704   :  { %v1152_v21 = vld [vmem:[%s7020_s28 + $0xf0] sm:$0xff]  ;;  %v1291_v17 = vld [vmem:[%s7022_s24 + $0x48] sm:$0xff] }
 0x705   :  { %v3461_v22 = vmul.f32 -1.442695, %v994_v20 }
 0x707   :  { %4597 = vpow2.f32 %v3461_v22 }
 0x711   :  { %v4598_v23 = vpop.eup %4597 }
 0x712   :  { %v1000_v24 = vadd.f32 1.0, %v4598_v23 }
 0x714   :  { %4599 = vrcp.f32 %v1000_v24 }
 0x71e   :  { %v4600_v25 = vpop.eup %4599 }
 0x71f   :  { %v1003_v26 = vmul.f32 %v4600_v25, %v994_v20  ;;  %v1150_v20 = vld [vmem:[%s7020_s28 + $0xe0] sm:$0xff] }
 0x720   :  { %v4018_v22 = vpack.c.bf16 %v1152_v21, %v1150_v20  ;;  %v1309_v20 = vld [vmem:[%s7022_s24 + $0xd8] sm:$0xff]  ;;  %v1292_v21 = vld [vmem:[%s7022_s24 + $0x50] sm:$0xff] }
 0x721   :  { %3837 = vmatmul.mubr.msk.f32.vlgmr.msra.gmra.mrb[2].mxu1 %vm1019_vm1, %v1003_v26 }
 0x722   :  { %1230 = vmatprep.mubr.f32.mxu1 %v5798_v1  ;;  %3991 = vmatpush1.bf16.msra.mxu1 %v3990_v40 }
 0x723   :  { %3993 = vmatprep.subr.bf16.mxu1 %v3992_v41 }
 0x726   :  { %3995 = vmatpush1.bf16.msra.mxu1 %v3994_v46  ;;  %v1282_v46 = vld [vmem:[%s7022_s24] sm:$0xff] }
 0x727   :  { %3997 = vmatprep.subr.bf16.mxu1 %v3996_v47  ;;  %v4020_v47 = vpack.c.bf16 %v1299_v45, %v1298_v44 }
 0x729   :  { %4021 = vmatprep.subr.bf16.mxu0 %v4020_v47 }
 0x72a   :  { %3999 = vmatpush1.bf16.msra.mxu1 %v3998_v50  ;;  %v1301_v50 = vld [vmem:[%s7022_s24 + $0x98] sm:$0xff] }
 0x72b   :  { %4001 = vmatprep.subr.bf16.mxu1 %v4000_v57 }
 0x72e   :  { %4003 = vmatpush1.bf16.msra.mxu1 %v4002_v60  ;;  %v1287_v60 = vld [vmem:[%s7022_s24 + $0x28] sm:$0xff] }
 0x72f   :  { %4005 = vmatprep.subr.bf16.mxu1 %v4004_v63  ;;  %v4030_v61 = vpack.c.bf16 %v1287_v60, %v1286_v59  ;;  %v1400_v59 = vld [vmem:[#allocation22 + $0x10] sm:$0xff] }
 0x732   :  { %4007 = vmatpush1.bf16.msra.mxu1 %v4006_v4 }
 0x733   :  { %4009 = vmatprep.subr.bf16.mxu1 %v4008_v8  ;;  %v1305_v8 = vld [vmem:[%s7022_s24 + $0xb8] sm:$0xff] }
 0x734   :  { %v4032_v9 = vpack.c.bf16 %v1305_v8, %v1304_v7  ;;  %v1406_v8 = vld [vmem:[#allocation22 + $0x40] sm:$0xff] }
 0x736   :  { %4011 = vmatpush1.bf16.msra.mxu1 %v4010_v12  ;;  %v4034_v12 = vpack.c.bf16 %v1289_v11, %v1288_v10  ;;  %v1411_v11 = vld [vmem:[#allocation22 + $0x68] sm:$0xff] }
 0x737   :  { %4013 = vmatprep.subr.bf16.mxu1 %v4012_v13  ;;  %v1306_v13 = vld [vmem:[%s7022_s24 + $0xc0] sm:$0xff] }
 0x738   :  { %v4036_v15 = vpack.c.bf16 %v1307_v14, %v1306_v13  ;;  %v1410_v14 = vld [vmem:[#allocation22 + $0x60] sm:$0xff] }
 0x73a   :  { %4015 = vmatpush1.bf16.msra.mxu1 %v4014_v18  ;;  %v1308_v18 = vld [vmem:[%s7022_s24 + $0xd0] sm:$0xff] }
 0x73b   :  { %4017 = vmatprep.subr.bf16.mxu1 %v4016_v19  ;;  %v4038_v19 = vpack.c.bf16 %v1291_v17, %v1290_v16 }
 0x73e   :  { %4019 = vmatpush1.bf16.msra.mxu1 %v4018_v22  ;;  %v1293_v22 = vld [vmem:[%s7022_s24 + $0x58] sm:$0xff] }
 0x7f4   :  { %v1089_v28 = vpop.f32.mrb[2].mxu1 }
 0x7f5   :  { %v1090_v29 = vadd.f32 %v3462_v27, %v1089_v28  ;;  %v3838_v30 = vpop.f32.mrb[3].mxu1  ;;  %v3464_v27 = vld [vmem:[#allocation16] ss:$0 sm:$0xff] }
 0x7f7   :  { %v1094_v32 = vadd.f32 %v1093_v31, %v1090_v29  ;;  %v3465_v29 = vld [vmem:[#allocation17] ss:$0 sm:$0xff] }
 0x7f9   :  { %1097 = vadd.xlane.f32.xlu1 %v1094_v32 }
 0x886   :  { %v1098_v51 = vpop.xlane.xlu1 %1097 }
 0x887   :  { %v1099_v52 = vmul.f32 0.0078125, %v1098_v51  ;;  %v4022_v51 = vpack.c.bf16 %v1283_v48, %v1282_v46 }
 0x889   :  { %v1100_v53 = vsub.f32 %v1094_v32, %v1099_v52  ;;  %v1156_v32 = vlaneseq  ;;  %v4024_v52 = vpack.c.bf16 %v1301_v50, %v1300_v49  ;;  %4023 = vmatpush3.bf16.msra.mxu0 %v4022_v51 }
 0x88b   :  { %v1101_v54 = vmul.f32 %v1100_v53, %v1100_v53  ;;  %v1157_v33 = vshrl.u32 %v1156_v32, 7  ;;  %4025 = vmatprep.subr.bf16.mxu0 %v4024_v52 }
 0x88d   :  { %1102 = vadd.xlane.f32.xlu1 %v1101_v54  ;;  %v6437_v34 = vsub.s32 0, %v1157_v33  ;;  %v6440_v36 = vsub.s32 1, %v1157_v33  ;;  %v1285_v54 = vld [vmem:[%s7022_s24 + $0x18] sm:$0xff] }
 0x88f   :  { %v1159_v37 = vrot.slane %v1154_v35, %v6437_v34  ;;  %v1163_v38 = vrot.slane %v1154_v35, %v6440_v36  ;;  %v1296_v35 = vld [vmem:[%s7022_s24 + $0x70] sm:$0xff] }
 0x91a   :  { %v1103_v23 = vpop.xlane.xlu1 %1102 }
 0x91b   :  { %v1104_v24 = vmul.f32 0.0078125, %v1103_v23  ;;  %v4040_v23 = vpack.c.bf16 %v1309_v20, %v1308_v18  ;;  %v3466_v18 = vld [vmem:[#allocation20] ss:$0 sm:$0xff] }
 0x91d   :  { %v1105_v25 = vadd.f32 1e-05, %v1104_v24  ;;  %v1310_v24 = vld [vmem:[%s7022_s24 + $0xe0] sm:$0xff] }
 0x91f   :  { %4601 = vrsqrt.f32 %v1105_v25  ;;  %v1311_v25 = vld [vmem:[%s7022_s24 + $0xe8] sm:$0xff] }
 0x929   :  { %v4602_v26 = vpop.eup %4601 }
 0x92a   :  { %v1107_v28 = vmul.f32 %v4602_v26, %v1100_v53  ;;  %v1284_v53 = vld [vmem:[%s7022_s24 + $0x10] sm:$0xff]  ;;  %v4042_v26 = vpack.c.bf16 %v1293_v22, %v1292_v21 }
 0x92b   :  { %v4026_v57 = vpack.c.bf16 %v1285_v54, %v1284_v53 }
 0x92c   :  { %v1114_v30 = vmul.f32 %v3464_v27, %v1107_v28  ;;  %v4044_v27 = vpack.c.bf16 %v1311_v25, %v1310_v24  ;;  %v1294_v28 = vld [vmem:[%s7022_s24 + $0x60] sm:$0xff] }
 0x92d   :  { %4027 = vmatpush3.bf16.msra.mxu0 %v4026_v57  ;;  %v4052_v57 = vpack.c.bf16 %v1401_v56, %v1399_v55  ;;  %v1556_v56 = vld [vmem:[%s7024_s26 + $0x40] sm:$0xff] }
 0x92e   :  { %v1121_v31 = vadd.f32 %v3465_v29, %v1114_v30  ;;  %4029 = vmatprep.subr.bf16.mxu0 %v4028_v58  ;;  %v1295_v29 = vld [vmem:[%s7022_s24 + $0x68] sm:$0xff]  ;;  %v1312_v30 = vld [vmem:[%s7022_s24 + $0xf0] sm:$0xff]  ;;  %v1398_v58 = vld [vmem:[#allocation22] sm:$0xff] }
 0x92f   :  { %v4046_v32 = vpack.c.bf16 %v1295_v29, %v1294_v28  ;;  %v4054_v60 = vpack.c.bf16 %v1400_v59, %v1398_v58  ;;  %4053 = vmatprep.subr.bf16.mxu1 %v4052_v57  ;;  %v1558_v57 = vld [vmem:[%s7024_s26 + $0x50] sm:$0xff]  ;;  %v1561_v58 = vld [vmem:[%s7024_s26 + $0x68] sm:$0xff]  ;;  %v1563_v59 = vld [vmem:[%s7024_s26 + $0x78] sm:$0xff] }
 0x930   :  { %1231 = vmatmul.mubr.f32.vlgmr.msra.gmra.mrb[4].mxu1 %v1121_v31  ;;  %v1313_v31 = vld [vmem:[%s7022_s24 + $0xf8] sm:$0xff] }
 0x931   :  { %1493 = vmatprep.mubr.f32.mxu1 %v5798_v1  ;;  %4031 = vmatpush3.bf16.msra.mxu0 %v4030_v61  ;;  %v4048_v33 = vpack.c.bf16 %v1313_v31, %v1312_v30  ;;  %v1403_v61 = vld [vmem:[#allocation22 + $0x28] sm:$0xff] }
 0x932   :  { %4033 = vmatprep.subr.bf16.mxu0 %v4032_v9  ;;  %4055 = vmatpush1.bf16.msra.mxu1 %v4054_v60  ;;  %v1408_v9 = vld [vmem:[#allocation22 + $0x50] sm:$0xff]  ;;  %v4078_v60 = vpack.c.bf16 %v1558_v57, %v1556_v56  ;;  %v1595_v57 = vld [vmem:[%s7024_s26 + $0x178] sm:$0xff] }
 0x933   :  { %v4062_v10 = vpack.c.bf16 %v1408_v9, %v1406_v8  ;;  %v1569_v8 = vld [vmem:[%s7024_s26 + $0xa8] sm:$0xff]  ;;  %v1571_v9 = vld [vmem:[%s7024_s26 + $0xb8] sm:$0xff] }
 0x934   :  { %v1593_v56 = vld [vmem:[%s7024_s26 + $0x168] sm:$0xff] }
 0x935   :  { %4035 = vmatpush3.bf16.msra.mxu0 %v4034_v12  ;;  %v1413_v12 = vld [vmem:[#allocation22 + $0x78] sm:$0xff] }
 0x936   :  { %4037 = vmatprep.subr.bf16.mxu0 %v4036_v15  ;;  %v4064_v13 = vpack.c.bf16 %v1413_v12, %v1411_v11  ;;  %v1412_v15 = vld [vmem:[#allocation22 + $0x70] sm:$0xff]  ;;  %v4088_v11 = vpack.c.bf16 %v1571_v9, %v1569_v8  ;;  %v1568_v12 = vld [vmem:[%s7024_s26 + $0xa0] sm:$0xff] }
 0x937   :  { %v4066_v16 = vpack.c.bf16 %v1412_v15, %v1410_v14  ;;  %v1573_v14 = vld [vmem:[%s7024_s26 + $0xc8] sm:$0xff]  ;;  %v1575_v15 = vld [vmem:[%s7024_s26 + $0xd8] sm:$0xff] }
 0x938   :  { %v1605_v9 = vld [vmem:[%s7024_s26 + $0x1c8] sm:$0xff] }
 0x939   :  { %4039 = vmatpush3.bf16.msra.mxu0 %v4038_v19 }
 0x93a   :  { %4041 = vmatprep.subr.bf16.mxu0 %v4040_v23 }
 0x93d   :  { %4043 = vmatpush3.bf16.msra.mxu0 %v4042_v26 }
 0x93e   :  { %4045 = vmatprep.subr.bf16.mxu0 %v4044_v27  ;;  %v1414_v27 = vld [vmem:[#allocation23] sm:$0x3] }
 0x93f   :  { %v1419_v28 = vrot.slane %v1414_v27, %v6437_v34  ;;  %v1423_v29 = vrot.slane %v1414_v27, %v6440_v36  ;;  %v1583_v27 = vld [vmem:[%s7024_s26 + $0x118] sm:$0xff] }
 0x941   :  { %4047 = vmatpush3.bf16.msra.mxu0 %v4046_v32 }
 0x942   :  { %4049 = vmatprep.subr.bf16.mxu0 %v4048_v33 }
 0xa03   :  { %v1232_v39 = vpop.f32.mrb[4].mxu1 }
 0xa04   :  { %v1233_v40 = vadd.f32 %v1232_v39, %v1159_v37  ;;  %v1234_v41 = vpop.f32.mrb[5].mxu1  ;;  %v1297_v37 = vld [vmem:[%s7022_s24 + $0x78] sm:$0xff] }
 0xa05   :  { %v1235_v42 = vadd.f32 %v1234_v41, %v1163_v38  ;;  %v4050_v38 = vpack.c.bf16 %v1297_v37, %v1296_v35 }
 0xa07   :  { %v1239_v43 = vadd.f32 %v1235_v42, %v1233_v40  ;;  %4051 = vmatpush3.bf16.msra.mxu0 %v4050_v38 }
 0xa09   :  { %1240 = vadd.xlane.f32.xlu0 %v1239_v43  ;;  %v1238_v43 = vld [vmem:[#allocation19] sm:$0x3] }
 0xa0a   :  { %v1273_v48 = vrot.slane %v1238_v43, %v6437_v34  ;;  %v1277_v49 = vrot.slane %v1238_v43, %v6440_v36  ;;  %v1548_v43 = vld [vmem:[%s7024_s26] sm:$0xff] }
 0xa96   :  { %v1241_v62 = vpop.xlane.xlu0 %1240 }
 0xa97   :  { %v1243_v63 = vmul.f32 0.00390625, %v1241_v62  ;;  %v1405_v62 = vld [vmem:[#allocation22 + $0x38] sm:$0xff] }
 0xa99   :  { %v1244_v2 = vsub.f32 %v1233_v40, %v1243_v63  ;;  %v1245_v3 = vsub.f32 %v1235_v42, %v1243_v63  ;;  %v1237_v42 = vld [vmem:[%s7023_s8] sm:$0x3]  ;;  %v4056_v63 = vpack.c.bf16 %v1405_v62, %v1403_v61  ;;  %v4080_v61 = vpack.c.bf16 %v1563_v59, %v1561_v58 }
 0xa9a   :  { %v1260_v44 = vrot.slane %v1237_v42, %v6437_v34  ;;  %v1264_v45 = vrot.slane %v1237_v42, %v6440_v36  ;;  %v1551_v42 = vld [vmem:[%s7024_s26 + $0x18] sm:$0xff]  ;;  %v1560_v62 = vld [vmem:[%s7024_s26 + $0x60] sm:$0xff]  ;;  %v4112_v58 = vpack.c.bf16 %v1595_v57, %v1593_v56 }
 0xa9b   :  { %v1246_v4 = vmul.f32 %v1244_v2, %v1244_v2  ;;  %v1247_v5 = vmul.f32 %v1245_v3, %v1245_v3  ;;  %4057 = vmatprep.subr.bf16.mxu1 %v4056_v63  ;;  %v1562_v63 = vld [vmem:[%s7024_s26 + $0x70] sm:$0xff]  ;;  %v1592_v59 = vld [vmem:[%s7024_s26 + $0x160] sm:$0xff]  ;;  %v1758_v56 = vld [vmem:[%s7025_s2 + $0x98] sm:$0xff] }
 0xa9d   :  { %v1248_v6 = vadd.f32 %v1247_v5, %v1246_v4  ;;  %v1404_v4 = vld [vmem:[#allocation22 + $0x30] sm:$0xff]  ;;  %v1407_v5 = vld [vmem:[#allocation22 + $0x48] sm:$0xff] }
 0xa9f   :  { %1249 = vadd.xlane.f32.xlu1 %v1248_v6  ;;  %v1409_v6 = vld [vmem:[#allocation22 + $0x58] sm:$0xff] }
 0xaa0   :  { %v4060_v7 = vpack.c.bf16 %v1409_v6, %v1407_v5  ;;  %v1564_v6 = vld [vmem:[%s7024_s26 + $0x80] sm:$0xff] }
 0xb2c   :  { %v1250_v39 = vpop.xlane.xlu1 %1249 }
 0xb2d   :  { %v1251_v40 = vmul.f32 0.00390625, %v1250_v39 }
 0xb2f   :  { %v1252_v41 = vadd.f32 1e-05, %v1251_v40 }
 0xb31   :  { %4603 = vrsqrt.f32 %v1252_v41  ;;  %v1549_v41 = vld [vmem:[%s7024_s26 + $0x8] sm:$0xff] }
 0xb3b   :  { %v4604_v46 = vpop.eup %4603 }
 0xb3c   :  { %v1255_v47 = vmul.f32 %v4604_v46, %v1245_v3  ;;  %v1254_v50 = vmul.f32 %v4604_v46, %v1244_v2  ;;  %v1402_v3 = vld [vmem:[#allocation22 + $0x20] sm:$0xff]  ;;  %v1553_v46 = vld [vmem:[%s7024_s26 + $0x28] sm:$0xff] }
 0xb3d   :  { %v4058_v2 = vpack.c.bf16 %v1404_v4, %v1402_v3  ;;  %v1565_v3 = vld [vmem:[%s7024_s26 + $0x88] sm:$0xff]  ;;  %v1567_v4 = vld [vmem:[%s7024_s26 + $0x98] sm:$0xff] }
 0xb3e   :  { %v1268_v51 = vmul.f32 %v1264_v45, %v1255_v47  ;;  %v1267_v52 = vmul.f32 %v1260_v44, %v1254_v50  ;;  %v4068_v44 = vpack.c.bf16 %v1551_v42, %v1549_v41  ;;  %v1550_v45 = vld [vmem:[%s7024_s26 + $0x10] sm:$0xff]  ;;  %v1555_v47 = vld [vmem:[%s7024_s26 + $0x38] sm:$0xff]  ;;  %v1552_v50 = vld [vmem:[%s7024_s26 + $0x20] sm:$0xff]  ;;  %v4084_v5 = vpack.c.bf16 %v1567_v4, %v1565_v3 }
 0xb3f   :  { %4059 = vmatpush1.bf16.msra.mxu1 %v4058_v2  ;;  %v4082_v2 = vpack.c.bf16 %v1562_v63, %v1560_v62  ;;  %v1586_v41 = vld [vmem:[%s7024_s26 + $0x130] sm:$0xff]  ;;  %v1589_v42 = vld [vmem:[%s7024_s26 + $0x148] sm:$0xff]  ;;  %v1596_v63 = vld [vmem:[%s7024_s26 + $0x180] sm:$0xff] }
 0xb40   :  { %v1281_v53 = vadd.f32 %v1277_v49, %v1268_v51  ;;  %v1280_v54 = vadd.f32 %v1273_v48, %v1267_v52  ;;  %4061 = vmatprep.subr.bf16.mxu1 %v4060_v7  ;;  %v4070_v48 = vpack.c.bf16 %v1550_v45, %v1548_v43  ;;  %v4072_v49 = vpack.c.bf16 %v1555_v47, %v1553_v46  ;;  %v1554_v51 = vld [vmem:[%s7024_s26 + $0x30] sm:$0xff]  ;;  %v1557_v52 = vld [vmem:[%s7024_s26 + $0x48] sm:$0xff]  ;;  %v1591_v43 = vld [vmem:[%s7024_s26 + $0x158] sm:$0xff] }
 0xb41   :  { %4069 = vmatprep.subr.bf16.mxu0 %v4068_v44  ;;  %v1566_v7 = vld [vmem:[%s7024_s26 + $0x90] sm:$0xff]  ;;  %v4108_v45 = vpack.c.bf16 %v1591_v43, %v1589_v42  ;;  %v1588_v46 = vld [vmem:[%s7024_s26 + $0x140] sm:$0xff]  ;;  %v1601_v4 = vld [vmem:[%s7024_s26 + $0x1a8] sm:$0xff] }
 0xb42   :  { %1385 = vmatprep.mubr.f32.mxu0 %v1281_v53  ;;  %v1500_v32 = vmul.f32 2.0, %v1280_v54  ;;  %v1501_v37 = vmul.f32 2.0, %v1281_v53  ;;  %v1559_v53 = vld [vmem:[%s7024_s26 + $0x58] sm:$0xff]  ;;  %v1590_v47 = vld [vmem:[%s7024_s26 + $0x150] sm:$0xff]  ;;  %v1612_v42 = vld [vmem:[#allocation28] sm:$0x3] }
 0xb43   :  { %1386 = vmatmul.mubr.f32.vlgmr.msra.gmra.mrb[2].mxu0 %v1280_v54  ;;  %4063 = vmatpush1.bf16.msra.mxu1 %v4062_v10  ;;  %v4074_v54 = vpack.c.bf16 %v1554_v51, %v1552_v50  ;;  %v4076_v55 = vpack.c.bf16 %v1559_v53, %v1557_v52  ;;  %v4086_v10 = vpack.c.bf16 %v1566_v7, %v1564_v6  ;;  %v1598_v3 = vld [vmem:[%s7024_s26 + $0x190] sm:$0xff]  ;;  %v1600_v6 = vld [vmem:[%s7024_s26 + $0x1a0] sm:$0xff] }
 0xb44   :  { %4065 = vmatprep.subr.bf16.mxu1 %v4064_v13  ;;  %4071 = vmatpush1.bf16.msra.mxu0 %v4070_v48  ;;  %v1570_v13 = vld [vmem:[%s7024_s26 + $0xb0] sm:$0xff]  ;;  %v4110_v48 = vpack.c.bf16 %v1590_v47, %v1588_v46  ;;  %v1617_v43 = vrot.slane %v1612_v42, %v6437_v34 }
 0xb45   :  { %4073 = vmatprep.subr.bf16.mxu0 %v4072_v49  ;;  %v1602_v7 = vld [vmem:[%s7024_s26 + $0x1b0] sm:$0xff] }
 0xb47   :  { %4067 = vmatpush1.bf16.msra.mxu1 %v4066_v16  ;;  %v4090_v16 = vpack.c.bf16 %v1570_v13, %v1568_v12  ;;  %v1604_v13 = vld [vmem:[%s7024_s26 + $0x1c0] sm:$0xff] }
 0xb48   :  { %4075 = vmatpush1.bf16.msra.mxu0 %v4074_v54 }
 0xb49   :  { %4077 = vmatprep.subr.bf16.mxu0 %v4076_v55 }
 0xb4c   :  { %4079 = vmatpush1.bf16.msra.mxu0 %v4078_v60  ;;  %v1594_v60 = vld [vmem:[%s7024_s26 + $0x170] sm:$0xff] }
 0xb4d   :  { %4081 = vmatprep.subr.bf16.mxu0 %v4080_v61  ;;  %v4114_v61 = vpack.c.bf16 %v1594_v60, %v1592_v59  ;;  %v1741_v59 = vld [vmem:[%s7025_s2 + $0x10] sm:$0xff]  ;;  %v1742_v60 = vld [vmem:[%s7025_s2 + $0x18] sm:$0xff] }
 0xb50   :  { %4083 = vmatpush1.bf16.msra.mxu0 %v4082_v2  ;;  %v4118_v2 = vpack.c.bf16 %v1598_v3, %v1596_v63  ;;  %v1743_v63 = vld [vmem:[%s7025_s2 + $0x20] sm:$0xff]  ;;  %v1744_v3 = vld [vmem:[%s7025_s2 + $0x28] sm:$0xff] }
 0xb51   :  { %4085 = vmatprep.subr.bf16.mxu0 %v4084_v5  ;;  %v1603_v5 = vld [vmem:[%s7024_s26 + $0x1b8] sm:$0xff] }
 0xb52   :  { %v4120_v8 = vpack.c.bf16 %v1603_v5, %v1601_v4  ;;  %v4142_v4 = vpack.c.bf16 %v1744_v3, %v1743_v63  ;;  %v1857_v63 = vld [vmem:[#allocation34 + $0x10] sm:$0xff] }
 0xb54   :  { %4087 = vmatpush1.bf16.msra.mxu0 %v4086_v10  ;;  %v1607_v10 = vld [vmem:[%s7024_s26 + $0x1d8] sm:$0xff] }
 0xb55   :  { %4089 = vmatprep.subr.bf16.mxu0 %v4088_v11  ;;  %v4122_v11 = vpack.c.bf16 %v1602_v7, %v1600_v6  ;;  %v4124_v12 = vpack.c.bf16 %v1607_v10, %v1605_v9 }
 0xb58   :  { %4091 = vmatpush1.bf16.msra.mxu0 %v4090_v16  ;;  %v1611_v16 = vld [vmem:[%s7024_s26 + $0x1f8] sm:$0xff] }
 0xc16   :  { %v3564_v17 = vpop.f32.mrb[2].mxu0 }
 0xc17   :  { %v3565_v19 = vpop.f32.mrb[3].mxu0 }
 0xc18   :  { %v3566_v20 = vadd.f32 %v3565_v19, %v3564_v17  ;;  %v4092_v17 = vpack.c.bf16 %v1575_v15, %v1573_v14  ;;  %v1574_v19 = vld [vmem:[%s7024_s26 + $0xd0] sm:$0xff]  ;;  %v1609_v15 = vld [vmem:[%s7024_s26 + $0x1e8] sm:$0xff] }
 0xc19   :  { %v1606_v14 = vld [vmem:[%s7024_s26 + $0x1d0] sm:$0xff] }
 0xc1a   :  { %v1388_v21 = vadd.f32 %v3566_v20, %v3466_v18  ;;  %v1572_v18 = vld [vmem:[%s7024_s26 + $0xc0] sm:$0xff]  ;;  %v1577_v20 = vld [vmem:[%s7024_s26 + $0xe8] sm:$0xff]  ;;  %4093 = vmatprep.subr.bf16.mxu0 %v4092_v17  ;;  %v4126_v17 = vpack.c.bf16 %v1606_v14, %v1604_v13  ;;  %v1745_v14 = vld [vmem:[%s7025_s2 + $0x30] sm:$0xff] }
 0xc1c   :  { %v3467_v22 = vmul.f32 -1.442695, %v1388_v21 }
 0xc1e   :  { %4605 = vpow2.f32 %v3467_v22  ;;  %v4094_v22 = vpack.c.bf16 %v1574_v19, %v1572_v18  ;;  %v4128_v18 = vpack.c.bf16 %v1611_v16, %v1609_v15  ;;  %v1608_v19 = vld [vmem:[%s7024_s26 + $0x1e0] sm:$0xff]  ;;  %v1746_v15 = vld [vmem:[%s7025_s2 + $0x38] sm:$0xff] }
 0xc1f   :  { %v4146_v16 = vpack.c.bf16 %v1746_v15, %v1745_v14 }
 0xc20   :  { %4095 = vmatpush1.bf16.msra.mxu0 %v4094_v22 }
 0xc28   :  { %v4606_v23 = vpop.eup %4605 }
 0xc29   :  { %v1394_v24 = vadd.f32 1.0, %v4606_v23 }
 0xc2b   :  { %4607 = vrcp.f32 %v1394_v24  ;;  %v1576_v24 = vld [vmem:[%s7024_s26 + $0xe0] sm:$0xff] }
 0xc35   :  { %v4608_v25 = vpop.eup %4607 }
 0xc36   :  { %v1397_v26 = vmul.f32 %v4608_v25, %v1388_v21  ;;  %v1579_v21 = vld [vmem:[%s7024_s26 + $0xf8] sm:$0xff]  ;;  %v1578_v25 = vld [vmem:[%s7024_s26 + $0xf0] sm:$0xff] }
 0xc37   :  { %v4096_v23 = vpack.c.bf16 %v1579_v21, %v1577_v20  ;;  %v1610_v20 = vld [vmem:[%s7024_s26 + $0x1f0] sm:$0xff] }
 0xc38   :  { %3468 = vmatmul.mubr.msk.f32.vlgmr.msra.gmra.mrb[6].mxu1 %vm1019_vm1, %v1397_v26  ;;  %v1581_v26 = vld [vmem:[%s7024_s26 + $0x108] sm:$0xff]  ;;  %v4130_v21 = vpack.c.bf16 %v1610_v20, %v1608_v19  ;;  %v1747_v20 = vld [vmem:[%s7025_s2 + $0x40] sm:$0xff] }
 0xc39   :  { %4097 = vmatprep.subr.bf16.mxu0 %v4096_v23 }
 0xd0b   :  { %v1495_v30 = vpop.f32.mrb[6].mxu1 }
 0xd0c   :  { %v1496_v31 = vadd.f32 %v1495_v30, %v1419_v28  ;;  %v1497_v33 = vpop.f32.mrb[7].mxu1  ;;  %v4098_v28 = vpack.c.bf16 %v1578_v25, %v1576_v24  ;;  %v1580_v30 = vld [vmem:[%s7024_s26 + $0x100] sm:$0xff]  ;;  %v1504_v25 = vld [vmem:[#allocation25] sm:$0x3] }
 0xd0d   :  { %v1498_v35 = vadd.f32 %v1497_v33, %v1423_v29  ;;  %v4100_v29 = vpack.c.bf16 %v1583_v27, %v1581_v26  ;;  %v1587_v33 = vld [vmem:[%s7024_s26 + $0x138] sm:$0xff]  ;;  %v1526_v27 = vrot.slane %v1504_v25, %v6437_v34 }
 0xd0e   :  { %v6484_v38 = vadd.f32 %v1500_v32, %v1496_v31  ;;  %v1582_v31 = vld [vmem:[%s7024_s26 + $0x110] sm:$0xff]  ;;  %v1585_v32 = vld [vmem:[%s7024_s26 + $0x128] sm:$0xff]  ;;  %4099 = vmatpush1.bf16.msra.mxu0 %v4098_v28  ;;  %v1505_v26 = vld [vmem:[#allocation26] sm:$0x3]  ;;  %v1530_v28 = vrot.slane %v1504_v25, %v6440_v36 }
 0xd0f   :  { %v6486_v39 = vadd.f32 %v1501_v37, %v1498_v35  ;;  %v4102_v35 = vpack.c.bf16 %v1582_v31, %v1580_v30  ;;  %4101 = vmatprep.subr.bf16.mxu0 %v4100_v29  ;;  %v4104_v37 = vpack.c.bf16 %v1587_v33, %v1585_v32  ;;  %v1539_v31 = vrot.slane %v1505_v26, %v6437_v34  ;;  %v1749_v25 = vld [vmem:[%s7025_s2 + $0x50] sm:$0xff] }
 0xd10   :  { %v1543_v32 = vrot.slane %v1505_v26, %v6440_v36  ;;  %v1750_v26 = vld [vmem:[%s7025_s2 + $0x58] sm:$0xff] }
 0xd11   :  { %v1506_v40 = vadd.f32 %v6486_v39, %v6484_v38 }
 0xd12   :  { %4103 = vmatpush1.bf16.msra.mxu0 %v4102_v35 }
 0xd13   :  { %1507 = vadd.xlane.f32.xlu0 %v1506_v40  ;;  %v1584_v40 = vld [vmem:[%s7024_s26 + $0x120] sm:$0xff]  ;;  %4105 = vmatprep.subr.bf16.mxu0 %v4104_v37 }
 0xd14   :  { %v4106_v44 = vpack.c.bf16 %v1586_v41, %v1584_v40 }
 0xd16   :  { %4107 = vmatpush1.bf16.msra.mxu0 %v4106_v44  ;;  %v1621_v44 = vrot.slane %v1612_v42, %v6440_v36  ;;  %v1753_v42 = vld [vmem:[%s7025_s2 + $0x70] sm:$0xff] }
 0xd17   :  { %4109 = vmatprep.subr.bf16.mxu0 %v4108_v45 }
 0xd1a   :  { %4111 = vmatpush1.bf16.msra.mxu0 %v4110_v48 }
 0xd1b   :  { %4113 = vmatprep.subr.bf16.mxu0 %v4112_v58 }
 0xd1e   :  { %4115 = vmatpush1.bf16.msra.mxu0 %v4114_v61  ;;  %v1759_v61 = vld [vmem:[%s7025_s2 + $0xa0] sm:$0xff] }
 0xda0   :  { %v1508_v49 = vpop.xlane.xlu0 %1507 }
 0xda1   :  { %v1509_v50 = vmul.f32 0.00390625, %v1508_v49 }
 0xda3   :  { %v1510_v51 = vsub.f32 %v6484_v38, %v1509_v50  ;;  %v1511_v52 = vsub.f32 %v6486_v39, %v1509_v50  ;;  %v1597_v38 = vld [vmem:[%s7024_s26 + $0x188] sm:$0xff]  ;;  %v1599_v39 = vld [vmem:[%s7024_s26 + $0x198] sm:$0xff]  ;;  %v1755_v50 = vld [vmem:[%s7025_s2 + $0x80] sm:$0xff] }
 0xda4   :  { %v4116_v62 = vpack.c.bf16 %v1599_v39, %v1597_v38  ;;  %v1760_v38 = vld [vmem:[%s7025_s2 + $0xa8] sm:$0xff]  ;;  %v4138_v39 = vpack.c.bf16 %v1742_v60, %v1741_v59 }
 0xda5   :  { %v1512_v53 = vmul.f32 %v1510_v51, %v1510_v51  ;;  %v1513_v54 = vmul.f32 %v1511_v52, %v1511_v52 }
 0xda6   :  { %4117 = vmatprep.subr.bf16.mxu0 %v4116_v62  ;;  %v4140_v62 = vpack.c.bf16 %v1760_v38, %v1759_v61  ;;  %v1856_v61 = vld [vmem:[#allocation34 + $0x8] sm:$0xff]  ;;  %v1858_v38 = vld [vmem:[#allocation34 + $0x18] sm:$0xff] }
 0xda7   :  { %v1514_v55 = vadd.f32 %v1513_v54, %v1512_v53  ;;  %4119 = vmatpush1.bf16.msra.mxu0 %v4118_v2  ;;  %v1740_v54 = vld [vmem:[%s7025_s2 + $0x8] sm:$0xff] }
 0xda8   :  { %4121 = vmatprep.subr.bf16.mxu0 %v4120_v8 }
 0xda9   :  { %1515 = vadd.xlane.f32.xlu1 %v1514_v55  ;;  %v1757_v55 = vld [vmem:[%s7025_s2 + $0x90] sm:$0xff] }
 0xdaa   :  { %v4136_v58 = vpack.c.bf16 %v1758_v56, %v1757_v55 }
 0xdab   :  { %4123 = vmatpush1.bf16.msra.mxu0 %v4122_v11  ;;  %v1761_v11 = vld [vmem:[%s7025_s2 + $0xb0] sm:$0xff] }
 0xdac   :  { %4125 = vmatprep.subr.bf16.mxu0 %v4124_v12  ;;  %v1762_v12 = vld [vmem:[%s7025_s2 + $0xb8] sm:$0xff] }
 0xdad   :  { %v4144_v13 = vpack.c.bf16 %v1762_v12, %v1761_v11 }
 0xdaf   :  { %4127 = vmatpush1.bf16.msra.mxu0 %v4126_v17  ;;  %v1763_v17 = vld [vmem:[%s7025_s2 + $0xc0] sm:$0xff] }
 0xdb0   :  { %4129 = vmatprep.subr.bf16.mxu0 %v4128_v18  ;;  %v1764_v18 = vld [vmem:[%s7025_s2 + $0xc8] sm:$0xff] }
 0xdb1   :  { %v4148_v19 = vpack.c.bf16 %v1764_v18, %v1763_v17 }
 0xdb3   :  { %4131 = vmatpush1.bf16.msra.mxu0 %v4130_v21  ;;  %v1748_v21 = vld [vmem:[%s7025_s2 + $0x48] sm:$0xff] }
 0xe36   :  { %v1516_v22 = vpop.xlane.xlu1 %1515 }
 0xe37   :  { %v1517_v23 = vmul.f32 0.00390625, %v1516_v22  ;;  %v1765_v22 = vld [vmem:[%s7025_s2 + $0xd0] sm:$0xff] }
 0xe39   :  { %v1518_v24 = vadd.f32 1e-05, %v1517_v23  ;;  %v4150_v23 = vpack.c.bf16 %v1748_v21, %v1747_v20 }
 0xe3b   :  { %4609 = vrsqrt.f32 %v1518_v24  ;;  %v1766_v24 = vld [vmem:[%s7025_s2 + $0xd8] sm:$0xff] }
 0xe45   :  { %v4610_v29 = vpop.eup %4609 }
 0xe46   :  { %v1521_v30 = vmul.f32 %v4610_v29, %v1511_v52  ;;  %v1520_v33 = vmul.f32 %v4610_v29, %v1510_v51  ;;  %v1756_v51 = vld [vmem:[%s7025_s2 + $0x88] sm:$0xff]  ;;  %v1739_v52 = vld [vmem:[%s7025_s2] sm:$0xff] }
 0xe47   :  { %v4132_v53 = vpack.c.bf16 %v1756_v51, %v1755_v50  ;;  %v4134_v57 = vpack.c.bf16 %v1740_v54, %v1739_v52  ;;  %v1768_v29 = vld [vmem:[%s7025_s2 + $0xe8] sm:$0xff] }
 0xe48   :  { %v1534_v35 = vmul.f32 %v1530_v28, %v1521_v30  ;;  %v1533_v37 = vmul.f32 %v1526_v27, %v1520_v33  ;;  %v4152_v27 = vpack.c.bf16 %v1766_v24, %v1765_v22  ;;  %v1767_v28 = vld [vmem:[%s7025_s2 + $0xe0] sm:$0xff]  ;;  %v4154_v30 = vpack.c.bf16 %v1750_v26, %v1749_v25  ;;  %v1752_v33 = vld [vmem:[%s7025_s2 + $0x68] sm:$0xff] }
 0xe49   :  { %4133 = vmatprep.subr.bf16.mxu1 %v4132_v53 }
 0xe4a   :  { %v1547_v40 = vadd.f32 %v1543_v32, %v1534_v35  ;;  %v1546_v41 = vadd.f32 %v1539_v31, %v1533_v37  ;;  %4135 = vmatpush3.bf16.msra.mxu1 %v4134_v57  ;;  %v4156_v31 = vpack.c.bf16 %v1768_v29, %v1767_v28  ;;  %v1751_v32 = vld [vmem:[%s7025_s2 + $0x60] sm:$0xff]  ;;  %v1769_v35 = vld [vmem:[%s7025_s2 + $0xf0] sm:$0xff]  ;;  %v1770_v37 = vld [vmem:[%s7025_s2 + $0xf8] sm:$0xff] }
 0xe4b   :  { %4137 = vmatprep.subr.bf16.mxu1 %v4136_v58 }
 0xe4c   :  { %1688 = vmatprep.mubr.f32.mxu0 %v1547_v40  ;;  %v4158_v40 = vpack.c.bf16 %v1752_v33, %v1751_v32  ;;  %v2001_v32 = vld [vmem:[%s7026_s27 + $0x18] sm:$0xff]  ;;  %v1998_v33 = vld [vmem:[%s7026_s27] sm:$0xff] }
 0xe4d   :  { %1689 = vmatmul.mubr.f32.vlgmr.msra.gmra.mrb[4].mxu0 %v1546_v41  ;;  %v4160_v41 = vpack.c.bf16 %v1770_v37, %v1769_v35  ;;  %v2000_v37 = vld [vmem:[%s7026_s27 + $0x10] sm:$0xff] }
 0xe4e   :  { %4139 = vmatpush3.bf16.msra.mxu1 %v4138_v39  ;;  %v4164_v39 = vpack.c.bf16 %v1858_v38, %v1856_v61  ;;  %v2014_v38 = vld [vmem:[%s7026_s27 + $0x80] sm:$0xff] }
 0xe4f   :  { %4141 = vmatprep.subr.bf16.mxu1 %v4140_v62  ;;  %v1855_v62 = vld [vmem:[#allocation34] sm:$0xff] }
 0xe50   :  { %v4166_v3 = vpack.c.bf16 %v1857_v63, %v1855_v62  ;;  %v2019_v62 = vld [vmem:[%s7026_s27 + $0xa8] sm:$0xff]  ;;  %v2021_v63 = vld [vmem:[%s7026_s27 + $0xb8] sm:$0xff] }
 0xe52   :  { %4143 = vmatpush3.bf16.msra.mxu1 %v4142_v4  ;;  %v1860_v4 = vld [vmem:[#allocation34 + $0x28] sm:$0xff] }
 0xe53   :  { %4145 = vmatprep.subr.bf16.mxu1 %v4144_v13 }
 0xe56   :  { %4147 = vmatpush3.bf16.msra.mxu1 %v4146_v16 }
 0xe57   :  { %4149 = vmatprep.subr.bf16.mxu1 %v4148_v19  ;;  %v1863_v19 = vld [vmem:[#allocation35] sm:$0x3] }
 0xe58   :  { %v1868_v20 = vrot.slane %v1863_v19, %v6437_v34  ;;  %v1872_v21 = vrot.slane %v1863_v19, %v6440_v36  ;;  %v2033_v19 = vld [vmem:[%s7026_s27 + $0x118] sm:$0xff] }
 0xe5a   :  { %4151 = vmatpush3.bf16.msra.mxu1 %v4150_v23 }
 0xe5b   :  { %4153 = vmatprep.subr.bf16.mxu1 %v4152_v27 }
 0xe5e   :  { %4155 = vmatpush3.bf16.msra.mxu1 %v4154_v30 }
 0xe5f   :  { %4157 = vmatprep.subr.bf16.mxu1 %v4156_v31  ;;  %v1999_v31 = vld [vmem:[%s7026_s27 + $0x8] sm:$0xff] }
 0xe60   :  { %v4172_v35 = vpack.c.bf16 %v2001_v32, %v1999_v31  ;;  %v2036_v31 = vld [vmem:[%s7026_s27 + $0x130] sm:$0xff]  ;;  %v2039_v32 = vld [vmem:[%s7026_s27 + $0x148] sm:$0xff] }
 0xe62   :  { %4159 = vmatpush3.bf16.msra.mxu1 %v4158_v40  ;;  %v2003_v40 = vld [vmem:[%s7026_s27 + $0x28] sm:$0xff] }
 0xe63   :  { %4161 = vmatprep.subr.bf16.mxu1 %v4160_v41  ;;  %v2005_v41 = vld [vmem:[%s7026_s27 + $0x38] sm:$0xff] }
 0xf20   :  { %v1690_v45 = vpop.f32.mrb[4].mxu0 }
 0xf21   :  { %v1691_v46 = vadd.f32 %v1690_v45, %v1617_v43  ;;  %v1692_v47 = vpop.f32.mrb[5].mxu0  ;;  %v1754_v43 = vld [vmem:[%s7025_s2 + $0x78] sm:$0xff] }
 0xf22   :  { %v1693_v48 = vadd.f32 %v1692_v47, %v1621_v44  ;;  %v4162_v44 = vpack.c.bf16 %v1754_v43, %v1753_v42  ;;  %v4174_v42 = vpack.c.bf16 %v2000_v37, %v1998_v33  ;;  %v4176_v43 = vpack.c.bf16 %v2005_v41, %v2003_v40  ;;  %v2041_v33 = vld [vmem:[%s7026_s27 + $0x158] sm:$0xff]  ;;  %v2038_v40 = vld [vmem:[%s7026_s27 + $0x140] sm:$0xff]  ;;  %v2040_v41 = vld [vmem:[%s7026_s27 + $0x150] sm:$0xff] }
 0xf23   :  { %v4212_v37 = vpack.c.bf16 %v2041_v33, %v2039_v32  ;;  %v2062_v32 = vld [vmem:[#allocation40] sm:$0x3] }
 0xf24   :  { %v1697_v49 = vadd.f32 %v1693_v48, %v1691_v46  ;;  %4163 = vmatpush3.bf16.msra.mxu1 %v4162_v44  ;;  %v2002_v44 = vld [vmem:[%s7026_s27 + $0x20] sm:$0xff]  ;;  %v2067_v33 = vrot.slane %v2062_v32, %v6437_v34 }
 0xf25   :  { %4165 = vmatprep.subr.bf16.mxu1 %v4164_v39  ;;  %v2016_v39 = vld [vmem:[%s7026_s27 + $0x90] sm:$0xff] }
 0xf26   :  { %1698 = vadd.xlane.f32.xlu0 %v1697_v49  ;;  %v1696_v49 = vld [vmem:[#allocation31] sm:$0x3] }
 0xf27   :  { %v1730_v54 = vrot.slane %v1696_v49, %v6437_v34  ;;  %v1734_v55 = vrot.slane %v1696_v49, %v6440_v36 }
 0xfb3   :  { %v1699_v2 = vpop.xlane.xlu0 %1698 }
 0xfb4   :  { %v1700_v5 = vmul.f32 0.00390625, %v1699_v2  ;;  %v1862_v2 = vld [vmem:[#allocation34 + $0x38] sm:$0xff] }
 0xfb6   :  { %v1701_v6 = vsub.f32 %v1691_v46, %v1700_v5  ;;  %v1702_v7 = vsub.f32 %v1693_v48, %v1700_v5  ;;  %v1695_v48 = vld [vmem:[#allocation29] sm:$0x3]  ;;  %v4168_v5 = vpack.c.bf16 %v1862_v2, %v1860_v4  ;;  %v4192_v4 = vpack.c.bf16 %v2021_v63, %v2019_v62  ;;  %v2055_v63 = vld [vmem:[%s7026_s27 + $0x1c8] sm:$0xff] }
 0xfb7   :  { %v1717_v50 = vrot.slane %v1695_v48, %v6437_v34  ;;  %v1721_v51 = vrot.slane %v1695_v48, %v6440_v36  ;;  %v2018_v2 = vld [vmem:[%s7026_s27 + $0xa0] sm:$0xff] }
 0xfb8   :  { %v1703_v8 = vmul.f32 %v1701_v6, %v1701_v6  ;;  %v1704_v9 = vmul.f32 %v1702_v7, %v1702_v7 }
 0xfba   :  { %v1705_v10 = vadd.f32 %v1704_v9, %v1703_v8 }
 0xfbc   :  { %1706 = vadd.xlane.f32.xlu1 %v1705_v10  ;;  %v3469_v10 = vld [vmem:[#allocation32] ss:$0 sm:$0xff] }
0x1049   :  { %v1707_v45 = vpop.xlane.xlu1 %1706 }
0x104a   :  { %v1708_v46 = vmul.f32 0.00390625, %v1707_v45  ;;  %v2004_v45 = vld [vmem:[%s7026_s27 + $0x30] sm:$0xff] }
0x104b   :  { %v4178_v48 = vpack.c.bf16 %v2004_v45, %v2002_v44 }
0x104c   :  { %v1709_v47 = vadd.f32 1e-05, %v1708_v46  ;;  %v2007_v46 = vld [vmem:[%s7026_s27 + $0x48] sm:$0xff] }
0x104e   :  { %4611 = vrsqrt.f32 %v1709_v47  ;;  %v2009_v47 = vld [vmem:[%s7026_s27 + $0x58] sm:$0xff] }
0x104f   :  { %v4180_v49 = vpack.c.bf16 %v2009_v47, %v2007_v46 }
0x1058   :  { %v4612_v52 = vpop.eup %4611 }
0x1059   :  { %v1712_v53 = vmul.f32 %v4612_v52, %v1702_v7  ;;  %v1711_v56 = vmul.f32 %v4612_v52, %v1701_v6  ;;  %v1859_v6 = vld [vmem:[#allocation34 + $0x20] sm:$0xff]  ;;  %v1861_v7 = vld [vmem:[#allocation34 + $0x30] sm:$0xff] }
0x105a   :  { %v4170_v8 = vpack.c.bf16 %v1861_v7, %v1859_v6  ;;  %v2011_v52 = vld [vmem:[%s7026_s27 + $0x68] sm:$0xff]  ;;  %v2025_v7 = vld [vmem:[%s7026_s27 + $0xd8] sm:$0xff] }
0x105b   :  { %v1725_v57 = vmul.f32 %v1721_v51, %v1712_v53  ;;  %v1724_v58 = vmul.f32 %v1717_v50, %v1711_v56  ;;  %v2006_v50 = vld [vmem:[%s7026_s27 + $0x40] sm:$0xff]  ;;  %v2008_v51 = vld [vmem:[%s7026_s27 + $0x50] sm:$0xff]  ;;  %v2013_v53 = vld [vmem:[%s7026_s27 + $0x78] sm:$0xff] }
0x105c   :  { %v2010_v56 = vld [vmem:[%s7026_s27 + $0x60] sm:$0xff]  ;;  %v2023_v6 = vld [vmem:[%s7026_s27 + $0xc8] sm:$0xff] }
0x105d   :  { %v1738_v59 = vadd.f32 %v1734_v55, %v1725_v57  ;;  %v1737_v60 = vadd.f32 %v1730_v54, %v1724_v58  ;;  %v4182_v54 = vpack.c.bf16 %v2008_v51, %v2006_v50  ;;  %v4184_v55 = vpack.c.bf16 %v2013_v53, %v2011_v52  ;;  %v2012_v57 = vld [vmem:[%s7026_s27 + $0x70] sm:$0xff]  ;;  %v2015_v58 = vld [vmem:[%s7026_s27 + $0x88] sm:$0xff]  ;;  %v2045_v51 = vld [vmem:[%s7026_s27 + $0x178] sm:$0xff] }
0x105e   :  { %v2043_v50 = vld [vmem:[%s7026_s27 + $0x168] sm:$0xff]  ;;  %v2042_v53 = vld [vmem:[%s7026_s27 + $0x160] sm:$0xff] }
0x105f   :  { %1842 = vmatprep.mubr.f32.mxu1 %v1738_v59  ;;  %v1950_v24 = vmul.f32 2.0, %v1737_v60  ;;  %v1951_v27 = vmul.f32 2.0, %v1738_v59  ;;  %v2017_v59 = vld [vmem:[%s7026_s27 + $0x98] sm:$0xff]  ;;  %v4216_v52 = vpack.c.bf16 %v2045_v51, %v2043_v50 }
0x1060   :  { %1843 = vmatmul.mubr.f32.vlgmr.msra.gmra.mrb[8].mxu1 %v1737_v60  ;;  %v4186_v60 = vpack.c.bf16 %v2012_v57, %v2010_v56  ;;  %v4188_v61 = vpack.c.bf16 %v2017_v59, %v2015_v58  ;;  %v2046_v57 = vld [vmem:[%s7026_s27 + $0x180] sm:$0xff]  ;;  %v2048_v58 = vld [vmem:[%s7026_s27 + $0x190] sm:$0xff]  ;;  %v2051_v59 = vld [vmem:[%s7026_s27 + $0x1a8] sm:$0xff] }
0x1061   :  { %1943 = vmatprep.mubr.f32.mxu1 %v5798_v1  ;;  %4167 = vmatpush1.bf16.msra.mxu1 %v4166_v3  ;;  %v4190_v3 = vpack.c.bf16 %v2016_v39, %v2014_v38  ;;  %v2050_v38 = vld [vmem:[%s7026_s27 + $0x1a0] sm:$0xff]  ;;  %v2052_v39 = vld [vmem:[%s7026_s27 + $0x1b0] sm:$0xff]  ;;  %v2208_v50 = vld [vmem:[%s7027_s4 + $0x98] sm:$0xff] }
0x1062   :  { %4169 = vmatprep.subr.bf16.mxu1 %v4168_v5  ;;  %v2020_v5 = vld [vmem:[%s7026_s27 + $0xb0] sm:$0xff] }
0x1065   :  { %4171 = vmatpush1.bf16.msra.mxu1 %v4170_v8  ;;  %v4194_v8 = vpack.c.bf16 %v2020_v5, %v2018_v2  ;;  %v2054_v5 = vld [vmem:[%s7026_s27 + $0x1c0] sm:$0xff] }
0x1066   :  { %4173 = vmatprep.subr.bf16.mxu1 %v4172_v35 }
0x1133   :  { %v3599_v9 = vpop.f32.mrb[8].mxu1 }
0x1134   :  { %v3600_v11 = vpop.f32.mrb[9].mxu1 }
0x1135   :  { %v3601_v12 = vadd.f32 %v3600_v11, %v3599_v9  ;;  %v4196_v9 = vpack.c.bf16 %v2025_v7, %v2023_v6  ;;  %v2024_v11 = vld [vmem:[%s7026_s27 + $0xd0] sm:$0xff]  ;;  %v2059_v7 = vld [vmem:[%s7026_s27 + $0x1e8] sm:$0xff] }
0x1136   :  { %v2056_v6 = vld [vmem:[%s7026_s27 + $0x1d0] sm:$0xff] }
0x1137   :  { %v1845_v13 = vadd.f32 %v3601_v12, %v3469_v10  ;;  %v2022_v10 = vld [vmem:[%s7026_s27 + $0xc0] sm:$0xff]  ;;  %v2027_v12 = vld [vmem:[%s7026_s27 + $0xe8] sm:$0xff] }
0x1139   :  { %v3470_v14 = vmul.f32 -1.442695, %v1845_v13 }
0x113b   :  { %4613 = vpow2.f32 %v3470_v14  ;;  %v4198_v14 = vpack.c.bf16 %v2024_v11, %v2022_v10  ;;  %v2058_v11 = vld [vmem:[%s7026_s27 + $0x1e0] sm:$0xff] }
0x1145   :  { %v4614_v15 = vpop.eup %4613 }
0x1146   :  { %v1851_v16 = vadd.f32 1.0, %v4614_v15 }
0x1148   :  { %4615 = vrcp.f32 %v1851_v16  ;;  %v2026_v16 = vld [vmem:[%s7026_s27 + $0xe0] sm:$0xff] }
0x1152   :  { %v4616_v17 = vpop.eup %4615 }
0x1153   :  { %v1854_v18 = vmul.f32 %v4616_v17, %v1845_v13  ;;  %v2029_v13 = vld [vmem:[%s7026_s27 + $0xf8] sm:$0xff]  ;;  %v2028_v17 = vld [vmem:[%s7026_s27 + $0xf0] sm:$0xff] }
0x1154   :  { %v4200_v15 = vpack.c.bf16 %v2029_v13, %v2027_v12  ;;  %v2060_v12 = vld [vmem:[%s7026_s27 + $0x1f0] sm:$0xff] }
0x1155   :  { %3471 = vmatmul.mubr.msk.f32.vlgmr.msra.gmra.mrb[10].mxu1 %vm1875_vm2, %v1854_v18  ;;  %v2031_v18 = vld [vmem:[%s7026_s27 + $0x108] sm:$0xff]  ;;  %v4234_v13 = vpack.c.bf16 %v2060_v12, %v2058_v11  ;;  %v2197_v12 = vld [vmem:[%s7027_s4 + $0x40] sm:$0xff] }
0x1156   :  { %4175 = vmatpush1.bf16.msra.mxu1 %v4174_v42  ;;  %v4214_v42 = vpack.c.bf16 %v2040_v41, %v2038_v40 }
0x1157   :  { %4177 = vmatprep.subr.bf16.mxu1 %v4176_v43 }
0x115a   :  { %4179 = vmatpush1.bf16.msra.mxu1 %v4178_v48 }
0x115b   :  { %4181 = vmatprep.subr.bf16.mxu1 %v4180_v49 }
0x115e   :  { %4183 = vmatpush1.bf16.msra.mxu1 %v4182_v54  ;;  %v2044_v54 = vld [vmem:[%s7026_s27 + $0x170] sm:$0xff] }
0x115f   :  { %4185 = vmatprep.subr.bf16.mxu1 %v4184_v55  ;;  %v4218_v55 = vpack.c.bf16 %v2044_v54, %v2042_v53  ;;  %v2191_v53 = vld [vmem:[%s7027_s4 + $0x10] sm:$0xff]  ;;  %v2192_v54 = vld [vmem:[%s7027_s4 + $0x18] sm:$0xff] }
0x1162   :  { %4187 = vmatpush1.bf16.msra.mxu1 %v4186_v60  ;;  %v4222_v60 = vpack.c.bf16 %v2048_v58, %v2046_v57  ;;  %v2193_v57 = vld [vmem:[%s7027_s4 + $0x20] sm:$0xff]  ;;  %v2194_v58 = vld [vmem:[%s7027_s4 + $0x28] sm:$0xff] }
0x1163   :  { %4189 = vmatprep.subr.bf16.mxu1 %v4188_v61  ;;  %v2053_v61 = vld [vmem:[%s7026_s27 + $0x1b8] sm:$0xff] }
0x1164   :  { %v4224_v62 = vpack.c.bf16 %v2053_v61, %v2051_v59  ;;  %v4246_v59 = vpack.c.bf16 %v2194_v58, %v2193_v57  ;;  %v2307_v57 = vld [vmem:[#allocation46 + $0x10] sm:$0xff] }
0x1166   :  { %4191 = vmatpush1.bf16.msra.mxu1 %v4190_v3  ;;  %v2057_v3 = vld [vmem:[%s7026_s27 + $0x1d8] sm:$0xff] }
0x1167   :  { %4193 = vmatprep.subr.bf16.mxu1 %v4192_v4  ;;  %v4226_v4 = vpack.c.bf16 %v2052_v39, %v2050_v38  ;;  %v4228_v2 = vpack.c.bf16 %v2057_v3, %v2055_v63 }
0x116a   :  { %4195 = vmatpush1.bf16.msra.mxu1 %v4194_v8  ;;  %v2061_v8 = vld [vmem:[%s7026_s27 + $0x1f8] sm:$0xff] }
0x116b   :  { %4197 = vmatprep.subr.bf16.mxu1 %v4196_v9  ;;  %v4230_v9 = vpack.c.bf16 %v2056_v6, %v2054_v5  ;;  %v4232_v10 = vpack.c.bf16 %v2061_v8, %v2059_v7  ;;  %v2195_v6 = vld [vmem:[%s7027_s4 + $0x30] sm:$0xff]  ;;  %v2196_v7 = vld [vmem:[%s7027_s4 + $0x38] sm:$0xff] }
0x116c   :  { %v4250_v8 = vpack.c.bf16 %v2196_v7, %v2195_v6 }
0x116e   :  { %4199 = vmatpush1.bf16.msra.mxu1 %v4198_v14 }
0x116f   :  { %4201 = vmatprep.subr.bf16.mxu1 %v4200_v15 }
0x1228   :  { %v1945_v22 = vpop.f32.mrb[10].mxu1 }
0x1229   :  { %v1946_v23 = vadd.f32 %v1945_v22, %v1868_v20  ;;  %v1947_v25 = vpop.f32.mrb[11].mxu1  ;;  %v4202_v20 = vpack.c.bf16 %v2028_v17, %v2026_v16  ;;  %v2030_v22 = vld [vmem:[%s7026_s27 + $0x100] sm:$0xff]  ;;  %v1954_v17 = vld [vmem:[#allocation37] sm:$0x3] }
0x122a   :  { %v1948_v26 = vadd.f32 %v1947_v25, %v1872_v21  ;;  %v4204_v21 = vpack.c.bf16 %v2033_v19, %v2031_v18  ;;  %v2037_v25 = vld [vmem:[%s7026_s27 + $0x138] sm:$0xff]  ;;  %v1955_v18 = vld [vmem:[#allocation38] sm:$0x3]  ;;  %v1976_v19 = vrot.slane %v1954_v17, %v6437_v34 }
0x122b   :  { %v6602_v28 = vadd.f32 %v1950_v24, %v1946_v23  ;;  %v2032_v23 = vld [vmem:[%s7026_s27 + $0x110] sm:$0xff]  ;;  %v2035_v24 = vld [vmem:[%s7026_s27 + $0x128] sm:$0xff]  ;;  %4203 = vmatpush1.bf16.msra.mxu1 %v4202_v20  ;;  %v1980_v20 = vrot.slane %v1954_v17, %v6440_v36 }
0x122c   :  { %v6604_v29 = vadd.f32 %v1951_v27, %v1948_v26  ;;  %v4206_v26 = vpack.c.bf16 %v2032_v23, %v2030_v22  ;;  %4205 = vmatprep.subr.bf16.mxu1 %v4204_v21  ;;  %v4208_v27 = vpack.c.bf16 %v2037_v25, %v2035_v24  ;;  %v1989_v23 = vrot.slane %v1955_v18, %v6437_v34  ;;  %v2199_v17 = vld [vmem:[%s7027_s4 + $0x50] sm:$0xff] }
0x122d   :  { %v1993_v24 = vrot.slane %v1955_v18, %v6440_v36  ;;  %v2200_v18 = vld [vmem:[%s7027_s4 + $0x58] sm:$0xff] }
0x122e   :  { %v1956_v30 = vadd.f32 %v6604_v29, %v6602_v28 }
0x122f   :  { %4207 = vmatpush1.bf16.msra.mxu1 %v4206_v26 }
0x1230   :  { %1957 = vadd.xlane.f32.xlu0 %v1956_v30  ;;  %v2034_v30 = vld [vmem:[%s7026_s27 + $0x120] sm:$0xff]  ;;  %4209 = vmatprep.subr.bf16.mxu1 %v4208_v27 }
0x1231   :  { %v4210_v35 = vpack.c.bf16 %v2036_v31, %v2034_v30 }
0x1233   :  { %4211 = vmatpush1.bf16.msra.mxu1 %v4210_v35  ;;  %v2071_v35 = vrot.slane %v2062_v32, %v6440_v36  ;;  %v2203_v32 = vld [vmem:[%s7027_s4 + $0x70] sm:$0xff] }
0x1234   :  { %4213 = vmatprep.subr.bf16.mxu1 %v4212_v37 }
0x1237   :  { %4215 = vmatpush1.bf16.msra.mxu1 %v4214_v42 }
0x1238   :  { %4217 = vmatprep.subr.bf16.mxu1 %v4216_v52 }
0x123b   :  { %4219 = vmatpush1.bf16.msra.mxu1 %v4218_v55  ;;  %v2209_v55 = vld [vmem:[%s7027_s4 + $0xa0] sm:$0xff] }
0x12bd   :  { %v1958_v43 = vpop.xlane.xlu0 %1957 }
0x12be   :  { %v1959_v44 = vmul.f32 0.00390625, %v1958_v43 }
0x12c0   :  { %v1960_v45 = vsub.f32 %v6602_v28, %v1959_v44  ;;  %v1961_v46 = vsub.f32 %v6604_v29, %v1959_v44  ;;  %v2047_v28 = vld [vmem:[%s7026_s27 + $0x188] sm:$0xff]  ;;  %v2049_v29 = vld [vmem:[%s7026_s27 + $0x198] sm:$0xff]  ;;  %v2205_v44 = vld [vmem:[%s7027_s4 + $0x80] sm:$0xff] }
0x12c1   :  { %v4220_v56 = vpack.c.bf16 %v2049_v29, %v2047_v28  ;;  %v2210_v28 = vld [vmem:[%s7027_s4 + $0xa8] sm:$0xff]  ;;  %v4242_v29 = vpack.c.bf16 %v2192_v54, %v2191_v53 }
0x12c2   :  { %v1962_v47 = vmul.f32 %v1960_v45, %v1960_v45  ;;  %v1963_v48 = vmul.f32 %v1961_v46, %v1961_v46 }
0x12c3   :  { %4221 = vmatprep.subr.bf16.mxu1 %v4220_v56  ;;  %v4244_v56 = vpack.c.bf16 %v2210_v28, %v2209_v55  ;;  %v2306_v55 = vld [vmem:[#allocation46 + $0x8] sm:$0xff]  ;;  %v2308_v28 = vld [vmem:[#allocation46 + $0x18] sm:$0xff] }
0x12c4   :  { %v1964_v49 = vadd.f32 %v1963_v48, %v1962_v47  ;;  %4223 = vmatpush1.bf16.msra.mxu1 %v4222_v60  ;;  %v2190_v48 = vld [vmem:[%s7027_s4 + $0x8] sm:$0xff] }
0x12c5   :  { %4225 = vmatprep.subr.bf16.mxu1 %v4224_v62 }
0x12c6   :  { %1965 = vadd.xlane.f32.xlu1 %v1964_v49  ;;  %v2207_v49 = vld [vmem:[%s7027_s4 + $0x90] sm:$0xff] }
0x12c7   :  { %v4240_v52 = vpack.c.bf16 %v2208_v50, %v2207_v49 }
0x12c8   :  { %4227 = vmatpush1.bf16.msra.mxu1 %v4226_v4  ;;  %v2211_v4 = vld [vmem:[%s7027_s4 + $0xb0] sm:$0xff] }
0x12c9   :  { %4229 = vmatprep.subr.bf16.mxu1 %v4228_v2  ;;  %v2212_v2 = vld [vmem:[%s7027_s4 + $0xb8] sm:$0xff] }
0x12ca   :  { %v4248_v5 = vpack.c.bf16 %v2212_v2, %v2211_v4 }
0x12cc   :  { %4231 = vmatpush1.bf16.msra.mxu1 %v4230_v9  ;;  %v2213_v9 = vld [vmem:[%s7027_s4 + $0xc0] sm:$0xff] }
0x12cd   :  { %4233 = vmatprep.subr.bf16.mxu1 %v4232_v10  ;;  %v2214_v10 = vld [vmem:[%s7027_s4 + $0xc8] sm:$0xff] }
0x12ce   :  { %v4252_v11 = vpack.c.bf16 %v2214_v10, %v2213_v9 }
0x12d0   :  { %4235 = vmatpush1.bf16.msra.mxu1 %v4234_v13  ;;  %v2198_v13 = vld [vmem:[%s7027_s4 + $0x48] sm:$0xff] }
0x1353   :  { %v1966_v14 = vpop.xlane.xlu1 %1965 }
0x1354   :  { %v1967_v15 = vmul.f32 0.00390625, %v1966_v14  ;;  %v2215_v14 = vld [vmem:[%s7027_s4 + $0xd0] sm:$0xff] }
0x1356   :  { %v1968_v16 = vadd.f32 1e-05, %v1967_v15  ;;  %v4254_v15 = vpack.c.bf16 %v2198_v13, %v2197_v12 }
0x1358   :  { %4617 = vrsqrt.f32 %v1968_v16  ;;  %v2216_v16 = vld [vmem:[%s7027_s4 + $0xd8] sm:$0xff] }
0x1362   :  { %v4618_v21 = vpop.eup %4617 }
0x1363   :  { %v1971_v22 = vmul.f32 %v4618_v21, %v1961_v46  ;;  %v1970_v25 = vmul.f32 %v4618_v21, %v1960_v45  ;;  %v2206_v45 = vld [vmem:[%s7027_s4 + $0x88] sm:$0xff]  ;;  %v2189_v46 = vld [vmem:[%s7027_s4] sm:$0xff] }
0x1364   :  { %v4236_v47 = vpack.c.bf16 %v2206_v45, %v2205_v44  ;;  %v4238_v51 = vpack.c.bf16 %v2190_v48, %v2189_v46  ;;  %v2218_v21 = vld [vmem:[%s7027_s4 + $0xe8] sm:$0xff] }
0x1365   :  { %v1984_v26 = vmul.f32 %v1980_v20, %v1971_v22  ;;  %v1983_v27 = vmul.f32 %v1976_v19, %v1970_v25  ;;  %v4256_v19 = vpack.c.bf16 %v2216_v16, %v2215_v14  ;;  %v2217_v20 = vld [vmem:[%s7027_s4 + $0xe0] sm:$0xff]  ;;  %v4258_v22 = vpack.c.bf16 %v2200_v18, %v2199_v17  ;;  %v2202_v25 = vld [vmem:[%s7027_s4 + $0x68] sm:$0xff] }
0x1366   :  { %4237 = vmatprep.subr.bf16.mxu0 %v4236_v47 }
0x1367   :  { %v1997_v30 = vadd.f32 %v1993_v24, %v1984_v26  ;;  %v1996_v31 = vadd.f32 %v1989_v23, %v1983_v27  ;;  %4239 = vmatpush3.bf16.msra.mxu0 %v4238_v51  ;;  %v4260_v23 = vpack.c.bf16 %v2218_v21, %v2217_v20  ;;  %v2201_v24 = vld [vmem:[%s7027_s4 + $0x60] sm:$0xff]  ;;  %v2219_v26 = vld [vmem:[%s7027_s4 + $0xf0] sm:$0xff]  ;;  %v2220_v27 = vld [vmem:[%s7027_s4 + $0xf8] sm:$0xff] }
0x1368   :  { %4241 = vmatprep.subr.bf16.mxu0 %v4240_v52 }
0x1369   :  { %2138 = vmatprep.mubr.f32.mxu1 %v1997_v30  ;;  %v4262_v30 = vpack.c.bf16 %v2202_v25, %v2201_v24  ;;  %v2450_v24 = vld [vmem:[%s7029_s10 + $0x18] sm:$0xff]  ;;  %v2447_v25 = vld [vmem:[%s7029_s10] sm:$0xff] }
0x136a   :  { %2139 = vmatmul.mubr.f32.vlgmr.msra.gmra.mrb[12].mxu1 %v1996_v31  ;;  %v4264_v31 = vpack.c.bf16 %v2220_v27, %v2219_v26  ;;  %v2449_v27 = vld [vmem:[%s7029_s10 + $0x10] sm:$0xff] }
0x136b   :  { %4243 = vmatpush3.bf16.msra.mxu0 %v4242_v29  ;;  %v4268_v29 = vpack.c.bf16 %v2308_v28, %v2306_v55  ;;  %v2463_v28 = vld [vmem:[%s7029_s10 + $0x80] sm:$0xff] }
0x136c   :  { %4245 = vmatprep.subr.bf16.mxu0 %v4244_v56  ;;  %v2305_v56 = vld [vmem:[#allocation46] sm:$0xff] }
0x136d   :  { %v4270_v58 = vpack.c.bf16 %v2307_v57, %v2305_v56  ;;  %v2468_v56 = vld [vmem:[%s7029_s10 + $0xa8] sm:$0xff]  ;;  %v2470_v57 = vld [vmem:[%s7029_s10 + $0xb8] sm:$0xff] }
0x136f   :  { %4247 = vmatpush3.bf16.msra.mxu0 %v4246_v59  ;;  %v2310_v59 = vld [vmem:[#allocation46 + $0x28] sm:$0xff] }
0x1370   :  { %4249 = vmatprep.subr.bf16.mxu0 %v4248_v5 }
0x1373   :  { %4251 = vmatpush3.bf16.msra.mxu0 %v4250_v8 }
0x1374   :  { %4253 = vmatprep.subr.bf16.mxu0 %v4252_v11  ;;  %v2313_v11 = vld [vmem:[%s7028_s7] sm:$0x3] }
0x1375   :  { %v2318_v12 = vrot.slane %v2313_v11, %v6437_v34  ;;  %v2322_v13 = vrot.slane %v2313_v11, %v6440_v36  ;;  %v2482_v11 = vld [vmem:[%s7029_s10 + $0x118] sm:$0xff] }
0x1377   :  { %4255 = vmatpush3.bf16.msra.mxu0 %v4254_v15 }
0x1378   :  { %4257 = vmatprep.subr.bf16.mxu0 %v4256_v19 }
0x137b   :  { %4259 = vmatpush3.bf16.msra.mxu0 %v4258_v22 }
0x137c   :  { %4261 = vmatprep.subr.bf16.mxu0 %v4260_v23  ;;  %v2448_v23 = vld [vmem:[%s7029_s10 + $0x8] sm:$0xff] }
0x137d   :  { %v4276_v26 = vpack.c.bf16 %v2450_v24, %v2448_v23  ;;  %v2485_v23 = vld [vmem:[%s7029_s10 + $0x130] sm:$0xff]  ;;  %v2488_v24 = vld [vmem:[%s7029_s10 + $0x148] sm:$0xff] }
0x137f   :  { %4263 = vmatpush3.bf16.msra.mxu0 %v4262_v30  ;;  %v2452_v30 = vld [vmem:[%s7029_s10 + $0x28] sm:$0xff] }
0x1380   :  { %4265 = vmatprep.subr.bf16.mxu0 %v4264_v31  ;;  %v2454_v31 = vld [vmem:[%s7029_s10 + $0x38] sm:$0xff] }
0x143d   :  { %v2140_v37 = vpop.f32.mrb[12].mxu1 }
0x143e   :  { %v2141_v40 = vadd.f32 %v2140_v37, %v2067_v33  ;;  %v2142_v41 = vpop.f32.mrb[13].mxu1  ;;  %v2204_v33 = vld [vmem:[%s7027_s4 + $0x78] sm:$0xff] }
0x143f   :  { %v2143_v42 = vadd.f32 %v2142_v41, %v2071_v35  ;;  %v4266_v35 = vpack.c.bf16 %v2204_v33, %v2203_v32  ;;  %v4278_v32 = vpack.c.bf16 %v2449_v27, %v2447_v25  ;;  %v4280_v33 = vpack.c.bf16 %v2454_v31, %v2452_v30  ;;  %v2490_v25 = vld [vmem:[%s7029_s10 + $0x158] sm:$0xff]  ;;  %v2487_v30 = vld [vmem:[%s7029_s10 + $0x140] sm:$0xff]  ;;  %v2489_v31 = vld [vmem:[%s7029_s10 + $0x150] sm:$0xff] }
0x1440   :  { %v4316_v27 = vpack.c.bf16 %v2490_v25, %v2488_v24  ;;  %v2511_v24 = vld [vmem:[%s7031_s15] sm:$0x3] }
0x1441   :  { %v2147_v43 = vadd.f32 %v2143_v42, %v2141_v40  ;;  %4267 = vmatpush3.bf16.msra.mxu0 %v4266_v35  ;;  %v2451_v35 = vld [vmem:[%s7029_s10 + $0x20] sm:$0xff]  ;;  %v2516_v25 = vrot.slane %v2511_v24, %v6437_v34 }
0x1442   :  { %4269 = vmatprep.subr.bf16.mxu0 %v4268_v29  ;;  %v2465_v29 = vld [vmem:[%s7029_s10 + $0x90] sm:$0xff] }
0x1443   :  { %2148 = vadd.xlane.f32.xlu0 %v2147_v43  ;;  %v2146_v43 = vld [vmem:[#allocation43] sm:$0x3] }
0x1444   :  { %v2180_v48 = vrot.slane %v2146_v43, %v6437_v34  ;;  %v2184_v49 = vrot.slane %v2146_v43, %v6440_v36 }
0x14d0   :  { %v2149_v60 = vpop.xlane.xlu0 %2148 }
0x14d1   :  { %v2150_v61 = vmul.f32 0.00390625, %v2149_v60  ;;  %v2312_v60 = vld [vmem:[#allocation46 + $0x38] sm:$0xff] }
0x14d3   :  { %v2151_v38 = vsub.f32 %v2141_v40, %v2150_v61  ;;  %v2152_v39 = vsub.f32 %v2143_v42, %v2150_v61  ;;  %v2145_v42 = vld [vmem:[#allocation41] sm:$0x3]  ;;  %v4272_v61 = vpack.c.bf16 %v2312_v60, %v2310_v59  ;;  %v4296_v59 = vpack.c.bf16 %v2470_v57, %v2468_v56  ;;  %v2467_v60 = vld [vmem:[%s7029_s10 + $0xa0] sm:$0xff]  ;;  %v2504_v57 = vld [vmem:[%s7029_s10 + $0x1c8] sm:$0xff] }
0x14d4   :  { %v2167_v44 = vrot.slane %v2145_v42, %v6437_v34  ;;  %v2171_v45 = vrot.slane %v2145_v42, %v6440_v36 }
0x14d5   :  { %v2153_v62 = vmul.f32 %v2151_v38, %v2151_v38  ;;  %v2154_v63 = vmul.f32 %v2152_v39, %v2152_v39 }
0x14d7   :  { %v2155_v3 = vadd.f32 %v2154_v63, %v2153_v62 }
0x14d9   :  { %2156 = vadd.xlane.f32.xlu1 %v2155_v3  ;;  %v3472_v3 = vld [vmem:[#allocation44] ss:$0 sm:$0xff] }
0x1566   :  { %v2157_v37 = vpop.xlane.xlu1 %2156 }
0x1567   :  { %v2158_v40 = vmul.f32 0.00390625, %v2157_v37  ;;  %v2453_v37 = vld [vmem:[%s7029_s10 + $0x30] sm:$0xff] }
0x1568   :  { %v4282_v42 = vpack.c.bf16 %v2453_v37, %v2451_v35 }
0x1569   :  { %v2159_v41 = vadd.f32 1e-05, %v2158_v40  ;;  %v2456_v40 = vld [vmem:[%s7029_s10 + $0x48] sm:$0xff] }
0x156b   :  { %4619 = vrsqrt.f32 %v2159_v41  ;;  %v2458_v41 = vld [vmem:[%s7029_s10 + $0x58] sm:$0xff] }
0x156c   :  { %v4284_v43 = vpack.c.bf16 %v2458_v41, %v2456_v40 }
0x1575   :  { %v4620_v46 = vpop.eup %4619 }
0x1576   :  { %v2162_v47 = vmul.f32 %v4620_v46, %v2152_v39  ;;  %v2161_v50 = vmul.f32 %v4620_v46, %v2151_v38  ;;  %v2309_v38 = vld [vmem:[#allocation46 + $0x20] sm:$0xff]  ;;  %v2311_v39 = vld [vmem:[#allocation46 + $0x30] sm:$0xff] }
0x1577   :  { %v4274_v62 = vpack.c.bf16 %v2311_v39, %v2309_v38  ;;  %v2460_v46 = vld [vmem:[%s7029_s10 + $0x68] sm:$0xff]  ;;  %v2474_v39 = vld [vmem:[%s7029_s10 + $0xd8] sm:$0xff] }
0x1578   :  { %v2175_v51 = vmul.f32 %v2171_v45, %v2162_v47  ;;  %v2174_v52 = vmul.f32 %v2167_v44, %v2161_v50  ;;  %v2455_v44 = vld [vmem:[%s7029_s10 + $0x40] sm:$0xff]  ;;  %v2457_v45 = vld [vmem:[%s7029_s10 + $0x50] sm:$0xff]  ;;  %v2462_v47 = vld [vmem:[%s7029_s10 + $0x78] sm:$0xff] }
0x1579   :  { %v2459_v50 = vld [vmem:[%s7029_s10 + $0x60] sm:$0xff]  ;;  %v2472_v38 = vld [vmem:[%s7029_s10 + $0xc8] sm:$0xff] }
0x157a   :  { %v2188_v53 = vadd.f32 %v2184_v49, %v2175_v51  ;;  %v2187_v54 = vadd.f32 %v2180_v48, %v2174_v52  ;;  %v4286_v48 = vpack.c.bf16 %v2457_v45, %v2455_v44  ;;  %v4288_v49 = vpack.c.bf16 %v2462_v47, %v2460_v46  ;;  %v2461_v51 = vld [vmem:[%s7029_s10 + $0x70] sm:$0xff]  ;;  %v2464_v52 = vld [vmem:[%s7029_s10 + $0x88] sm:$0xff]  ;;  %v2494_v45 = vld [vmem:[%s7029_s10 + $0x178] sm:$0xff] }
0x157b   :  { %v2492_v44 = vld [vmem:[%s7029_s10 + $0x168] sm:$0xff]  ;;  %v2491_v47 = vld [vmem:[%s7029_s10 + $0x160] sm:$0xff] }
0x157c   :  { %2292 = vmatprep.mubr.f32.mxu0 %v2188_v53  ;;  %v2399_v16 = vmul.f32 2.0, %v2187_v54  ;;  %v2400_v19 = vmul.f32 2.0, %v2188_v53  ;;  %v2466_v53 = vld [vmem:[%s7029_s10 + $0x98] sm:$0xff]  ;;  %v4320_v46 = vpack.c.bf16 %v2494_v45, %v2492_v44 }
0x157d   :  { %2293 = vmatmul.mubr.f32.vlgmr.msra.gmra.mrb[6].mxu0 %v2187_v54  ;;  %v4290_v54 = vpack.c.bf16 %v2461_v51, %v2459_v50  ;;  %v4292_v55 = vpack.c.bf16 %v2466_v53, %v2464_v52  ;;  %v2495_v51 = vld [vmem:[%s7029_s10 + $0x180] sm:$0xff]  ;;  %v2497_v52 = vld [vmem:[%s7029_s10 + $0x190] sm:$0xff]  ;;  %v2500_v53 = vld [vmem:[%s7029_s10 + $0x1a8] sm:$0xff] }
0x157e   :  { %2392 = vmatprep.mubr.f32.mxu0 %v5798_v1  ;;  %4271 = vmatpush1.bf16.msra.mxu0 %v4270_v58  ;;  %v4294_v58 = vpack.c.bf16 %v2465_v29, %v2463_v28  ;;  %v2499_v28 = vld [vmem:[%s7029_s10 + $0x1a0] sm:$0xff]  ;;  %v2501_v29 = vld [vmem:[%s7029_s10 + $0x1b0] sm:$0xff]  ;;  %v2657_v44 = vld [vmem:[%s7032_s29 + $0x98] sm:$0xff] }
0x157f   :  { %4273 = vmatprep.subr.bf16.mxu0 %v4272_v61  ;;  %v2469_v61 = vld [vmem:[%s7029_s10 + $0xb0] sm:$0xff] }
0x1582   :  { %4275 = vmatpush1.bf16.msra.mxu0 %v4274_v62  ;;  %v4298_v62 = vpack.c.bf16 %v2469_v61, %v2467_v60  ;;  %v2503_v61 = vld [vmem:[%s7029_s10 + $0x1c0] sm:$0xff] }
0x1583   :  { %4277 = vmatprep.subr.bf16.mxu0 %v4276_v26 }
0x1650   :  { %v3634_v63 = vpop.f32.mrb[6].mxu0 }
0x1651   :  { %v3635_v4 = vpop.f32.mrb[7].mxu0 }
0x1652   :  { %v3636_v2 = vadd.f32 %v3635_v4, %v3634_v63  ;;  %v4300_v63 = vpack.c.bf16 %v2474_v39, %v2472_v38  ;;  %v2473_v4 = vld [vmem:[%s7029_s10 + $0xd0] sm:$0xff]  ;;  %v2508_v39 = vld [vmem:[%s7029_s10 + $0x1e8] sm:$0xff] }
0x1653   :  { %v2505_v38 = vld [vmem:[%s7029_s10 + $0x1d0] sm:$0xff] }
0x1654   :  { %v2295_v5 = vadd.f32 %v3636_v2, %v3472_v3  ;;  %v2471_v3 = vld [vmem:[%s7029_s10 + $0xc0] sm:$0xff]  ;;  %v2476_v2 = vld [vmem:[%s7029_s10 + $0xe8] sm:$0xff] }
0x1656   :  { %v3473_v6 = vmul.f32 -1.442695, %v2295_v5 }
0x1658   :  { %4621 = vpow2.f32 %v3473_v6  ;;  %v4302_v6 = vpack.c.bf16 %v2473_v4, %v2471_v3  ;;  %v2507_v4 = vld [vmem:[%s7029_s10 + $0x1e0] sm:$0xff] }
0x1662   :  { %v4622_v7 = vpop.eup %4621 }
0x1663   :  { %v2301_v8 = vadd.f32 1.0, %v4622_v7 }
0x1665   :  { %4623 = vrcp.f32 %v2301_v8  ;;  %v2475_v8 = vld [vmem:[%s7029_s10 + $0xe0] sm:$0xff] }
0x166f   :  { %v4624_v9 = vpop.eup %4623 }
0x1670   :  { %v2304_v10 = vmul.f32 %v4624_v9, %v2295_v5  ;;  %v2478_v5 = vld [vmem:[%s7029_s10 + $0xf8] sm:$0xff]  ;;  %v2477_v9 = vld [vmem:[%s7029_s10 + $0xf0] sm:$0xff] }
0x1671   :  { %v4304_v7 = vpack.c.bf16 %v2478_v5, %v2476_v2  ;;  %v2509_v2 = vld [vmem:[%s7029_s10 + $0x1f0] sm:$0xff] }
0x1672   :  { %3474 = vmatmul.mubr.msk.f32.vlgmr.msra.gmra.mrb[8].mxu0 %vm1875_vm2, %v2304_v10  ;;  %v2480_v10 = vld [vmem:[%s7029_s10 + $0x108] sm:$0xff]  ;;  %v4338_v5 = vpack.c.bf16 %v2509_v2, %v2507_v4  ;;  %v2646_v2 = vld [vmem:[%s7032_s29 + $0x40] sm:$0xff] }
0x1673   :  { %4279 = vmatpush1.bf16.msra.mxu0 %v4278_v32  ;;  %v4318_v32 = vpack.c.bf16 %v2489_v31, %v2487_v30 }
0x1674   :  { %4281 = vmatprep.subr.bf16.mxu0 %v4280_v33 }
0x1677   :  { %4283 = vmatpush1.bf16.msra.mxu0 %v4282_v42 }
0x1678   :  { %4285 = vmatprep.subr.bf16.mxu0 %v4284_v43 }
0x167b   :  { %4287 = vmatpush1.bf16.msra.mxu0 %v4286_v48  ;;  %v2493_v48 = vld [vmem:[%s7029_s10 + $0x170] sm:$0xff] }
0x167c   :  { %4289 = vmatprep.subr.bf16.mxu0 %v4288_v49  ;;  %v4322_v49 = vpack.c.bf16 %v2493_v48, %v2491_v47  ;;  %v2640_v47 = vld [vmem:[%s7032_s29 + $0x10] sm:$0xff]  ;;  %v2641_v48 = vld [vmem:[%s7032_s29 + $0x18] sm:$0xff] }
0x167f   :  { %4291 = vmatpush1.bf16.msra.mxu0 %v4290_v54  ;;  %v4326_v54 = vpack.c.bf16 %v2497_v52, %v2495_v51  ;;  %v2642_v51 = vld [vmem:[%s7032_s29 + $0x20] sm:$0xff]  ;;  %v2643_v52 = vld [vmem:[%s7032_s29 + $0x28] sm:$0xff] }
0x1680   :  { %4293 = vmatprep.subr.bf16.mxu0 %v4292_v55  ;;  %v2502_v55 = vld [vmem:[%s7029_s10 + $0x1b8] sm:$0xff] }
0x1681   :  { %v4328_v56 = vpack.c.bf16 %v2502_v55, %v2500_v53  ;;  %v4350_v53 = vpack.c.bf16 %v2643_v52, %v2642_v51  ;;  %v2756_v51 = vld [vmem:[#allocation52 + $0x10] sm:$0xff] }
0x1683   :  { %4295 = vmatpush1.bf16.msra.mxu0 %v4294_v58  ;;  %v2506_v58 = vld [vmem:[%s7029_s10 + $0x1d8] sm:$0xff] }
0x1684   :  { %4297 = vmatprep.subr.bf16.mxu0 %v4296_v59  ;;  %v4330_v59 = vpack.c.bf16 %v2501_v29, %v2499_v28  ;;  %v4332_v60 = vpack.c.bf16 %v2506_v58, %v2504_v57 }
0x1687   :  { %4299 = vmatpush1.bf16.msra.mxu0 %v4298_v62  ;;  %v2510_v62 = vld [vmem:[%s7029_s10 + $0x1f8] sm:$0xff] }
0x1688   :  { %4301 = vmatprep.subr.bf16.mxu0 %v4300_v63  ;;  %v4334_v63 = vpack.c.bf16 %v2505_v38, %v2503_v61  ;;  %v4336_v3 = vpack.c.bf16 %v2510_v62, %v2508_v39  ;;  %v2644_v38 = vld [vmem:[%s7032_s29 + $0x30] sm:$0xff]  ;;  %v2645_v39 = vld [vmem:[%s7032_s29 + $0x38] sm:$0xff] }
0x1689   :  { %v4354_v62 = vpack.c.bf16 %v2645_v39, %v2644_v38  ;;  %v2767_v39 = vld [vmem:[#allocation52 + $0x68] sm:$0xff] }
0x168b   :  { %4303 = vmatpush1.bf16.msra.mxu0 %v4302_v6 }
0x168c   :  { %4305 = vmatprep.subr.bf16.mxu0 %v4304_v7 }
0x1745   :  { %v2394_v14 = vpop.f32.mrb[8].mxu0 }
0x1746   :  { %v2395_v15 = vadd.f32 %v2394_v14, %v2318_v12  ;;  %v2396_v17 = vpop.f32.mrb[9].mxu0  ;;  %v4306_v12 = vpack.c.bf16 %v2477_v9, %v2475_v8  ;;  %v2479_v14 = vld [vmem:[%s7029_s10 + $0x100] sm:$0xff] }
0x1747   :  { %v2397_v18 = vadd.f32 %v2396_v17, %v2322_v13  ;;  %v4308_v13 = vpack.c.bf16 %v2482_v11, %v2480_v10  ;;  %v2486_v17 = vld [vmem:[%s7029_s10 + $0x138] sm:$0xff]  ;;  %v2403_v9 = vld [vmem:[%s7030_s14] sm:$0x3]  ;;  %v2404_v10 = vld [vmem:[#allocation47] sm:$0x3] }
0x1748   :  { %v6721_v20 = vadd.f32 %v2399_v16, %v2395_v15  ;;  %v2481_v15 = vld [vmem:[%s7029_s10 + $0x110] sm:$0xff]  ;;  %v2484_v16 = vld [vmem:[%s7029_s10 + $0x128] sm:$0xff]  ;;  %4307 = vmatpush1.bf16.msra.mxu0 %v4306_v12  ;;  %v2425_v11 = vrot.slane %v2403_v9, %v6437_v34  ;;  %v2429_v12 = vrot.slane %v2403_v9, %v6440_v36 }
0x1749   :  { %v6723_v21 = vadd.f32 %v2400_v19, %v2397_v18  ;;  %v4310_v18 = vpack.c.bf16 %v2481_v15, %v2479_v14  ;;  %4309 = vmatprep.subr.bf16.mxu0 %v4308_v13  ;;  %v4312_v19 = vpack.c.bf16 %v2486_v17, %v2484_v16  ;;  %v2438_v15 = vrot.slane %v2404_v10, %v6437_v34  ;;  %v2648_v9 = vld [vmem:[%s7032_s29 + $0x50] sm:$0xff] }
0x174a   :  { %v2442_v16 = vrot.slane %v2404_v10, %v6440_v36  ;;  %v2649_v10 = vld [vmem:[%s7032_s29 + $0x58] sm:$0xff] }
0x174b   :  { %v2405_v22 = vadd.f32 %v6723_v21, %v6721_v20 }
0x174c   :  { %4311 = vmatpush1.bf16.msra.mxu0 %v4310_v18 }
0x174d   :  { %2406 = vadd.xlane.f32.xlu0 %v2405_v22  ;;  %v2483_v22 = vld [vmem:[%s7029_s10 + $0x120] sm:$0xff]  ;;  %4313 = vmatprep.subr.bf16.mxu0 %v4312_v19 }
0x174e   :  { %v4314_v26 = vpack.c.bf16 %v2485_v23, %v2483_v22 }
0x1750   :  { %4315 = vmatpush1.bf16.msra.mxu0 %v4314_v26  ;;  %v2520_v26 = vrot.slane %v2511_v24, %v6440_v36  ;;  %v2652_v24 = vld [vmem:[%s7032_s29 + $0x70] sm:$0xff] }
0x1751   :  { %4317 = vmatprep.subr.bf16.mxu0 %v4316_v27 }
0x1754   :  { %4319 = vmatpush1.bf16.msra.mxu0 %v4318_v32 }
0x1755   :  { %4321 = vmatprep.subr.bf16.mxu0 %v4320_v46 }
0x1758   :  { %4323 = vmatpush1.bf16.msra.mxu0 %v4322_v49  ;;  %v2658_v49 = vld [vmem:[%s7032_s29 + $0xa0] sm:$0xff] }
0x17da   :  { %v2407_v33 = vpop.xlane.xlu0 %2406 }
0x17db   :  { %v2408_v35 = vmul.f32 0.00390625, %v2407_v33 }
0x17dd   :  { %v2409_v37 = vsub.f32 %v6721_v20, %v2408_v35  ;;  %v2410_v40 = vsub.f32 %v6723_v21, %v2408_v35  ;;  %v2496_v20 = vld [vmem:[%s7029_s10 + $0x188] sm:$0xff]  ;;  %v2498_v21 = vld [vmem:[%s7029_s10 + $0x198] sm:$0xff]  ;;  %v2654_v35 = vld [vmem:[%s7032_s29 + $0x80] sm:$0xff] }
0x17de   :  { %v4324_v50 = vpack.c.bf16 %v2498_v21, %v2496_v20  ;;  %v2659_v20 = vld [vmem:[%s7032_s29 + $0xa8] sm:$0xff]  ;;  %v4346_v21 = vpack.c.bf16 %v2641_v48, %v2640_v47 }
0x17df   :  { %v2411_v41 = vmul.f32 %v2409_v37, %v2409_v37  ;;  %v2412_v42 = vmul.f32 %v2410_v40, %v2410_v40 }
0x17e0   :  { %4325 = vmatprep.subr.bf16.mxu0 %v4324_v50  ;;  %v4348_v50 = vpack.c.bf16 %v2659_v20, %v2658_v49  ;;  %v2755_v49 = vld [vmem:[#allocation52 + $0x8] sm:$0xff]  ;;  %v2757_v20 = vld [vmem:[#allocation52 + $0x18] sm:$0xff] }
0x17e1   :  { %v2413_v43 = vadd.f32 %v2412_v42, %v2411_v41  ;;  %4327 = vmatpush1.bf16.msra.mxu0 %v4326_v54  ;;  %v2639_v42 = vld [vmem:[%s7032_s29 + $0x8] sm:$0xff] }
0x17e2   :  { %4329 = vmatprep.subr.bf16.mxu0 %v4328_v56 }
0x17e3   :  { %2414 = vadd.xlane.f32.xlu1 %v2413_v43  ;;  %v2656_v43 = vld [vmem:[%s7032_s29 + $0x90] sm:$0xff] }
0x17e4   :  { %v4344_v46 = vpack.c.bf16 %v2657_v44, %v2656_v43 }
0x17e5   :  { %4331 = vmatpush1.bf16.msra.mxu0 %v4330_v59  ;;  %v2660_v59 = vld [vmem:[%s7032_s29 + $0xb0] sm:$0xff] }
0x17e6   :  { %4333 = vmatprep.subr.bf16.mxu0 %v4332_v60  ;;  %v2661_v60 = vld [vmem:[%s7032_s29 + $0xb8] sm:$0xff] }
0x17e7   :  { %v4352_v61 = vpack.c.bf16 %v2661_v60, %v2660_v59  ;;  %v2762_v60 = vld [vmem:[#allocation52 + $0x40] sm:$0xff] }
0x17e9   :  { %4335 = vmatpush1.bf16.msra.mxu0 %v4334_v63  ;;  %v2662_v63 = vld [vmem:[%s7032_s29 + $0xc0] sm:$0xff] }
0x17ea   :  { %4337 = vmatprep.subr.bf16.mxu0 %v4336_v3  ;;  %v2663_v3 = vld [vmem:[%s7032_s29 + $0xc8] sm:$0xff] }
0x17eb   :  { %v4356_v4 = vpack.c.bf16 %v2663_v3, %v2662_v63  ;;  %v2766_v3 = vld [vmem:[#allocation52 + $0x60] sm:$0xff] }
0x17ed   :  { %4339 = vmatpush1.bf16.msra.mxu0 %v4338_v5  ;;  %v2647_v5 = vld [vmem:[%s7032_s29 + $0x48] sm:$0xff] }
0x17ee   :  { %4420 = vmatprep.subr.bf16.mxu0 %v5796_v0 }
0x1870   :  { %v2415_v6 = vpop.xlane.xlu1 %2414 }
0x1871   :  { %v2416_v7 = vmul.f32 0.00390625, %v2415_v6  ;;  %v2664_v6 = vld [vmem:[%s7032_s29 + $0xd0] sm:$0xff] }
0x1873   :  { %v2417_v8 = vadd.f32 1e-05, %v2416_v7  ;;  %v4358_v7 = vpack.c.bf16 %v2647_v5, %v2646_v2 }
0x1875   :  { %4625 = vrsqrt.f32 %v2417_v8  ;;  %v2665_v8 = vld [vmem:[%s7032_s29 + $0xd8] sm:$0xff] }
0x187f   :  { %v4626_v13 = vpop.eup %4625 }
0x1880   :  { %v2420_v14 = vmul.f32 %v4626_v13, %v2410_v40  ;;  %v2419_v17 = vmul.f32 %v4626_v13, %v2409_v37  ;;  %v2655_v37 = vld [vmem:[%s7032_s29 + $0x88] sm:$0xff]  ;;  %v2638_v40 = vld [vmem:[%s7032_s29] sm:$0xff] }
0x1881   :  { %v4340_v41 = vpack.c.bf16 %v2655_v37, %v2654_v35  ;;  %v4342_v45 = vpack.c.bf16 %v2639_v42, %v2638_v40  ;;  %v2667_v13 = vld [vmem:[%s7032_s29 + $0xe8] sm:$0xff] }
0x1882   :  { %v2433_v18 = vmul.f32 %v2429_v12, %v2420_v14  ;;  %v2432_v19 = vmul.f32 %v2425_v11, %v2419_v17  ;;  %v4360_v11 = vpack.c.bf16 %v2665_v8, %v2664_v6  ;;  %v2666_v12 = vld [vmem:[%s7032_s29 + $0xe0] sm:$0xff]  ;;  %v4362_v14 = vpack.c.bf16 %v2649_v10, %v2648_v9  ;;  %v2651_v17 = vld [vmem:[%s7032_s29 + $0x68] sm:$0xff]  ;;  %v3475_v6 = vld [vmem:[#allocation50] ss:$0 sm:$0xff] }
0x1883   :  { %4341 = vmatprep.subr.bf16.mxu1 %v4340_v41 }
0x1884   :  { %v2446_v22 = vadd.f32 %v2442_v16, %v2433_v18  ;;  %v2445_v23 = vadd.f32 %v2438_v15, %v2432_v19  ;;  %4343 = vmatpush3.bf16.msra.mxu1 %v4342_v45  ;;  %v4364_v15 = vpack.c.bf16 %v2667_v13, %v2666_v12  ;;  %v2650_v16 = vld [vmem:[%s7032_s29 + $0x60] sm:$0xff]  ;;  %v2668_v18 = vld [vmem:[%s7032_s29 + $0xf0] sm:$0xff]  ;;  %v2669_v19 = vld [vmem:[%s7032_s29 + $0xf8] sm:$0xff] }
0x1885   :  { %4345 = vmatprep.subr.bf16.mxu1 %v4344_v46 }
0x1886   :  { %2587 = vmatprep.mubr.f32.mxu0 %v2446_v22  ;;  %v4366_v22 = vpack.c.bf16 %v2651_v17, %v2650_v16 }
0x1887   :  { %2588 = vmatmul.mubr.f32.vlgmr.msra.gmra.mrb[10].mxu0 %v2445_v23  ;;  %v4368_v23 = vpack.c.bf16 %v2669_v19, %v2668_v18 }
0x1888   :  { %3871 = vmatprep.mubr.msk.f32.mxu0 %vm5797_vm0, %v5798_v1  ;;  %4347 = vmatpush3.bf16.msra.mxu1 %v4346_v21  ;;  %v4372_v21 = vpack.c.bf16 %v2757_v20, %v2755_v49  ;;  %v2908_v20 = vld [vmem:[#allocation58 + $0x20] sm:$0xff] }
0x1889   :  { %4349 = vmatprep.subr.bf16.mxu1 %v4348_v50  ;;  %v2754_v50 = vld [vmem:[#allocation52] sm:$0xff] }
0x188a   :  { %v4374_v52 = vpack.c.bf16 %v2756_v51, %v2754_v50 }
0x188c   :  { %4351 = vmatpush3.bf16.msra.mxu1 %v4350_v53  ;;  %v2759_v53 = vld [vmem:[#allocation52 + $0x28] sm:$0xff] }
0x188d   :  { %4353 = vmatprep.subr.bf16.mxu1 %v4352_v61  ;;  %v2764_v61 = vld [vmem:[#allocation52 + $0x50] sm:$0xff] }
0x188e   :  { %v4382_v38 = vpack.c.bf16 %v2764_v61, %v2762_v60  ;;  %v2911_v60 = vld [vmem:[#allocation58 + $0x38] sm:$0xff] }
0x1890   :  { %4355 = vmatpush3.bf16.msra.mxu1 %v4354_v62  ;;  %v2769_v62 = vld [vmem:[#allocation52 + $0x78] sm:$0xff] }
0x1891   :  { %4357 = vmatprep.subr.bf16.mxu1 %v4356_v4  ;;  %v4384_v63 = vpack.c.bf16 %v2769_v62, %v2767_v39  ;;  %v2768_v4 = vld [vmem:[#allocation52 + $0x70] sm:$0xff] }
0x1892   :  { %v4386_v2 = vpack.c.bf16 %v2768_v4, %v2766_v3  ;;  %v2929_v39 = vld [vmem:[#allocation58 + $0xc8] sm:$0xff]  ;;  %v2930_v4 = vld [vmem:[#allocation58 + $0xd0] sm:$0xff] }
0x1893   :  { %v2913_v3 = vld [vmem:[#allocation58 + $0x48] sm:$0xff] }
0x1894   :  { %4359 = vmatpush3.bf16.msra.mxu1 %v4358_v7 }
0x1895   :  { %4361 = vmatprep.subr.bf16.mxu1 %v4360_v11 }
0x1898   :  { %4363 = vmatpush3.bf16.msra.mxu1 %v4362_v14 }
0x1899   :  { %4365 = vmatprep.subr.bf16.mxu1 %v4364_v15  ;;  %v2770_v15 = vld [vmem:[#allocation53] sm:$0x3] }
0x189a   :  { %v2775_v16 = vrot.slane %v2770_v15, %v6437_v34  ;;  %v2779_v17 = vrot.slane %v2770_v15, %v6440_v36  ;;  %v2934_v15 = vld [vmem:[#allocation58 + $0xf0] sm:$0xff] }
0x189c   :  { %4367 = vmatpush3.bf16.msra.mxu1 %v4366_v22 }
0x189d   :  { %4369 = vmatprep.subr.bf16.mxu1 %v4368_v23 }
0x195a   :  { %v2589_v27 = vpop.f32.mrb[10].mxu0 }
0x195b   :  { %v2590_v30 = vadd.f32 %v2589_v27, %v2516_v25  ;;  %v2591_v31 = vpop.f32.mrb[11].mxu0  ;;  %v2653_v25 = vld [vmem:[%s7032_s29 + $0x78] sm:$0xff] }
0x195c   :  { %v2592_v32 = vadd.f32 %v2591_v31, %v2520_v26  ;;  %v4370_v26 = vpack.c.bf16 %v2653_v25, %v2652_v24 }
0x195e   :  { %v2596_v33 = vadd.f32 %v2592_v32, %v2590_v30  ;;  %4371 = vmatpush3.bf16.msra.mxu1 %v4370_v26 }
0x195f   :  { %4373 = vmatprep.subr.bf16.mxu1 %v4372_v21  ;;  %v2909_v21 = vld [vmem:[#allocation58 + $0x28] sm:$0xff] }
0x1960   :  { %2597 = vadd.xlane.f32.xlu0 %v2596_v33  ;;  %v2595_v33 = vld [vmem:[#allocation49] sm:$0x3]  ;;  %v4398_v50 = vpack.c.bf16 %v2909_v21, %v2908_v20  ;;  %v3041_v20 = vld [vmem:[%s7034_s11 + $0x8] sm:$0xff]  ;;  %v3042_v21 = vld [vmem:[%s7034_s11 + $0x10] sm:$0xff] }
0x1961   :  { %v2629_v42 = vrot.slane %v2595_v33, %v6437_v34  ;;  %v2633_v43 = vrot.slane %v2595_v33, %v6440_v36  ;;  %v2904_v33 = vld [vmem:[#allocation58] sm:$0xff] }
0x19ed   :  { %v2598_v54 = vpop.xlane.xlu0 %2597 }
0x19ee   :  { %v2599_v55 = vmul.f32 0.00390625, %v2598_v54  ;;  %v2761_v54 = vld [vmem:[#allocation52 + $0x38] sm:$0xff] }
0x19f0   :  { %v2600_v28 = vsub.f32 %v2590_v30, %v2599_v55  ;;  %v2601_v29 = vsub.f32 %v2592_v32, %v2599_v55  ;;  %v2594_v32 = vld [vmem:[%s7033_s6] sm:$0x3]  ;;  %v4376_v55 = vpack.c.bf16 %v2761_v54, %v2759_v53 }
0x19f1   :  { %v2616_v35 = vrot.slane %v2594_v32, %v6437_v34  ;;  %v2620_v37 = vrot.slane %v2594_v32, %v6440_v36  ;;  %v2921_v32 = vld [vmem:[#allocation58 + $0x88] sm:$0xff] }
0x19f2   :  { %v2602_v56 = vmul.f32 %v2600_v28, %v2600_v28  ;;  %v2603_v57 = vmul.f32 %v2601_v29, %v2601_v29 }
0x19f4   :  { %v2604_v58 = vadd.f32 %v2603_v57, %v2602_v56  ;;  %v2763_v57 = vld [vmem:[#allocation52 + $0x48] sm:$0xff] }
0x19f6   :  { %2605 = vadd.xlane.f32.xlu1 %v2604_v58  ;;  %v2765_v58 = vld [vmem:[#allocation52 + $0x58] sm:$0xff] }
0x19f7   :  { %v4380_v59 = vpack.c.bf16 %v2765_v58, %v2763_v57  ;;  %v2927_v57 = vld [vmem:[#allocation58 + $0xb8] sm:$0xff] }
0x1a83   :  { %v2606_v27 = vpop.xlane.xlu1 %2605 }
0x1a84   :  { %v2607_v30 = vmul.f32 0.00390625, %v2606_v27 }
0x1a86   :  { %v2608_v31 = vadd.f32 1e-05, %v2607_v30 }
0x1a88   :  { %4627 = vrsqrt.f32 %v2608_v31  ;;  %v2920_v31 = vld [vmem:[#allocation58 + $0x80] sm:$0xff] }
0x1a92   :  { %v4628_v40 = vpop.eup %4627 }
0x1a93   :  { %v2611_v41 = vmul.f32 %v4628_v40, %v2601_v29  ;;  %v2610_v44 = vmul.f32 %v4628_v40, %v2600_v28  ;;  %v2758_v28 = vld [vmem:[#allocation52 + $0x20] sm:$0xff]  ;;  %v2760_v29 = vld [vmem:[#allocation52 + $0x30] sm:$0xff] }
0x1a94   :  { %v4378_v56 = vpack.c.bf16 %v2760_v29, %v2758_v28  ;;  %v2922_v40 = vld [vmem:[#allocation58 + $0x90] sm:$0xff] }
0x1a95   :  { %v2624_v45 = vmul.f32 %v2620_v37, %v2611_v41  ;;  %v2623_v46 = vmul.f32 %v2616_v35, %v2610_v44  ;;  %v4388_v35 = vpack.c.bf16 %v2921_v32, %v2920_v31  ;;  %v2905_v37 = vld [vmem:[#allocation58 + $0x8] sm:$0xff]  ;;  %v2923_v41 = vld [vmem:[#allocation58 + $0x98] sm:$0xff]  ;;  %v2906_v44 = vld [vmem:[#allocation58 + $0x10] sm:$0xff] }
0x1a97   :  { %v2637_v47 = vadd.f32 %v2633_v43, %v2624_v45  ;;  %v2636_v48 = vadd.f32 %v2629_v42, %v2623_v46  ;;  %v4390_v42 = vpack.c.bf16 %v2905_v37, %v2904_v33  ;;  %v4392_v43 = vpack.c.bf16 %v2923_v41, %v2922_v40  ;;  %v2907_v45 = vld [vmem:[#allocation58 + $0x18] sm:$0xff]  ;;  %v2924_v46 = vld [vmem:[#allocation58 + $0xa0] sm:$0xff] }
0x1a99   :  { %2741 = vmatprep.mubr.f32.mxu1 %v2637_v47  ;;  %v2856_v22 = vmul.f32 2.0, %v2636_v48  ;;  %v2857_v25 = vmul.f32 2.0, %v2637_v47  ;;  %v4394_v47 = vpack.c.bf16 %v2907_v45, %v2906_v44 }
0x1a9a   :  { %2742 = vmatmul.mubr.f32.vlgmr.msra.gmra.mrb[14].mxu1 %v2636_v48  ;;  %v2925_v48 = vld [vmem:[#allocation58 + $0xa8] sm:$0xff] }
0x1a9b   :  { %2849 = vmatprep.mubr.f32.mxu1 %v5798_v1  ;;  %4375 = vmatpush1.bf16.msra.mxu1 %v4374_v52  ;;  %v4396_v49 = vpack.c.bf16 %v2925_v48, %v2924_v46  ;;  %v3478_v48 = vld [vmem:[#allocation59] ss:$0 sm:$0xff] }
0x1a9c   :  { %4377 = vmatprep.subr.bf16.mxu1 %v4376_v55 }
0x1a9f   :  { %4379 = vmatpush1.bf16.msra.mxu1 %v4378_v56  ;;  %v2926_v56 = vld [vmem:[#allocation58 + $0xb0] sm:$0xff] }
0x1aa0   :  { %4381 = vmatprep.subr.bf16.mxu1 %v4380_v59  ;;  %v4400_v58 = vpack.c.bf16 %v2927_v57, %v2926_v56  ;;  %v2910_v59 = vld [vmem:[#allocation58 + $0x30] sm:$0xff] }
0x1aa1   :  { %v4402_v61 = vpack.c.bf16 %v2911_v60, %v2910_v59  ;;  %v3047_v59 = vld [vmem:[%s7034_s11 + $0x38] sm:$0xff] }
0x1aa3   :  { %4383 = vmatpush1.bf16.msra.mxu1 %v4382_v38  ;;  %v2928_v38 = vld [vmem:[#allocation58 + $0xc0] sm:$0xff] }
0x1aa4   :  { %4385 = vmatprep.subr.bf16.mxu1 %v4384_v63  ;;  %v4404_v62 = vpack.c.bf16 %v2929_v39, %v2928_v38  ;;  %v2912_v63 = vld [vmem:[#allocation58 + $0x40] sm:$0xff] }
0x1aa5   :  { %v3049_v38 = vld [vmem:[%s7034_s11 + $0x48] sm:$0xff] }
0x1aa7   :  { %4387 = vmatpush1.bf16.msra.mxu1 %v4386_v2  ;;  %v4406_v2 = vpack.c.bf16 %v2913_v3, %v2912_v63  ;;  %v3051_v63 = vld [vmem:[%s7034_s11 + $0x58] sm:$0xff] }
0x1aa8   :  { %4389 = vmatprep.subr.bf16.mxu1 %v4388_v35 }
0x1b6d   :  { %v3669_v5 = vpop.f32.mrb[14].mxu1 }
0x1b6e   :  { %v3670_v7 = vpop.f32.mrb[15].mxu1 }
0x1b6f   :  { %v3671_v8 = vadd.f32 %v3670_v7, %v3669_v5  ;;  %v2931_v5 = vld [vmem:[#allocation58 + $0xd8] sm:$0xff] }
0x1b70   :  { %v2915_v7 = vld [vmem:[#allocation58 + $0x58] sm:$0xff] }
0x1b71   :  { %v2744_v9 = vadd.f32 %v3671_v8, %v3475_v6  ;;  %v2914_v6 = vld [vmem:[#allocation58 + $0x50] sm:$0xff]  ;;  %v4408_v8 = vpack.c.bf16 %v2931_v5, %v2930_v4  ;;  %v3052_v4 = vld [vmem:[%s7034_s11 + $0x60] sm:$0xff] }
0x1b73   :  { %v3476_v10 = vmul.f32 -1.442695, %v2744_v9 }
0x1b75   :  { %4629 = vpow2.f32 %v3476_v10  ;;  %v2933_v10 = vld [vmem:[#allocation58 + $0xe8] sm:$0xff] }
0x1b7f   :  { %v4630_v11 = vpop.eup %4629 }
0x1b80   :  { %v2750_v12 = vadd.f32 1.0, %v4630_v11  ;;  %v4410_v11 = vpack.c.bf16 %v2915_v7, %v2914_v6  ;;  %v3054_v6 = vld [vmem:[%s7034_s11 + $0x70] sm:$0xff]  ;;  %v3055_v7 = vld [vmem:[%s7034_s11 + $0x78] sm:$0xff] }
0x1b82   :  { %4631 = vrcp.f32 %v2750_v12 }
0x1b8c   :  { %v4632_v13 = vpop.eup %4631 }
0x1b8d   :  { %v2753_v14 = vmul.f32 %v4632_v13, %v2744_v9  ;;  %v2932_v9 = vld [vmem:[#allocation58 + $0xe0] sm:$0xff] }
0x1b8e   :  { %v4412_v12 = vpack.c.bf16 %v2933_v10, %v2932_v9  ;;  %v2916_v13 = vld [vmem:[#allocation58 + $0x60] sm:$0xff] }
0x1b8f   :  { %3477 = vmatmul.mubr.msk.f32.vlgmr.msra.gmra.mrb[16].mxu1 %vm1019_vm1, %v2753_v14  ;;  %v2917_v14 = vld [vmem:[#allocation58 + $0x68] sm:$0xff] }
0x1b90   :  { %4391 = vmatpush3.bf16.msra.mxu1 %v4390_v42 }
0x1b91   :  { %4393 = vmatprep.subr.bf16.mxu1 %v4392_v43 }
0x1b94   :  { %4395 = vmatpush3.bf16.msra.mxu1 %v4394_v47 }
0x1b95   :  { %4397 = vmatprep.subr.bf16.mxu1 %v4396_v49  ;;  %v3040_v49 = vld [vmem:[%s7034_s11] sm:$0xff] }
0x1b98   :  { %4399 = vmatpush3.bf16.msra.mxu1 %v4398_v50  ;;  %v4421_v50 = vpack.c.bf16 %v3041_v20, %v3040_v49  ;;  %v3257_v20 = vld [vmem:[#allocation68] sm:$0xff] }
0x1b99   :  { %4401 = vmatprep.subr.bf16.mxu1 %v4400_v58  ;;  %v3046_v58 = vld [vmem:[%s7034_s11 + $0x30] sm:$0xff] }
0x1b9a   :  { %4422 = vmatpush3.bf16.msra.mxu0 %v4421_v50  ;;  %v4430_v60 = vpack.c.bf16 %v3047_v59, %v3046_v58  ;;  %v3259_v50 = vld [vmem:[#allocation68 + $0x10] sm:$0xff] }
0x1b9b   :  { %4423 = vmatprep.subr.bf16.mxu0 %v5796_v0  ;;  %v3263_v59 = vld [vmem:[#allocation68 + $0x30] sm:$0xff] }
0x1b9c   :  { %4403 = vmatpush3.bf16.msra.mxu1 %v4402_v61  ;;  %v3048_v61 = vld [vmem:[%s7034_s11 + $0x40] sm:$0xff] }
0x1b9d   :  { %4405 = vmatprep.subr.bf16.mxu1 %v4404_v62  ;;  %v4433_v39 = vpack.c.bf16 %v3049_v38, %v3048_v61  ;;  %v3050_v62 = vld [vmem:[%s7034_s11 + $0x50] sm:$0xff] }
0x1b9e   :  { %v4436_v3 = vpack.c.bf16 %v3051_v63, %v3050_v62  ;;  %v3265_v38 = vld [vmem:[#allocation68 + $0x40] sm:$0xff]  ;;  %v3267_v63 = vld [vmem:[#allocation68 + $0x50] sm:$0xff] }
0x1ba0   :  { %4407 = vmatpush3.bf16.msra.mxu1 %v4406_v2  ;;  %v3053_v2 = vld [vmem:[%s7034_s11 + $0x68] sm:$0xff] }
0x1ba1   :  { %4409 = vmatprep.subr.bf16.mxu1 %v4408_v8  ;;  %v4439_v5 = vpack.c.bf16 %v3053_v2, %v3052_v4  ;;  %v4442_v8 = vpack.c.bf16 %v3055_v7, %v3054_v6  ;;  %v3269_v2 = vld [vmem:[#allocation68 + $0x60] sm:$0xff]  ;;  %v3271_v7 = vld [vmem:[#allocation68 + $0x70] sm:$0xff] }
0x1ba4   :  { %4411 = vmatpush3.bf16.msra.mxu1 %v4410_v11 }
0x1ba5   :  { %4413 = vmatprep.subr.bf16.mxu1 %v4412_v12 }
0x1c62   :  { %v2851_v18 = vpop.f32.mrb[16].mxu1 }
0x1c63   :  { %v2852_v19 = vadd.f32 %v2851_v18, %v2775_v16  ;;  %v2853_v23 = vpop.f32.mrb[17].mxu1  ;;  %v2935_v16 = vld [vmem:[#allocation58 + $0xf8] sm:$0xff] }
0x1c64   :  { %v2854_v24 = vadd.f32 %v2853_v23, %v2779_v17  ;;  %v4414_v17 = vpack.c.bf16 %v2917_v14, %v2916_v13  ;;  %v4416_v18 = vpack.c.bf16 %v2935_v16, %v2934_v15  ;;  %v3479_v13 = vld [vmem:[#allocation61] ss:$0 sm:$0xff]  ;;  %v3480_v15 = vld [vmem:[#allocation62] ss:$0 sm:$0xff] }
0x1c65   :  { %v2858_v26 = vadd.f32 %v2856_v22, %v2852_v19  ;;  %v2918_v19 = vld [vmem:[#allocation58 + $0x70] sm:$0xff]  ;;  %v2919_v22 = vld [vmem:[#allocation58 + $0x78] sm:$0xff] }
0x1c66   :  { %v2859_v27 = vadd.f32 %v2857_v25, %v2854_v24  ;;  %4415 = vmatpush3.bf16.msra.mxu1 %v4414_v17  ;;  %v4418_v23 = vpack.c.bf16 %v2919_v22, %v2918_v19  ;;  %v3141_v19 = vld [vmem:[%s7035_s16 + $0x8] sm:$0xff] }
0x1c67   :  { %4417 = vmatprep.subr.bf16.mxu1 %v4416_v18  ;;  %v3140_v18 = vld [vmem:[%s7035_s16] sm:$0xff] }
0x1c68   :  { %v2862_v30 = vadd.f32 %v2859_v27, %v2858_v26  ;;  %v4445_v22 = vpack.c.bf16 %v3141_v19, %v3140_v18  ;;  %v3487_v19 = vld [vmem:[%s6118_s21] ss:$0 sm:$0xff] }
0x1c6a   :  { %2863 = vadd.xlane.f32.xlu0 %v2862_v30  ;;  %4419 = vmatpush3.bf16.msra.mxu1 %v4418_v23  ;;  %v2861_v30 = vld [vmem:[#allocation56] sm:$0x3]  ;;  %v3142_v23 = vld [vmem:[%s7035_s16 + $0x10] sm:$0xff] }
0x1c6b   :  { %4444 = vmatprep.subr.bf16.mxu1 %v5796_v0  ;;  %v2895_v37 = vrot.slane %v2861_v30, %v6437_v34  ;;  %v2899_v40 = vrot.slane %v2861_v30, %v6440_v36 }
0x1cf7   :  { %v2864_v51 = vpop.xlane.xlu0 %2863 }
0x1cf8   :  { %v2865_v52 = vmul.f32 0.00390625, %v2864_v51  ;;  %v3043_v51 = vld [vmem:[%s7034_s11 + $0x18] sm:$0xff] }
0x1cfa   :  { %v2866_v53 = vsub.f32 %v2858_v26, %v2865_v52  ;;  %v2867_v54 = vsub.f32 %v2859_v27, %v2865_v52  ;;  %v2860_v27 = vld [vmem:[#allocation55] sm:$0x3]  ;;  %v4424_v52 = vpack.c.bf16 %v3043_v51, %v3042_v21  ;;  %v3258_v21 = vld [vmem:[#allocation68 + $0x8] sm:$0xff] }
0x1cfb   :  { %v2882_v31 = vrot.slane %v2860_v27, %v6437_v34  ;;  %v2886_v32 = vrot.slane %v2860_v27, %v6440_v36  ;;  %v3145_v27 = vld [vmem:[%s7035_s16 + $0x28] sm:$0xff]  ;;  %v4457_v51 = vpack.c.bf16 %v3258_v21, %v3257_v20 }
0x1cfc   :  { %v2868_v55 = vmul.f32 %v2866_v53, %v2866_v53  ;;  %v2869_v28 = vmul.f32 %v2867_v54, %v2867_v54  ;;  %4425 = vmatpush3.bf16.msra.mxu0 %v4424_v52  ;;  %v3260_v52 = vld [vmem:[#allocation68 + $0x18] sm:$0xff] }
0x1cfd   :  { %4426 = vmatprep.subr.bf16.mxu0 %v5796_v0 }
0x1cfe   :  { %v2870_v29 = vadd.f32 %v2869_v28, %v2868_v55 }
0x1d00   :  { %2871 = vadd.xlane.f32.xlu1 %v2870_v29 }
0x1d8d   :  { %v2872_v24 = vpop.xlane.xlu1 %2871 }
0x1d8e   :  { %v2873_v25 = vmul.f32 0.00390625, %v2872_v24  ;;  %v3143_v24 = vld [vmem:[%s7035_s16 + $0x18] sm:$0xff] }
0x1d90   :  { %v2874_v26 = vadd.f32 1e-05, %v2873_v25  ;;  %v4448_v25 = vpack.c.bf16 %v3143_v24, %v3142_v23 }
0x1d92   :  { %4633 = vrsqrt.f32 %v2874_v26  ;;  %v3144_v26 = vld [vmem:[%s7035_s16 + $0x20] sm:$0xff] }
0x1d93   :  { %v4451_v30 = vpack.c.bf16 %v3145_v27, %v3144_v26 }
0x1d9c   :  { %v4634_v33 = vpop.eup %4633 }
0x1d9d   :  { %v2877_v35 = vmul.f32 %v4634_v33, %v2867_v54  ;;  %v2876_v41 = vmul.f32 %v4634_v33, %v2866_v53  ;;  %v3044_v53 = vld [vmem:[%s7034_s11 + $0x20] sm:$0xff]  ;;  %v3045_v54 = vld [vmem:[%s7034_s11 + $0x28] sm:$0xff] }
0x1d9e   :  { %v4427_v55 = vpack.c.bf16 %v3045_v54, %v3044_v53  ;;  %v3481_v33 = vld [vmem:[#allocation64] ss:$0 sm:$0xff]  ;;  %v4460_v53 = vpack.c.bf16 %v3260_v52, %v3259_v50  ;;  %v3261_v54 = vld [vmem:[#allocation68 + $0x20] sm:$0xff] }
0x1d9f   :  { %v2890_v42 = vmul.f32 %v2886_v32, %v2877_v35  ;;  %v2889_v43 = vmul.f32 %v2882_v31, %v2876_v41  ;;  %v3147_v31 = vld [vmem:[%s7035_s16 + $0x38] sm:$0xff] }
0x1da0   :  { %4428 = vmatpush3.bf16.msra.mxu0 %v4427_v55  ;;  %v3262_v55 = vld [vmem:[#allocation68 + $0x28] sm:$0xff] }
0x1da1   :  { %v2903_v44 = vadd.f32 %v2899_v40, %v2890_v42  ;;  %v2902_v45 = vadd.f32 %v2895_v37, %v2889_v43  ;;  %4429 = vmatprep.subr.bf16.mxu0 %v5796_v0 }
0x1da3   :  { %3007 = vmatprep.mubr.f32.mxu1 %v2903_v44 }
0x1da4   :  { %3008 = vmatmul.mubr.f32.vlgmr.msra.gmra.mrb[18].mxu1 %v2902_v45  ;;  %4431 = vmatpush3.bf16.msra.mxu0 %v4430_v60  ;;  %v3264_v60 = vld [vmem:[#allocation68 + $0x38] sm:$0xff] }
0x1da5   :  { %3890 = vmatprep.mubr.msk.f32.mxu1 %vm5797_vm0, %v5798_v1  ;;  %4432 = vmatprep.subr.bf16.mxu0 %v5796_v0  ;;  %v4466_v61 = vpack.c.bf16 %v3264_v60, %v3263_v59 }
0x1da6   :  { %4446 = vmatpush3.bf16.msra.mxu1 %v4445_v22 }
0x1da7   :  { %4447 = vmatprep.subr.bf16.mxu1 %v5796_v0 }
0x1da8   :  { %4434 = vmatpush3.bf16.msra.mxu0 %v4433_v39  ;;  %v3266_v39 = vld [vmem:[#allocation68 + $0x48] sm:$0xff] }
0x1da9   :  { %4435 = vmatprep.subr.bf16.mxu0 %v5796_v0  ;;  %v4469_v62 = vpack.c.bf16 %v3266_v39, %v3265_v38 }
0x1daa   :  { %4449 = vmatpush3.bf16.msra.mxu1 %v4448_v25 }
0x1dab   :  { %4450 = vmatprep.subr.bf16.mxu1 %v5796_v0 }
0x1dac   :  { %4437 = vmatpush3.bf16.msra.mxu0 %v4436_v3  ;;  %v3268_v3 = vld [vmem:[#allocation68 + $0x58] sm:$0xff] }
0x1dad   :  { %4438 = vmatprep.subr.bf16.mxu0 %v5796_v0  ;;  %v4472_v4 = vpack.c.bf16 %v3268_v3, %v3267_v63 }
0x1dae   :  { %4452 = vmatpush3.bf16.msra.mxu1 %v4451_v30 }
0x1daf   :  { %4453 = vmatprep.subr.bf16.mxu1 %v5796_v0 }
0x1db0   :  { %4440 = vmatpush3.bf16.msra.mxu0 %v4439_v5  ;;  %v3270_v5 = vld [vmem:[#allocation68 + $0x68] sm:$0xff] }
0x1db1   :  { %4441 = vmatprep.subr.bf16.mxu0 %v5796_v0  ;;  %v4475_v6 = vpack.c.bf16 %v3270_v5, %v3269_v2 }
0x1db4   :  { %4443 = vmatpush3.bf16.msra.mxu0 %v4442_v8  ;;  %v3272_v8 = vld [vmem:[#allocation68 + $0x78] sm:$0xff] }
0x1db5   :  { %4456 = vmatprep.subr.bf16.mxu0 %v5796_v0 }
0x1e77   :  { %v3704_v46 = vpop.f32.mrb[18].mxu1 }
0x1e78   :  { %v3705_v34 = vpop.f32.mrb[19].mxu1 }
0x1e79   :  { %v3706_v47 = vadd.f32 %v3705_v34, %v3704_v46  ;;  %v3483_v46 = vld [vmem:[#allocation65] ss:$0 sm:$0xff] }
0x1e7b   :  { %v3010_v36 = vadd.f32 %v3706_v47, %v3478_v48 }
0x1e7d   :  { %3015 = vadd.xlane.f32.xlu0 %v3010_v36 }
0x1f0a   :  { %v3016_v28 = vpop.xlane.xlu0 %3015 }
0x1f0b   :  { %v3017_v29 = vmul.f32 0.0078125, %v3016_v28  ;;  %v4463_v28 = vpack.c.bf16 %v3262_v55, %v3261_v54 }
0x1f0d   :  { %v3018_v56 = vsub.f32 %v3010_v36, %v3017_v29 }
0x1f0f   :  { %v3019_v57 = vmul.f32 %v3018_v56, %v3018_v56 }
0x1f11   :  { %3020 = vadd.xlane.f32.xlu1 %v3019_v57 }
0x1f9e   :  { %v3021_v9 = vpop.xlane.xlu1 %3020 }
0x1f9f   :  { %v3022_v10 = vmul.f32 0.0078125, %v3021_v9  ;;  %v4478_v9 = vpack.c.bf16 %v3272_v8, %v3271_v7 }
0x1fa1   :  { %v3023_v11 = vadd.f32 1e-05, %v3022_v10 }
0x1fa3   :  { %4635 = vrsqrt.f32 %v3023_v11 }
0x1fad   :  { %v4636_v12 = vpop.eup %4635 }
0x1fae   :  { %v3025_v14 = vmul.f32 %v4636_v12, %v3018_v56 }
0x1fb0   :  { %v3032_v16 = vmul.f32 %v3479_v13, %v3025_v14  ;;  %v3485_v14 = vld [vmem:[#allocation67] ss:$0 sm:$0xff] }
0x1fb2   :  { %v3039_v17 = vadd.f32 %v3480_v15, %v3032_v16  ;;  %v3486_v16 = vld [vmem:[%s6108_s5] ss:$0 sm:$0xff] }
0x1fb4   :  { %3872 = vmatmul.mubr.f32.vlgmr.msra.gmra.mrb[12].mxu0 %v3039_v17  ;;  %v3228_v36 = vmul.f32 2.0, %v3039_v17 }
0x1fb5   :  { %3925 = vmatprep.mubr.msk.f32.mxu0 %vm5797_vm0, %v5798_v1  ;;  %v3146_v1 = vld [vmem:[%s7035_s16 + $0x30] sm:$0xff]  ;;  %4458 = vmatpush3.bf16.msra.mxu0 %v4457_v51 }
0x1fb6   :  { %v4454_v32 = vpack.c.bf16 %v3147_v31, %v3146_v1  ;;  %4459 = vmatprep.subr.bf16.mxu0 %v5796_v0 }
0x1fb8   :  { %4455 = vmatpush3.bf16.msra.mxu1 %v4454_v32 }
0x1fb9   :  { %4461 = vmatpush3.bf16.msra.mxu0 %v4460_v53 }
0x1fba   :  { %4462 = vmatprep.subr.bf16.mxu0 %v5796_v0 }
0x1fbd   :  { %4464 = vmatpush3.bf16.msra.mxu0 %v4463_v28 }
0x1fbe   :  { %4465 = vmatprep.subr.bf16.mxu0 %v5796_v0 }
0x1fc1   :  { %4467 = vmatpush3.bf16.msra.mxu0 %v4466_v61 }
0x1fc2   :  { %4468 = vmatprep.subr.bf16.mxu0 %v5796_v0 }
0x1fc5   :  { %4470 = vmatpush3.bf16.msra.mxu0 %v4469_v62 }
0x1fc6   :  { %4471 = vmatprep.subr.bf16.mxu0 %v5796_v0 }
0x1fc9   :  { %4473 = vmatpush3.bf16.msra.mxu0 %v4472_v4 }
0x1fca   :  { %4474 = vmatprep.subr.bf16.mxu0 %v5796_v0 }
0x1fcd   :  { %4476 = vmatpush3.bf16.msra.mxu0 %v4475_v6 }
0x1fce   :  { %4477 = vmatprep.subr.bf16.mxu0 %v5796_v0 }
0x1fd1   :  { %4479 = vmatpush3.bf16.msra.mxu0 %v4478_v9 }
0x2087   :  { %v3129_v35 = vpop.f32.mrb[12].mxu0 }
0x2088   :  { %v3130_v37 = vadd.f32 %v3481_v33, %v3129_v35  ;;  %v3873_v40 = vpop.f32.mrb[13].mxu0 }
0x208a   :  { %v3482_v41 = vmul.f32 -1.442695, %v3130_v37 }
0x208c   :  { %4637 = vpow2.f32 %v3482_v41 }
0x2096   :  { %v4638_v42 = vpop.eup %4637 }
0x2097   :  { %v3136_v43 = vadd.f32 1.0, %v4638_v42 }
0x2099   :  { %4639 = vrcp.f32 %v3136_v43 }
0x20a3   :  { %v4640_v44 = vpop.eup %4639 }
0x20a4   :  { %v3139_v45 = vmul.f32 %v4640_v44, %v3130_v37 }
0x20a6   :  { %3891 = vmatmul.mubr.msk.f32.vlgmr.msra.gmra.mrb[20].mxu1 %vm1019_vm1, %v3139_v45 }
0x2179   :  { %v3224_v34 = vpop.f32.mrb[20].mxu1 }
0x217a   :  { %v3225_v48 = vadd.f32 %v3483_v46, %v3224_v34  ;;  %v3892_v47 = vpop.f32.mrb[21].mxu1 }
0x217c   :  { %v3229_v49 = vadd.f32 %v3228_v36, %v3225_v48 }
0x217e   :  { %3232 = vadd.xlane.f32.xlu0 %v3229_v49 }
0x220b   :  { %v3233_v29 = vpop.xlane.xlu0 %3232 }
0x220c   :  { %v3234_v56 = vmul.f32 0.0078125, %v3233_v29 }
0x220e   :  { %v3235_v57 = vsub.f32 %v3229_v49, %v3234_v56 }
0x2210   :  { %v3236_v58 = vmul.f32 %v3235_v57, %v3235_v57 }
0x2212   :  { %3237 = vadd.xlane.f32.xlu1 %v3236_v58 }
0x229f   :  { %v3238_v10 = vpop.xlane.xlu1 %3237 }
0x22a0   :  { %v3239_v11 = vmul.f32 0.0078125, %v3238_v10 }
0x22a2   :  { %v3240_v12 = vadd.f32 1e-05, %v3239_v11 }
0x22a4   :  { %4641 = vrsqrt.f32 %v3240_v12 }
0x22ae   :  { %v4642_v13 = vpop.eup %4641 }
0x22af   :  { %v3242_v15 = vmul.f32 %v4642_v13, %v3235_v57 }
0x22b1   :  { %v3249_v17 = vmul.f32 %v3485_v14, %v3242_v15 }
0x22b3   :  { %v3256_v18 = vadd.f32 %v3486_v16, %v3249_v17 }
0x22b5   :  { %3926 = vmatmul.mubr.f32.vlgmr.msra.gmra.mrb[14].mxu0 %v3256_v18 }
0x2388   :  { %v3346_v22 = vpop.f32.mrb[14].mxu0 }
0x2389   :  { %v3347_v23 = vadd.f32 %v3487_v19, %v3346_v22  ;;  %v3927_v24 = vpop.f32.mrb[15].mxu0 }
0x238b   :  { %v3488_v25 = vmul.f32 -1.442695, %v3347_v23 }
0x238d   :  { %4643 = vpow2.f32 %v3488_v25 }
0x2397   :  { %v4644_v26 = vpop.eup %4643 }
0x2398   :  { %v3353_v0 = vadd.f32 1.0, %v4644_v26 }
0x239a   :  { %4645 = vrcp.f32 %v3353_v0 }
0x23a4   :  { %v4646_v27 = vpop.eup %4645 }
0x23a5   :  { %3356 = vst [vmem:[#allocation70] sm:$0xff] %v4646_v27 }
0x23a6   :  { %5626 = shalt.err (!%p5623_p6)
}
0x23a7   :  { %s5627_s5 = scalar_lea.hbm %s6123_s12, 128 }
0x23a8   :  { %p5628_p7 = scmp.ne.s32.totalorder %s6123_s12, %s5627_s5  ;;  %p5631_p8 = scmp.lt.u32.totalorder %s5627_s5, %s6123_s12 }
0x23aa   :  { %p5633_p9 = pnand %p5631_p8, %p5628_p7 }
0x23ac   :  { %5636 = shalt.err (!%p5633_p9)
}
0x23ad   :  { %3366 = dma.vmem_to_hbm [thread:$0]  %s3364_s18, 128, %s6123_s12, [#allocation4]  }
0x23ae   :  { %5683 = dma.done.wait [#allocation4], 128  }
0x23af   :  { %5684 = vsyncadd [#allocation4], 4294967168 }
0x23b0   :  { %3370 = vsyncpa [#allocation3], 1 }
0x23b1   :  { %3371 = vsyncpa [#allocation6], 1 }
0x23b2   :  { %3372 = vsyncpa [#allocation9], 1 }
0x23b3   :  { %3373 = vsyncpa [#allocation12], 1 }
0x23b4   :  { %3374 = vsyncpa [#allocation15], 1 }
0x23b5   :  { %3375 = vsyncpa [#allocation18], 1 }
0x23b6   :  { %3376 = vsyncpa [#allocation21], 1 }
0x23b7   :  { %3377 = vsyncpa [#allocation24], 1 }
0x23b8   :  { %3378 = vsyncpa [#allocation27], 1 }
0x23b9   :  { %3379 = vsyncpa [#allocation30], 1 }
0x23ba   :  { %3380 = vsyncpa [#allocation33], 1 }
0x23bb   :  { %3381 = vsyncpa [#allocation36], 1 }
0x23bc   :  { %3382 = vsyncpa [#allocation39], 1 }
0x23bd   :  { %3383 = vsyncpa [#allocation42], 1 }
0x23be   :  { %3384 = vsyncpa [#allocation45], 1 }
0x23bf   :  { %3385 = vsyncpa [#allocation48], 1 }
0x23c0   :  { %3386 = vsyncpa [#allocation51], 1 }
0x23c1   :  { %3387 = vsyncpa [#allocation54], 1 }
0x23c2   :  { %3388 = vsyncpa [#allocation57], 1 }
0x23c3   :  { %3389 = vsyncpa [#allocation60], 1 }
0x23c4   :  { %3390 = vsyncpa [#allocation63], 1 }
0x23c5   :  { %3391 = vsyncpa [#allocation66], 1 }
0x23c6   :  { %3392 = vsyncpa [#allocation69], 1 }
0x23c7   :  { %3393 = vsyncpa [#allocation4], 1 }

</bundles_post_ra>
